<compile_context>
chip_gen: v7x
topology: tpu7x:2x2x1
jax: 0.10.0
libtpu: 0.0.40
codegen_flags: <defaults>
</compile_context>

<pallas_src>
import jax
import jax.numpy as jnp
from jax.experimental import pallas as pl
from jax.experimental.pallas import tpu as pltpu


# true hidden widths of the PyTorch module and their lane-padded counterparts
_HIDDEN_TRUE = (2000, 800, 200, 500)
_HIDDEN_PAD = (2048, 896, 256, 512)


def _round_up(n, m):
    return ((n + m - 1) // m) * m


def _relu(x):
    return jnp.maximum(x, 0.0)


def _softmax_last(x):
    # numerically stable softmax over the last axis (matches nn.Softmax on a
    # 2-D input, which reduces over dim=1)
    m = jnp.max(x, axis=-1, keepdims=True)
    e = jnp.exp(x - m)
    return e * pl.reciprocal(jnp.sum(e, axis=-1, keepdims=True), approx=False)


def policy_kernel(x_ref,
                  w1_ref, b1_ref,
                  w2_ref, b2_ref,
                  w3_ref, b3_ref,
                  w4_ref, b4_ref,
                  wh_ref, bh_ref,
                  out_ref):
    # bf16 weights, bf16 activations into the MXU, f32 accumulation.
    def dense(h, w_ref, b_ref):
        return jnp.dot(h.astype(jnp.bfloat16), w_ref[...],
                       preferred_element_type=jnp.float32) + b_ref[...]

    h = _relu(dense(x_ref[...], w1_ref, b1_ref))
    h = _relu(dense(h, w2_ref, b2_ref))
    h = _relu(dense(h, w3_ref, b3_ref))
    h = _relu(dense(h, w4_ref, b4_ref))

    # fused add|remove head: one matmul, softmax each half, one store
    logits = dense(h, wh_ref, bh_ref)                 # [TB, 2*output_size]
    half = logits.shape[-1] // 2
    out_ref[...] = jnp.concatenate(
        [_softmax_last(logits[:, :half]), _softmax_last(logits[:, half:])],
        axis=-1).astype(out_ref.dtype)


def _resident_spec(arr):
    # full-array block, constant block index -> stays VMEM-resident across grid
    return pl.BlockSpec(arr.shape, lambda i: (0, 0))


def policy_forward(x, params, *, batch_tile=128):
    """x: [batch, input_size] float32. params: output of prepare_params()."""
    batch, in_dim = x.shape
    two_out = params["wh"].shape[1]
    output_size = two_out // 2

    # pad batch to a sublane multiple, then to a multiple of the batch tile
    tb = min(_round_up(batch, 8), batch_tile)
    padded_b = _round_up(_round_up(batch, 8), tb)
    if padded_b != batch:
        x = jnp.pad(x, ((0, padded_b - batch), (0, 0)))

    flat_args = (
        x,
        params["w1"], params["b1"],
        params["w2"], params["b2"],
        params["w3"], params["b3"],
        params["w4"], params["b4"],
        params["wh"], params["bh"],
    )

    in_specs = [pl.BlockSpec((tb, in_dim), lambda i: (i, 0))]
    in_specs += [_resident_spec(a) for a in flat_args[1:]]
    out_specs = pl.BlockSpec((tb, two_out), lambda i: (i, 0))
    out_shape = jax.ShapeDtypeStruct((padded_b, two_out), jnp.float32)

    fused = pl.pallas_call(
        policy_kernel,
        out_shape=out_shape,
        grid=(padded_b // tb,),
        in_specs=in_specs,
        out_specs=out_specs,
        compiler_params=pltpu.CompilerParams(
            dimension_semantics=("parallel",),
            vmem_limit_bytes=32 << 20),
    )(*flat_args)

    fused = fused[:batch]
    return [fused[:, :output_size], fused[:, output_size:]]


def init_params(key, input_size, output_size):
    """f32 params at the true (unpadded) dims, mimicking nn.Linear's
    U(-1/sqrt(fan_in), +1/sqrt(fan_in)) init.  Weights are [in, out]
    (transpose of PyTorch layout), biases are [out]."""
    dims = [(input_size, 2000), (2000, 800), (800, 200), (200, 500),
            (500, output_size), (500, output_size)]
    names = ["1", "2", "3", "4", "a", "r"]
    params = {}
    for (fan_in, fan_out), name in zip(dims, names):
        key, kw, kb = jax.random.split(key, 3)
        bound = 1.0 / (float(fan_in) ** 0.5)
        params[f"w{name}"] = jax.random.uniform(
            kw, (fan_in, fan_out), jnp.float32, -bound, bound)
        params[f"b{name}"] = jax.random.uniform(
            kb, (fan_out,), jnp.float32, -bound, bound)
    return params


def prepare_params(raw, input_size, output_size):
    """Pad hidden dims to lane multiples, fuse the two heads, cast weights to
    bf16 (biases stay f32).  Zero padding preserves the original numerics."""
    h1, h2, h3, h4 = _HIDDEN_PAD

    def pad_w(w, rows, cols):
        return jnp.pad(w, ((0, rows - w.shape[0]), (0, cols - w.shape[1])))

    def pad_b(b, cols):
        return jnp.pad(b, (0, cols - b.shape[0])).reshape(1, cols)

    wh = jnp.concatenate([raw["wa"], raw["wr"]], axis=1)   # [500, 2*O]
    bh = jnp.concatenate([raw["ba"], raw["br"]], axis=0)   # [2*O]

    return {
        "w1": pad_w(raw["w1"], input_size, h1).astype(jnp.bfloat16),
        "b1": pad_b(raw["b1"], h1),
        "w2": pad_w(raw["w2"], h1, h2).astype(jnp.bfloat16),
        "b2": pad_b(raw["b2"], h2),
        "w3": pad_w(raw["w3"], h2, h3).astype(jnp.bfloat16),
        "b3": pad_b(raw["b3"], h3),
        "w4": pad_w(raw["w4"], h3, h4).astype(jnp.bfloat16),
        "b4": pad_b(raw["b4"], h4),
        "wh": pad_w(wh, h4, 2 * output_size).astype(jnp.bfloat16),
        "bh": bh.reshape(1, 2 * output_size),
    }


def _ref_forward(x, p):
    """Pure-JAX reference with identical bf16/padded arithmetic."""
    h = x
    for wn, bn in (("w1", "b1"), ("w2", "b2"), ("w3", "b3"), ("w4", "b4")):
        h = jnp.maximum(
            jnp.dot(h.astype(jnp.bfloat16), p[wn],
                    preferred_element_type=jnp.float32) + p[bn], 0.0)
    logits = jnp.dot(h.astype(jnp.bfloat16), p["wh"],
                     preferred_element_type=jnp.float32) + p["bh"]
    half = logits.shape[-1] // 2
    return (jax.nn.softmax(logits[:, :half], axis=-1),
            jax.nn.softmax(logits[:, half:], axis=-1))


if __name__ == "__main__":
    key = jax.random.PRNGKey(0)
    key, kx = jax.random.split(key)

    batch, input_size, output_size = 2, 32, 8
    x = jax.random.normal(kx, (batch, input_size), jnp.float32)
    raw = init_params(key, input_size, output_size)
    params = prepare_params(raw, input_size, output_size)

    out_add, out_rem = policy_forward(x, params)
    jax.block_until_ready(out_add)
    jax.block_until_ready(out_rem)

    assert out_add.shape == (batch, output_size)
    assert out_rem.shape == (batch, output_size)
    # softmax rows sum to 1
    assert jnp.allclose(jnp.sum(out_add, axis=-1), 1.0, atol=1e-5)
    assert jnp.allclose(jnp.sum(out_rem, axis=-1), 1.0, atol=1e-5)
    # match the pure-JAX reference (same bf16 weights / padding)
    ra, rr = _ref_forward(x, params)
    assert jnp.allclose(out_add, ra, atol=2e-3, rtol=2e-3)
    assert jnp.allclose(out_rem, rr, atol=2e-3, rtol=2e-3)

    print("KERNEL_OK")
</pallas_src>

<mosaic_0001>
module attributes {stable_mosaic.version = 11 : i64} {
  func.func @policy_kernel(%arg0: i32, %arg1: memref<8x32xf32, #tpu.memory_space<vmem>>, %arg2: memref<32x2048xbf16, #tpu.memory_space<vmem>>, %arg3: memref<1x2048xf32, #tpu.memory_space<vmem>>, %arg4: memref<2048x896xbf16, #tpu.memory_space<vmem>>, %arg5: memref<1x896xf32, #tpu.memory_space<vmem>>, %arg6: memref<896x256xbf16, #tpu.memory_space<vmem>>, %arg7: memref<1x256xf32, #tpu.memory_space<vmem>>, %arg8: memref<256x512xbf16, #tpu.memory_space<vmem>>, %arg9: memref<1x512xf32, #tpu.memory_space<vmem>>, %arg10: memref<512x16xbf16, #tpu.memory_space<vmem>>, %arg11: memref<1x16xf32, #tpu.memory_space<vmem>>, %arg12: memref<8x16xf32, #tpu.memory_space<vmem>>) attributes {dimension_semantics = [#tpu.dimension_semantics<parallel>], iteration_bounds = array<i64: 1>, scalar_prefetch = 0 : i64, scratch_operands = 0 : i64, tpu.core_type = #tpu.core_type<tc>, window_params = [{transform_indices = @transform_0, window_bounds = array<i64: 8, 32>}, {pipeline_mode = #tpu.pipeline_mode<synchronous>, transform_indices = @transform_1, window_bounds = array<i64: 32, 2048>}, {pipeline_mode = #tpu.pipeline_mode<synchronous>, transform_indices = @transform_2, window_bounds = array<i64: 1, 2048>}, {pipeline_mode = #tpu.pipeline_mode<synchronous>, transform_indices = @transform_3, window_bounds = array<i64: 2048, 896>}, {pipeline_mode = #tpu.pipeline_mode<synchronous>, transform_indices = @transform_4, window_bounds = array<i64: 1, 896>}, {pipeline_mode = #tpu.pipeline_mode<synchronous>, transform_indices = @transform_5, window_bounds = array<i64: 896, 256>}, {pipeline_mode = #tpu.pipeline_mode<synchronous>, transform_indices = @transform_6, window_bounds = array<i64: 1, 256>}, {pipeline_mode = #tpu.pipeline_mode<synchronous>, transform_indices = @transform_7, window_bounds = array<i64: 256, 512>}, {pipeline_mode = #tpu.pipeline_mode<synchronous>, transform_indices = @transform_8, window_bounds = array<i64: 1, 512>}, {pipeline_mode = #tpu.pipeline_mode<synchronous>, transform_indices = @transform_9, window_bounds = array<i64: 512, 16>}, {pipeline_mode = #tpu.pipeline_mode<synchronous>, transform_indices = @transform_10, window_bounds = array<i64: 1, 16>}, {transform_indices = @transform_11, window_bounds = array<i64: 8, 16>}]} {
    %c0 = arith.constant 0 : index
    %c0_0 = arith.constant 0 : index
    %0 = vector.load %arg1[%c0, %c0_0] : memref<8x32xf32, #tpu.memory_space<vmem>>, vector<8x32xf32>
    %1 = arith.truncf %0 : vector<8x32xf32> to vector<8x32xbf16>
    %c0_1 = arith.constant 0 : index
    %c0_2 = arith.constant 0 : index
    %2 = vector.load %arg2[%c0_1, %c0_2] : memref<32x2048xbf16, #tpu.memory_space<vmem>>, vector<32x2048xbf16>
    %cst = arith.constant dense<0.000000e+00> : vector<8x2048xf32>
    %3 = tpu.matmul %1, %2, %cst {dimension_numbers = #tpu.dot_dimension_numbers<[1], [0], [0], [1], [0, 0, 1, 1], [], []>} : vector<8x32xbf16>, vector<32x2048xbf16>, vector<8x2048xf32> -> vector<8x2048xf32>
    %c0_3 = arith.constant 0 : index
    %c0_4 = arith.constant 0 : index
    %4 = vector.load %arg3[%c0_3, %c0_4] : memref<1x2048xf32, #tpu.memory_space<vmem>>, vector<1x2048xf32>
    %5 = vector.broadcast %4 : vector<1x2048xf32> to vector<8x2048xf32>
    %6 = arith.addf %3, %5 : vector<8x2048xf32>
    %cst_5 = arith.constant 0.000000e+00 : f32
    %7 = vector.broadcast %cst_5 : f32 to vector<8x2048xf32>
    %8 = arith.maximumf %6, %7 : vector<8x2048xf32>
    %9 = arith.truncf %8 : vector<8x2048xf32> to vector<8x2048xbf16>
    %c0_6 = arith.constant 0 : index
    %c0_7 = arith.constant 0 : index
    %10 = vector.load %arg4[%c0_6, %c0_7] : memref<2048x896xbf16, #tpu.memory_space<vmem>>, vector<2048x896xbf16>
    %cst_8 = arith.constant dense<0.000000e+00> : vector<8x896xf32>
    %11 = tpu.matmul %9, %10, %cst_8 {dimension_numbers = #tpu.dot_dimension_numbers<[1], [0], [0], [1], [0, 0, 1, 1], [], []>} : vector<8x2048xbf16>, vector<2048x896xbf16>, vector<8x896xf32> -> vector<8x896xf32>
    %c0_9 = arith.constant 0 : index
    %c0_10 = arith.constant 0 : index
    %12 = vector.load %arg5[%c0_9, %c0_10] : memref<1x896xf32, #tpu.memory_space<vmem>>, vector<1x896xf32>
    %13 = vector.broadcast %12 : vector<1x896xf32> to vector<8x896xf32>
    %14 = arith.addf %11, %13 : vector<8x896xf32>
    %cst_11 = arith.constant 0.000000e+00 : f32
    %15 = vector.broadcast %cst_11 : f32 to vector<8x896xf32>
    %16 = arith.maximumf %14, %15 : vector<8x896xf32>
    %17 = arith.truncf %16 : vector<8x896xf32> to vector<8x896xbf16>
    %c0_12 = arith.constant 0 : index
    %c0_13 = arith.constant 0 : index
    %18 = vector.load %arg6[%c0_12, %c0_13] : memref<896x256xbf16, #tpu.memory_space<vmem>>, vector<896x256xbf16>
    %cst_14 = arith.constant dense<0.000000e+00> : vector<8x256xf32>
    %19 = tpu.matmul %17, %18, %cst_14 {dimension_numbers = #tpu.dot_dimension_numbers<[1], [0], [0], [1], [0, 0, 1, 1], [], []>} : vector<8x896xbf16>, vector<896x256xbf16>, vector<8x256xf32> -> vector<8x256xf32>
    %c0_15 = arith.constant 0 : index
    %c0_16 = arith.constant 0 : index
    %20 = vector.load %arg7[%c0_15, %c0_16] : memref<1x256xf32, #tpu.memory_space<vmem>>, vector<1x256xf32>
    %21 = vector.broadcast %20 : vector<1x256xf32> to vector<8x256xf32>
    %22 = arith.addf %19, %21 : vector<8x256xf32>
    %cst_17 = arith.constant 0.000000e+00 : f32
    %23 = vector.broadcast %cst_17 : f32 to vector<8x256xf32>
    %24 = arith.maximumf %22, %23 : vector<8x256xf32>
    %25 = arith.truncf %24 : vector<8x256xf32> to vector<8x256xbf16>
    %c0_18 = arith.constant 0 : index
    %c0_19 = arith.constant 0 : index
    %26 = vector.load %arg8[%c0_18, %c0_19] : memref<256x512xbf16, #tpu.memory_space<vmem>>, vector<256x512xbf16>
    %cst_20 = arith.constant dense<0.000000e+00> : vector<8x512xf32>
    %27 = tpu.matmul %25, %26, %cst_20 {dimension_numbers = #tpu.dot_dimension_numbers<[1], [0], [0], [1], [0, 0, 1, 1], [], []>} : vector<8x256xbf16>, vector<256x512xbf16>, vector<8x512xf32> -> vector<8x512xf32>
    %c0_21 = arith.constant 0 : index
    %c0_22 = arith.constant 0 : index
    %28 = vector.load %arg9[%c0_21, %c0_22] : memref<1x512xf32, #tpu.memory_space<vmem>>, vector<1x512xf32>
    %29 = vector.broadcast %28 : vector<1x512xf32> to vector<8x512xf32>
    %30 = arith.addf %27, %29 : vector<8x512xf32>
    %cst_23 = arith.constant 0.000000e+00 : f32
    %31 = vector.broadcast %cst_23 : f32 to vector<8x512xf32>
    %32 = arith.maximumf %30, %31 : vector<8x512xf32>
    %33 = arith.truncf %32 : vector<8x512xf32> to vector<8x512xbf16>
    %c0_24 = arith.constant 0 : index
    %c0_25 = arith.constant 0 : index
    %34 = vector.load %arg10[%c0_24, %c0_25] : memref<512x16xbf16, #tpu.memory_space<vmem>>, vector<512x16xbf16>
    %cst_26 = arith.constant dense<0.000000e+00> : vector<8x16xf32>
    %35 = tpu.matmul %33, %34, %cst_26 {dimension_numbers = #tpu.dot_dimension_numbers<[1], [0], [0], [1], [0, 0, 1, 1], [], []>} : vector<8x512xbf16>, vector<512x16xbf16>, vector<8x16xf32> -> vector<8x16xf32>
    %c0_27 = arith.constant 0 : index
    %c0_28 = arith.constant 0 : index
    %36 = vector.load %arg11[%c0_27, %c0_28] : memref<1x16xf32, #tpu.memory_space<vmem>>, vector<1x16xf32>
    %37 = vector.broadcast %36 : vector<1x16xf32> to vector<8x16xf32>
    %38 = arith.addf %35, %37 : vector<8x16xf32>
    %39 = vector.extract_strided_slice %38 {offsets = [0, 0], sizes = [8, 8], strides = [1, 1]} : vector<8x16xf32> to vector<8x8xf32>
    %cst_29 = arith.constant dense<0xFF800000> : vector<8xf32>
    %40 = vector.multi_reduction <maximumf>, %39, %cst_29 [1] : vector<8x8xf32> to vector<8xf32>
    %41 = vector.shape_cast %40 : vector<8xf32> to vector<8x1xf32>
    %42 = vector.broadcast %41 : vector<8x1xf32> to vector<8x8xf32>
    %43 = arith.subf %39, %42 : vector<8x8xf32>
    %44 = math.exp %43 : vector<8x8xf32>
    %cst_30 = arith.constant dense<0.000000e+00> : vector<8xf32>
    %45 = vector.multi_reduction <add>, %44, %cst_30 [1] : vector<8x8xf32> to vector<8xf32>
    %46 = vector.shape_cast %45 : vector<8xf32> to vector<8x1xf32>
    %47 = tpu.reciprocal %46 : vector<8x1xf32> -> vector<8x1xf32>
    %48 = vector.broadcast %47 : vector<8x1xf32> to vector<8x8xf32>
    %49 = arith.mulf %44, %48 : vector<8x8xf32>
    %50 = vector.extract_strided_slice %38 {offsets = [0, 8], sizes = [8, 8], strides = [1, 1]} : vector<8x16xf32> to vector<8x8xf32>
    %cst_31 = arith.constant dense<0xFF800000> : vector<8xf32>
    %51 = vector.multi_reduction <maximumf>, %50, %cst_31 [1] : vector<8x8xf32> to vector<8xf32>
    %52 = vector.shape_cast %51 : vector<8xf32> to vector<8x1xf32>
    %53 = vector.broadcast %52 : vector<8x1xf32> to vector<8x8xf32>
    %54 = arith.subf %50, %53 : vector<8x8xf32>
    %55 = math.exp %54 : vector<8x8xf32>
    %cst_32 = arith.constant dense<0.000000e+00> : vector<8xf32>
    %56 = vector.multi_reduction <add>, %55, %cst_32 [1] : vector<8x8xf32> to vector<8xf32>
    %57 = vector.shape_cast %56 : vector<8xf32> to vector<8x1xf32>
    %58 = tpu.reciprocal %57 : vector<8x1xf32> -> vector<8x1xf32>
    %59 = vector.broadcast %58 : vector<8x1xf32> to vector<8x8xf32>
    %60 = arith.mulf %55, %59 : vector<8x8xf32>
    %61 = tpu.concatenate %49, %60 in 1 : vector<8x8xf32>, vector<8x8xf32> -> vector<8x16xf32>
    %c0_33 = arith.constant 0 : index
    %c0_34 = arith.constant 0 : index
    %62 = vector.load %arg12[%c0_33, %c0_34] : memref<8x16xf32, #tpu.memory_space<vmem>>, vector<8x16xf32>
    tpu.vector_store %arg12[%c0_33, %c0_34], %61 {strides = array<i32>} : memref<8x16xf32, #tpu.memory_space<vmem>>, vector<8x16xf32>,
    return
  }
  func.func @transform_0(%arg0: i32) -> (i32, i32) {
    %c0_i32 = arith.constant 0 : i32
    %c0_i32_0 = arith.constant 0 : i32
    return %arg0, %c0_i32 : i32, i32
  }
  func.func @transform_1(%arg0: i32) -> (i32, i32) {
    %c0_i32 = arith.constant 0 : i32
    %c0_i32_0 = arith.constant 0 : i32
    %c0_i32_1 = arith.constant 0 : i32
    return %c0_i32, %c0_i32_0 : i32, i32
  }
  func.func @transform_2(%arg0: i32) -> (i32, i32) {
    %c0_i32 = arith.constant 0 : i32
    %c0_i32_0 = arith.constant 0 : i32
    %c0_i32_1 = arith.constant 0 : i32
    return %c0_i32, %c0_i32_0 : i32, i32
  }
  func.func @transform_3(%arg0: i32) -> (i32, i32) {
    %c0_i32 = arith.constant 0 : i32
    %c0_i32_0 = arith.constant 0 : i32
    %c0_i32_1 = arith.constant 0 : i32
    return %c0_i32, %c0_i32_0 : i32, i32
  }
  func.func @transform_4(%arg0: i32) -> (i32, i32) {
    %c0_i32 = arith.constant 0 : i32
    %c0_i32_0 = arith.constant 0 : i32
    %c0_i32_1 = arith.constant 0 : i32
    return %c0_i32, %c0_i32_0 : i32, i32
  }
  func.func @transform_5(%arg0: i32) -> (i32, i32) {
    %c0_i32 = arith.constant 0 : i32
    %c0_i32_0 = arith.constant 0 : i32
    %c0_i32_1 = arith.constant 0 : i32
    return %c0_i32, %c0_i32_0 : i32, i32
  }
  func.func @transform_6(%arg0: i32) -> (i32, i32) {
    %c0_i32 = arith.constant 0 : i32
    %c0_i32_0 = arith.constant 0 : i32
    %c0_i32_1 = arith.constant 0 : i32
    return %c0_i32, %c0_i32_0 : i32, i32
  }
  func.func @transform_7(%arg0: i32) -> (i32, i32) {
    %c0_i32 = arith.constant 0 : i32
    %c0_i32_0 = arith.constant 0 : i32
    %c0_i32_1 = arith.constant 0 : i32
    return %c0_i32, %c0_i32_0 : i32, i32
  }
  func.func @transform_8(%arg0: i32) -> (i32, i32) {
    %c0_i32 = arith.constant 0 : i32
    %c0_i32_0 = arith.constant 0 : i32
    %c0_i32_1 = arith.constant 0 : i32
    return %c0_i32, %c0_i32_0 : i32, i32
  }
  func.func @transform_9(%arg0: i32) -> (i32, i32) {
    %c0_i32 = arith.constant 0 : i32
    %c0_i32_0 = arith.constant 0 : i32
    %c0_i32_1 = arith.constant 0 : i32
    return %c0_i32, %c0_i32_0 : i32, i32
  }
  func.func @transform_10(%arg0: i32) -> (i32, i32) {
    %c0_i32 = arith.constant 0 : i32
    %c0_i32_0 = arith.constant 0 : i32
    %c0_i32_1 = arith.constant 0 : i32
    return %c0_i32, %c0_i32_0 : i32, i32
  }
  func.func @transform_11(%arg0: i32) -> (i32, i32) {
    %c0_i32 = arith.constant 0 : i32
    %c0_i32_0 = arith.constant 0 : i32
    return %arg0, %c0_i32 : i32, i32
  }
}

</mosaic_0001>

<bundles_post_ra>
// kernel: tpu_custom_call.1
= control target key start
LH: loop header
LB: loop body
LE: loop exit
PB: predicated region body
PF: predicated region fallthrough
CT: control target
= control target key end

     0   :  { %16 = vsyncpa [#allocation3], 0  ;;  %s13462_s0 = inlined_call_operand.hbm [shape: f32[8,32], index: 0, kind: input, shape index: {}]   ;;  %s13463_s1 = inlined_call_operand.hbm [shape: bf16[32,2048], index: 1, kind: input, shape index: {}]   ;;  %s13464_s2 = inlined_call_operand.hbm [shape: f32[1,2048], index: 2, kind: input, shape index: {}]   ;;  %s13465_s3 = inlined_call_operand.hbm [shape: bf16[2048,896], index: 3, kind: input, shape index: {}]   ;;  %s13466_s4 = inlined_call_operand.hbm [shape: f32[1,896], index: 4, kind: input, shape index: {}]   ;;  %s13467_s5 = inlined_call_operand.hbm [shape: bf16[896,256], index: 5, kind: input, shape index: {}]   ;;  %s13468_s6 = inlined_call_operand.hbm [shape: f32[1,256], index: 6, kind: input, shape index: {}]   ;;  %s13469_s7 = inlined_call_operand.hbm [shape: bf16[256,512], index: 7, kind: input, shape index: {}]   ;;  %s13470_s8 = inlined_call_operand.hbm [shape: f32[1,512], index: 8, kind: input, shape index: {}]   ;;  %s13471_s9 = inlined_call_operand.vmem [shape: bf16[512,16], index: 9, kind: input, shape index: {}]   ;;  %s13472_s10 = inlined_call_operand.hbm [shape: f32[1,16], index: 10, kind: input, shape index: {}]   ;;  %s13473_s11 = inlined_call_operand.hbm [shape: f32[8,16], index: 11, kind: output, shape index: {}]  }
   0x1   :  { %17 = vsyncpa [#allocation6], 0 }
   0x2   :  { %18 = vsyncpa [#allocation9], 0 }
   0x3   :  { %19 = vsyncpa [#allocation12], 0 }
   0x4   :  { %20 = vsyncpa [#allocation15], 0 }
   0x5   :  { %21 = vsyncpa [#allocation18], 0 }
   0x6   :  { %22 = vsyncpa [#allocation4], 0  ;;  %s12868_s17 = smov [#allocation5]   ;;  %s12612_s21 = scalar_lea.hbm %s13463_s1, 4096 }
   0x7   :  { %s38_s18 = sshll.u32 %s12868_s17, 4  ;;  %p12613_p0 = scmp.ne.s32.totalorder %s13463_s1, %s12612_s21  ;;  %s39_s18 = int_to_ptr.vmem [resolvable:$true] %s38_s18 }
   0x8   :  { %p12616_p1 = scmp.lt.u32.totalorder %s12612_s21, %s13463_s1 }
   0xa   :  { %p12618_p2 = pnand %p12616_p1, %p12613_p0 }
   0xc   :  { %12621 = shalt.err (!%p12618_p2)
}
   0xd   :  { %s12622_s26 = scalar_lea.vmem %s39_s18, 4096  ;;  %p12627_p4 = scmp.lt.s32.totalorder %s39_s18, %s39_s18 }
   0xe   :  { %p12623_p3 = scmp.ne.s32.totalorder %s39_s18, %s12622_s26  ;;  %p12628_p5 = scmp.lt.s32.totalorder %s12622_s26, %s12622_s26 }
  0x10   :  { %p12629_p6 = por %p12628_p5, %p12627_p4 }
  0x12   :  { %p12630_p7 = pnand %p12629_p6, %p12623_p3 }
  0x14   :  { %12633 = shalt.err (!%p12630_p7)
}
  0x15   :  { %s12869_s27 = smov 1024   ;;  %s12870_s28 = smov 64  }
  0x16   :  { %44 = dma.hbm_to_vmem [thread:$0]  %s13463_s1, 4096, %s39_s18, [#allocation6], %s12869_s27, %s12869_s27, %s12870_s28  }
  0x17   :  { %s12871_s12 = smov [#allocation8]   ;;  %s12634_s16 = scalar_lea.hbm %s13465_s3, 114688 }
  0x18   :  { %s60_s13 = sshll.u32 %s12871_s12, 4  ;;  %p12635_p8 = scmp.ne.s32.totalorder %s13465_s3, %s12634_s16  ;;  %s61_s13 = int_to_ptr.vmem [resolvable:$true] %s60_s13 }
  0x19   :  { %p12638_p9 = scmp.lt.u32.totalorder %s12634_s16, %s13465_s3 }
  0x1b   :  { %p12640_p10 = pnand %p12638_p9, %p12635_p8 }
  0x1d   :  { %12643 = shalt.err (!%p12640_p10)
}
  0x1e   :  { %s12644_s22 = scalar_lea.vmem %s61_s13, 114688  ;;  %p12649_p12 = scmp.lt.s32.totalorder %s61_s13, %s61_s13 }
  0x1f   :  { %p12645_p11 = scmp.ne.s32.totalorder %s61_s13, %s12644_s22  ;;  %p12650_p13 = scmp.lt.s32.totalorder %s12644_s22, %s12644_s22 }
  0x21   :  { %p12651_p0 = por %p12650_p13, %p12649_p12 }
  0x23   :  { %p12652_p1 = pnand %p12651_p0, %p12645_p11 }
  0x25   :  { %12655 = shalt.err (!%p12652_p1)
}
  0x26   :  { %s12872_s1 = smov 448   ;;  %s12873_s18 = smov 28  }
  0x27   :  { %66 = dma.hbm_to_vmem [thread:$0]  %s13465_s3, 114688, %s61_s13, [#allocation9], %s12872_s1, %s12872_s1, %s12873_s18  }
  0x28   :  { %s12874_s25 = smov [#allocation11]   ;;  %s12656_s29 = scalar_lea.hbm %s13467_s5, 14336 }
  0x29   :  { %s82_s26 = sshll.u32 %s12874_s25, 4  ;;  %p12657_p2 = scmp.ne.s32.totalorder %s13467_s5, %s12656_s29  ;;  %s83_s26 = int_to_ptr.vmem [resolvable:$true] %s82_s26 }
  0x2a   :  { %p12660_p3 = scmp.lt.u32.totalorder %s12656_s29, %s13467_s5 }
  0x2c   :  { %p12662_p4 = pnand %p12660_p3, %p12657_p2 }
  0x2e   :  { %12665 = shalt.err (!%p12662_p4)
}
  0x2f   :  { %s12666_s16 = scalar_lea.vmem %s83_s26, 14336  ;;  %p12671_p6 = scmp.lt.s32.totalorder %s83_s26, %s83_s26 }
  0x30   :  { %p12667_p5 = scmp.ne.s32.totalorder %s83_s26, %s12666_s16  ;;  %p12672_p7 = scmp.lt.s32.totalorder %s12666_s16, %s12666_s16 }
  0x32   :  { %p12673_p8 = por %p12672_p7, %p12671_p6 }
  0x34   :  { %p12674_p9 = pnand %p12673_p8, %p12667_p5 }
  0x36   :  { %12677 = shalt.err (!%p12674_p9)
}
  0x37   :  { %s12875_s3 = smov 128   ;;  %s12876_s13 = smov 8  }
  0x38   :  { %88 = dma.hbm_to_vmem [thread:$0]  %s13467_s5, 14336, %s83_s26, [#allocation12], %s12875_s3, %s12875_s3, %s12876_s13  }
  0x39   :  { %s12877_s20 = smov [#allocation14]   ;;  %s12678_s18 = scalar_lea.hbm %s13469_s7, 8192 }
  0x3a   :  { %s104_s21 = sshll.u32 %s12877_s20, 4  ;;  %p12679_p10 = scmp.ne.s32.totalorder %s13469_s7, %s12678_s18  ;;  %s105_s21 = int_to_ptr.vmem [resolvable:$true] %s104_s21 }
  0x3b   :  { %p12682_p11 = scmp.lt.u32.totalorder %s12678_s18, %s13469_s7 }
  0x3d   :  { %p12684_p12 = pnand %p12682_p11, %p12679_p10 }
  0x3f   :  { %12687 = shalt.err (!%p12684_p12)
}
  0x40   :  { %s12688_s28 = scalar_lea.vmem %s105_s21, 8192  ;;  %p12693_p0 = scmp.lt.s32.totalorder %s105_s21, %s105_s21 }
  0x41   :  { %p12689_p13 = scmp.ne.s32.totalorder %s105_s21, %s12688_s28  ;;  %p12694_p1 = scmp.lt.s32.totalorder %s12688_s28, %s12688_s28 }
  0x43   :  { %p12695_p2 = por %p12694_p1, %p12693_p0 }
  0x45   :  { %p12696_p3 = pnand %p12695_p2, %p12689_p13 }
  0x47   :  { %12699 = shalt.err (!%p12696_p3)
}
  0x48   :  { %s12878_s5 = smov 256   ;;  %s12879_s26 = smov 16  }
  0x49   :  { %110 = dma.hbm_to_vmem [thread:$0]  %s13469_s7, 8192, %s105_s21, [#allocation15], %s12878_s5, %s12878_s5, %s12879_s26  }
  0x4a   :  { %s12880_s12 = smov [#allocation2]   ;;  %s12881_s15 = smov [#allocation7]  }
  0x4b   :  { %s29_s14 = sshll.u32 %s12880_s12, 4  ;;  %s51_s16 = sshll.u32 %s12881_s15, 4  ;;  %s30_s14 = int_to_ptr.vmem [resolvable:$true] %s29_s14  ;;  %s52_s16 = int_to_ptr.vmem [resolvable:$true] %s51_s16 }
  0x4c   :  { %s12700_s17 = scalar_lea.hbm %s13462_s0, 128 }
  0x4d   :  { %p12701_p4 = scmp.ne.s32.totalorder %s13462_s0, %s12700_s17  ;;  %p12704_p5 = scmp.lt.u32.totalorder %s12700_s17, %s13462_s0 }
  0x4f   :  { %p12706_p6 = pnand %p12704_p5, %p12701_p4 }
  0x51   :  { %12709 = shalt.err (!%p12706_p6)
}
  0x52   :  { %s12710_s7 = scalar_lea.vmem %s30_s14, 128  ;;  %p12715_p8 = scmp.lt.s32.totalorder %s30_s14, %s30_s14 }
  0x53   :  { %p12711_p7 = scmp.ne.s32.totalorder %s30_s14, %s12710_s7  ;;  %p12716_p9 = scmp.lt.s32.totalorder %s12710_s7, %s12710_s7 }
  0x55   :  { %p12717_p10 = por %p12716_p9, %p12715_p8 }
  0x57   :  { %p12718_p11 = pnand %p12717_p10, %p12711_p7 }
  0x59   :  { %12721 = shalt.err (!%p12718_p11)
}
  0x5a   :  { %32 = dma.hbm_to_vmem [thread:$0]  %s13462_s0, 128, %s30_s14, [#allocation3]  }
  0x5b   :  { %s12722_s25 = scalar_lea.hbm %s13464_s2, 256 }
  0x5c   :  { %p12723_p12 = scmp.ne.s32.totalorder %s13464_s2, %s12722_s25  ;;  %p12726_p13 = scmp.lt.u32.totalorder %s12722_s25, %s13464_s2 }
  0x5e   :  { %p12728_p0 = pnand %p12726_p13, %p12723_p12 }
  0x60   :  { %12731 = shalt.err (!%p12728_p0)
}
  0x61   :  { %s12732_s29 = scalar_lea.vmem %s52_s16, 256  ;;  %p12737_p2 = scmp.lt.s32.totalorder %s52_s16, %s52_s16 }
  0x62   :  { %p12733_p1 = scmp.ne.s32.totalorder %s52_s16, %s12732_s29  ;;  %p12738_p3 = scmp.lt.s32.totalorder %s12732_s29, %s12732_s29 }
  0x64   :  { %p12739_p4 = por %p12738_p3, %p12737_p2 }
  0x66   :  { %p12740_p5 = pnand %p12739_p4, %p12733_p1 }
  0x68   :  { %12743 = shalt.err (!%p12740_p5)
}
  0x69   :  { %54 = dma.hbm_to_vmem [thread:$0]  %s13464_s2, 256, %s52_s16, [#allocation6]  }
  0x6a   :  { %s12882_s12 = smov [#allocation10]   ;;  %s12883_s15 = smov [#allocation13]  }
  0x6b   :  { %s73_s14 = sshll.u32 %s12882_s12, 4  ;;  %s95_s3 = sshll.u32 %s12883_s15, 4  ;;  %s74_s14 = int_to_ptr.vmem [resolvable:$true] %s73_s14  ;;  %s96_s3 = int_to_ptr.vmem [resolvable:$true] %s95_s3 }
  0x6c   :  { %s12744_s19 = scalar_lea.hbm %s13466_s4, 112 }
  0x6d   :  { %p12745_p6 = scmp.ne.s32.totalorder %s13466_s4, %s12744_s19  ;;  %p12748_p7 = scmp.lt.u32.totalorder %s12744_s19, %s13466_s4 }
  0x6f   :  { %p12750_p8 = pnand %p12748_p7, %p12745_p6 }
  0x71   :  { %12753 = shalt.err (!%p12750_p8)
}
  0x72   :  { %s12754_s2 = scalar_lea.vmem %s74_s14, 112  ;;  %s12758_s16 = scalar_lea.vmem %s74_s14, 128 }
  0x73   :  { %p12755_p9 = scmp.ne.s32.totalorder %s74_s14, %s12754_s2  ;;  %p12759_p10 = scmp.lt.s32.totalorder %s74_s14, %s74_s14 }
  0x74   :  { %p12760_p11 = scmp.lt.s32.totalorder %s12758_s16, %s12754_s2 }
  0x76   :  { %p12761_p12 = por %p12760_p11, %p12759_p10 }
  0x78   :  { %p12762_p13 = pnand %p12761_p12, %p12755_p9 }
  0x7a   :  { %12765 = shalt.err (!%p12762_p13)
}
  0x7b   :  { %76 = dma.hbm_to_vmem [thread:$0]  %s13466_s4, 112, %s74_s14, [#allocation9]  }
  0x7c   :  { %s12766_s25 = scalar_lea.hbm %s13468_s6, 32 }
  0x7d   :  { %p12767_p0 = scmp.ne.s32.totalorder %s13468_s6, %s12766_s25  ;;  %p12770_p1 = scmp.lt.u32.totalorder %s12766_s25, %s13468_s6 }
  0x7f   :  { %p12772_p2 = pnand %p12770_p1, %p12767_p0 }
  0x81   :  { %12775 = shalt.err (!%p12772_p2)
}
  0x82   :  { %s12776_s29 = scalar_lea.vmem %s96_s3, 32  ;;  %p12781_p4 = scmp.lt.s32.totalorder %s96_s3, %s96_s3 }
  0x83   :  { %p12777_p3 = scmp.ne.s32.totalorder %s96_s3, %s12776_s29  ;;  %p12782_p5 = scmp.lt.s32.totalorder %s12776_s29, %s12776_s29 }
  0x85   :  { %p12783_p6 = por %p12782_p5, %p12781_p4 }
  0x87   :  { %p12784_p7 = pnand %p12783_p6, %p12777_p3 }
  0x89   :  { %12787 = shalt.err (!%p12784_p7)
}
  0x8a   :  { %98 = dma.hbm_to_vmem [thread:$0]  %s13468_s6, 32, %s96_s3, [#allocation12]  }
  0x8b   :  { %s12884_s30 = smov [#allocation16]   ;;  %s12885_s14 = smov [#allocation17]  }
  0x8c   :  { %s117_s12 = sshll.u32 %s12884_s30, 4  ;;  %s129_s15 = sshll.u32 %s12885_s14, 4  ;;  %s118_s12 = int_to_ptr.vmem [resolvable:$true] %s117_s12  ;;  %s130_s15 = int_to_ptr.vmem [resolvable:$true] %s129_s15 }
  0x8d   :  { %s12788_s19 = scalar_lea.hbm %s13470_s8, 64 }
  0x8e   :  { %p12789_p8 = scmp.ne.s32.totalorder %s13470_s8, %s12788_s19  ;;  %p12792_p9 = scmp.lt.u32.totalorder %s12788_s19, %s13470_s8 }
  0x90   :  { %p12794_p10 = pnand %p12792_p9, %p12789_p8 }
  0x92   :  { %12797 = shalt.err (!%p12794_p10)
}
  0x93   :  { %s12798_s6 = scalar_lea.vmem %s118_s12, 64  ;;  %p12803_p12 = scmp.lt.s32.totalorder %s118_s12, %s118_s12 }
  0x94   :  { %p12799_p11 = scmp.ne.s32.totalorder %s118_s12, %s12798_s6  ;;  %p12804_p13 = scmp.lt.s32.totalorder %s12798_s6, %s12798_s6 }
  0x96   :  { %p12805_p0 = por %p12804_p13, %p12803_p12 }
  0x98   :  { %p12806_p1 = pnand %p12805_p0, %p12799_p11 }
  0x9a   :  { %12809 = shalt.err (!%p12806_p1)
}
  0x9b   :  { %120 = dma.hbm_to_vmem [thread:$0]  %s13470_s8, 64, %s118_s12, [#allocation15]  }
  0x9c   :  { %s12810_s18 = scalar_lea.hbm %s13472_s10, 16 }
  0x9d   :  { %p12811_p2 = scmp.ne.s32.totalorder %s13472_s10, %s12810_s18  ;;  %p12814_p3 = scmp.lt.u32.totalorder %s12810_s18, %s13472_s10 }
  0x9f   :  { %p12816_p4 = pnand %p12814_p3, %p12811_p2 }
  0xa1   :  { %12819 = shalt.err (!%p12816_p4)
}
  0xa2   :  { %s12820_s28 = scalar_lea.vmem %s130_s15, 16  ;;  %s12824_s5 = scalar_lea.vmem %s130_s15, 32 }
  0xa3   :  { %p12821_p5 = scmp.ne.s32.totalorder %s130_s15, %s12820_s28  ;;  %p12825_p6 = scmp.lt.s32.totalorder %s130_s15, %s130_s15 }
  0xa4   :  { %p12826_p7 = scmp.lt.s32.totalorder %s12824_s5, %s12820_s28 }
  0xa6   :  { %p12827_p8 = por %p12826_p7, %p12825_p6 }
  0xa8   :  { %p12828_p9 = pnand %p12827_p8, %p12821_p5 }
  0xaa   :  { %12831 = shalt.err (!%p12828_p9)
}
  0xab   :  { %132 = dma.hbm_to_vmem [thread:$0]  %s13472_s10, 16, %s130_s15, [#allocation18]  }
  0xac   :  { %12854 = dma.done.wait [#allocation3], 128  }
  0xad   :  { %12855 = vsyncadd [#allocation3], 4294967168 }
  0xae   :  { %12856 = dma.done.wait [#allocation6], 4352  }
  0xaf   :  { %12857 = vsyncadd [#allocation6], 4294962944 }
  0xb0   :  { %12858 = dma.done.wait [#allocation9], 114800  }
  0xb1   :  { %12859 = vsyncadd [#allocation9], 4294852496 }
  0xb2   :  { %12860 = dma.done.wait [#allocation12], 14368  }
  0xb3   :  { %12861 = vsyncadd [#allocation12], 4294952928 }
  0xb4   :  { %12862 = dma.done.wait [#allocation15], 8256  }
  0xb5   :  { %12863 = vsyncadd [#allocation15], 4294959040 }
  0xb6   :  { %12864 = dma.done.wait [#allocation18], 16  }
  0xb7   :  { %12865 = vsyncadd [#allocation18], 4294967280  ;;  %v12886_v0 = vmov 0   ;;  %v166_v1 = vld [vmem:[#allocation5] sm:$0xff]  ;;  %v167_v8 = vld [vmem:[#allocation5 + $0x8] sm:$0xff]  ;;  %vm442_vm0 = vcmask 261120  }
  0xb8   :  { %478 = vmatprep.mubr.bf16.mxu1 %v12886_v0  ;;  %642 = vmatprep.mubr.bf16.mxu0 %v12886_v0  ;;  %v174_v2 = vld [vmem:[#allocation5 + $0x40] sm:$0xff]  ;;  %v175_v9 = vld [vmem:[#allocation5 + $0x48] sm:$0xff]  ;;  %v164_v11 = vld [vmem:[#allocation2] sm:$0xff]  ;;  %vm9496_vm1 = vcmask 130112   ;;  %vm9484_vm2 = vcmask 64512   ;;  %s12888_s14 = smov [#allocation19]  }
  0xb9   :  { %v182_v3 = vld [vmem:[#allocation5 + $0x80] sm:$0xff]  ;;  %v9536_v4 = vcombine.high %v166_v1, %v174_v2  ;;  %v9535_v5 = vcombine.low %v166_v1, %v174_v2  ;;  %v9538_v12 = vcombine.high %v167_v8, %v175_v9  ;;  %v183_v14 = vld [vmem:[#allocation5 + $0x88] sm:$0xff]  ;;  %v13071_v17 = vpack.c.bf16 %v164_v11, %v164_v11  ;;  %v172_v24 = vld [vmem:[#allocation5 + $0x30] sm:$0xff]  ;;  %s9521_s15 = sshll.u32 %s12888_s14, 4  ;;  %s9522_s15 = int_to_ptr.vmem [resolvable:$true] %s9521_s15 }
  0xba   :  { %v190_v6 = vld [vmem:[#allocation5 + $0xc0] sm:$0xff]  ;;  %v191_v15 = vld [vmem:[#allocation5 + $0xc8] sm:$0xff]  ;;  %v9537_v22 = vcombine.low %v167_v8, %v175_v9  ;;  %v180_v25 = vld [vmem:[#allocation5 + $0x70] sm:$0xff]  ;;  %vm9513_vm3 = vcmask 130048   ;;  %s12832_s13 = scalar_lea.vmem %s9522_s15, 128  ;;  %p12837_p11 = scmp.lt.s32.totalorder %s9522_s15, %s9522_s15 }
  0xbb   :  { %v9552_v7 = vcombine.high %v182_v3, %v190_v6  ;;  %446 = vmatprep.subr.bf16.mxu1 %v9536_v4  ;;  %v9551_v10 = vcombine.low %v182_v3, %v190_v6  ;;  %v170_v13 = vld [vmem:[#allocation5 + $0x20] sm:$0xff]  ;;  %v9554_v26 = vcombine.high %v183_v14, %v191_v15  ;;  %v168_v27 = vld [vmem:[#allocation5 + $0x10] sm:$0xff]  ;;  %v9548_v30 = vcombine.high %v172_v24, %v180_v25  ;;  %v169_v41 = vld [vmem:[#allocation5 + $0x18] sm:$0xff]  ;;  %p12833_p10 = scmp.ne.s32.totalorder %s9522_s15, %s12832_s13  ;;  %p12838_p12 = scmp.lt.s32.totalorder %s12832_s13, %s12832_s13 }
  0xbc   :  { %447 = vmatpush1.bf16.msra.mxu1 %v9535_v5  ;;  %v178_v16 = vld [vmem:[#allocation5 + $0x60] sm:$0xff]  ;;  %v176_v28 = vld [vmem:[#allocation5 + $0x50] sm:$0xff]  ;;  %v9553_v32 = vcombine.low %v183_v14, %v191_v15  ;;  %v9547_v37 = vcombine.low %v172_v24, %v180_v25  ;;  %v177_v42 = vld [vmem:[#allocation5 + $0x58] sm:$0xff] }
  0xbd   :  { %448 = vmatprep.subr.bf16.mxu1 %v9552_v7  ;;  %v9544_v18 = vcombine.high %v170_v13, %v178_v16  ;;  %v9543_v19 = vcombine.low %v170_v13, %v178_v16  ;;  %v186_v20 = vld [vmem:[#allocation5 + $0xa0] sm:$0xff]  ;;  %v188_v31 = vld [vmem:[#allocation5 + $0xb0] sm:$0xff]  ;;  %v9540_v34 = vcombine.high %v168_v27, %v176_v28  ;;  %v9539_v39 = vcombine.low %v168_v27, %v176_v28  ;;  %v185_v47 = vld [vmem:[#allocation5 + $0x98] sm:$0xff]  ;;  %p12839_p13 = por %p12838_p12, %p12837_p11 }
  0xbe   :  { %v194_v21 = vld [vmem:[#allocation5 + $0xe0] sm:$0xff]  ;;  %v196_v33 = vld [vmem:[#allocation5 + $0xf0] sm:$0xff]  ;;  %v9542_v46 = vcombine.high %v169_v41, %v177_v42  ;;  %v193_v48 = vld [vmem:[#allocation5 + $0xd8] sm:$0xff]  ;;  %v9541_v51 = vcombine.low %v169_v41, %v177_v42 }
  0xbf   :  { %v9560_v23 = vcombine.high %v186_v20, %v194_v21  ;;  %610 = vmatprep.subr.bf16.mxu0 %v9544_v18  ;;  %v9559_v29 = vcombine.low %v186_v20, %v194_v21  ;;  %v184_v35 = vld [vmem:[#allocation5 + $0x90] sm:$0xff]  ;;  %v9564_v38 = vcombine.high %v188_v31, %v196_v33  ;;  %v9563_v43 = vcombine.low %v188_v31, %v196_v33  ;;  %v11033_v50 = vld [vmem:[#allocation8 + $0x3c] ss:$28 sps:$4 sm:$0xff]   ;;  %v11039_v56 = vld [vmem:[#allocation8 + $0x74] ss:$28 sps:$4 sm:$0xff]   ;;  %p12840_p0 = pnand %p12839_p13, %p12833_p10 }
  0xc0   :  { %449 = vmatpush1.bf16.msra.mxu1 %v9551_v10  ;;  %611 = vmatpush1.bf16.msra.mxu0 %v9543_v19  ;;  %v192_v36 = vld [vmem:[#allocation5 + $0xd0] sm:$0xff]  ;;  %v9558_v52 = vcombine.high %v185_v47, %v193_v48  ;;  %v171_v53 = vld [vmem:[#allocation5 + $0x28] sm:$0xff]  ;;  %v9557_v57 = vcombine.low %v185_v47, %v193_v48  ;;  %v11037_v61 = vld [vmem:[#allocation8 + $0x70] ss:$28 sps:$4 sm:$0xff]  }
  0xc1   :  { %487 = vmatprep.subr.bf16.mxu1 %v9538_v12  ;;  %612 = vmatprep.subr.bf16.mxu0 %v9560_v23  ;;  %v9556_v40 = vcombine.high %v184_v35, %v192_v36  ;;  %v11027_v44 = vld [vmem:[#allocation8 + $0x4] ss:$28 sps:$4 sm:$0xff]   ;;  %v9555_v45 = vcombine.low %v184_v35, %v192_v36  ;;  %v179_v54 = vld [vmem:[#allocation5 + $0x68] sm:$0xff]  ;;  %v11045_v62 = vld [vmem:[#allocation8 + $0xac] ss:$28 sps:$4 sm:$0xff]  }
  0xc2   :  { %v11025_v49 = vld [vmem:[#allocation8] ss:$28 sps:$4 sm:$0xff]   ;;  %v11031_v55 = vld [vmem:[#allocation8 + $0x38] ss:$28 sps:$4 sm:$0xff]   ;;  %v9546_v58 = vcombine.high %v171_v53, %v179_v54  ;;  %v9545_v63 = vcombine.low %v171_v53, %v179_v54  ;;  %v173_v2 = vld [vmem:[#allocation5 + $0x38] sm:$0xff] }
  0xc3   :  { %9567 = vmatmul.mubr.msk.bf16.vlgmr.msra.gmra.mrb[0].mxu1 %vm442_vm0, %v13071_v17  ;;  %v187_v59 = vld [vmem:[#allocation5 + $0xa8] sm:$0xff]  ;;  %v181_v3 = vld [vmem:[#allocation5 + $0x78] sm:$0xff]  ;;  %v11051_v5 = vld [vmem:[#allocation8 + $0xe4] ss:$28 sps:$4 sm:$0xff]  }
  0xc4   :  { %488 = vmatpush1.bf16.msra.mxu1 %v9537_v22  ;;  %519 = vmatprep.mubr.bf16.mxu1 %v12886_v0  ;;  %v195_v60 = vld [vmem:[#allocation5 + $0xe8] sm:$0xff]  ;;  %v11043_v4 = vld [vmem:[#allocation8 + $0xa8] ss:$28 sps:$4 sm:$0xff]   ;;  %v9550_v7 = vcombine.high %v173_v2, %v181_v3  ;;  %v9549_v12 = vcombine.low %v173_v2, %v181_v3  ;;  %v11063_v15 = vld [vmem:[#allocation8 + $0x154] ss:$28 sps:$4 sm:$0xff]  }
  0xc5   :  { %489 = vmatprep.subr.bf16.mxu1 %v9554_v26  ;;  %613 = vmatpush1.bf16.msra.mxu0 %v9559_v29  ;;  %v9562_v1 = vcombine.high %v187_v59, %v195_v60  ;;  %v9561_v6 = vcombine.low %v187_v59, %v195_v60  ;;  %v189_v8 = vld [vmem:[#allocation5 + $0xb8] sm:$0xff]  ;;  %v11049_v10 = vld [vmem:[#allocation8 + $0xe0] ss:$28 sps:$4 sm:$0xff]   ;;  %v11055_v14 = vld [vmem:[#allocation8 + $0x118] ss:$28 sps:$4 sm:$0xff]  }
  0xc6   :  { %692 = vmatprep.subr.bf16.mxu0 %v9548_v30  ;;  %v197_v9 = vld [vmem:[#allocation5 + $0xf8] sm:$0xff]  ;;  %v11057_v11 = vld [vmem:[#allocation8 + $0x11c] ss:$28 sps:$4 sm:$0xff]   ;;  %v11036_v22 = vld [vmem:[#allocation8 + $0x44] ss:$28 sps:$4 sm:$0xff]  }
  0xc7   :  { %v9566_v13 = vcombine.high %v189_v8, %v197_v9  ;;  %v9565_v16 = vcombine.low %v189_v8, %v197_v9  ;;  %v11030_v18 = vld [vmem:[#allocation8 + $0xc] ss:$28 sps:$4 sm:$0xff]   ;;  %v11075_v24 = vld [vmem:[#allocation8 + $0x1c4] ss:$28 sps:$4 sm:$0xff]   ;;  %v11042_v26 = vld [vmem:[#allocation8 + $0x7c] ss:$28 sps:$4 sm:$0xff]  }
  0xc8   :  { %490 = vmatpush1.bf16.msra.mxu1 %v9553_v32  ;;  %9571 = vmatmul.mubr.msk.bf16.vlgmr.msra.gmra.mrb[0].mxu0 %vm442_vm0, %v13071_v17  ;;  %v11028_v19 = vld [vmem:[#allocation8 + $0x8] ss:$28 sps:$4 sm:$0xff]   ;;  %v11061_v20 = vld [vmem:[#allocation8 + $0x150] ss:$28 sps:$4 sm:$0xff]   ;;  %v11034_v25 = vld [vmem:[#allocation8 + $0x40] ss:$28 sps:$4 sm:$0xff]  }
  0xc9   :  { %528 = vmatprep.subr.bf16.mxu1 %v9540_v34  ;;  %693 = vmatpush1.bf16.msra.mxu0 %v9547_v37  ;;  %v11069_v21 = vld [vmem:[#allocation8 + $0x18c] ss:$28 sps:$4 sm:$0xff]   ;;  %v11073_v27 = vld [vmem:[#allocation8 + $0x1c0] ss:$28 sps:$4 sm:$0xff]   ;;  %v11040_v29 = vld [vmem:[#allocation8 + $0x78] ss:$28 sps:$4 sm:$0xff]  }
  0xca   :  { %724 = vmatprep.mubr.bf16.mxu0 %v12886_v0  ;;  %694 = vmatprep.subr.bf16.mxu0 %v9564_v38  ;;  %v11067_v23 = vld [vmem:[#allocation8 + $0x188] ss:$28 sps:$4 sm:$0xff]   ;;  %v11081_v28 = vld [vmem:[#allocation8 + $0x1fc] ss:$28 sps:$4 sm:$0xff]   ;;  %v11048_v30 = vld [vmem:[#allocation8 + $0xb4] ss:$28 sps:$4 sm:$0xff]  }
  0xcb   :  { %9568 = vmatmul.mubr.msk.bf16.vlgmr.msra.gmra.mrb[4].mxu1 %vm442_vm0, %v13071_v17  ;;  %v11079_v31 = vld [vmem:[#allocation8 + $0x1f8] ss:$28 sps:$4 sm:$0xff]   ;;  %v11046_v33 = vld [vmem:[#allocation8 + $0xb0] ss:$28 sps:$4 sm:$0xff]   ;;  %v11052_v36 = vld [vmem:[#allocation8 + $0xe8] ss:$28 sps:$4 sm:$0xff]  }
  0xcc   :  { %529 = vmatpush1.bf16.msra.mxu1 %v9539_v39  ;;  %560 = vmatprep.mubr.bf16.mxu1 %v12886_v0  ;;  %v11087_v32 = vld [vmem:[#allocation8 + $0x234] ss:$28 sps:$4 sm:$0xff]   ;;  %v11054_v34 = vld [vmem:[#allocation8 + $0xec] ss:$28 sps:$4 sm:$0xff]   ;;  %v11060_v37 = vld [vmem:[#allocation8 + $0x124] ss:$28 sps:$4 sm:$0xff]  }
  0xcd   :  { %530 = vmatprep.subr.bf16.mxu1 %v9556_v40  ;;  %695 = vmatpush1.bf16.msra.mxu0 %v9563_v43  ;;  %v11093_v35 = vld [vmem:[#allocation8 + $0x26c] ss:$28 sps:$4 sm:$0xff]   ;;  %v11099_v39 = vld [vmem:[#allocation8 + $0x2a4] ss:$28 sps:$4 sm:$0xff]   ;;  %v11066_v41 = vld [vmem:[#allocation8 + $0x15c] ss:$28 sps:$4 sm:$0xff]  }
  0xce   :  { %6475 = vmatprep.subr.bf16.mxu0 %v11027_v44  ;;  %v11091_v38 = vld [vmem:[#allocation8 + $0x268] ss:$28 sps:$4 sm:$0xff]   ;;  %v11058_v40 = vld [vmem:[#allocation8 + $0x120] ss:$28 sps:$4 sm:$0xff]   ;;  %v11064_v44 = vld [vmem:[#allocation8 + $0x158] ss:$28 sps:$4 sm:$0xff]  }
  0xcf   :  { %v11097_v42 = vld [vmem:[#allocation8 + $0x2a0] ss:$28 sps:$4 sm:$0xff]   ;;  %v11070_v47 = vld [vmem:[#allocation8 + $0x190] ss:$28 sps:$4 sm:$0xff]   ;;  %v11088_v53 = vld [vmem:[#allocation8 + $0x238] ss:$28 sps:$4 sm:$0xff]  }
  0xd0   :  { %531 = vmatpush1.bf16.msra.mxu1 %v9555_v45  ;;  %9573 = vmatmul.mubr.msk.bf16.vlgmr.msra.gmra.mrb[4].mxu0 %vm442_vm0, %v13071_v17  ;;  %v11105_v43 = vld [vmem:[#allocation8 + $0x2dc] ss:$28 sps:$4 sm:$0xff]   ;;  %v11072_v45 = vld [vmem:[#allocation8 + $0x194] ss:$28 sps:$4 sm:$0xff]   ;;  %v11078_v48 = vld [vmem:[#allocation8 + $0x1cc] ss:$28 sps:$4 sm:$0xff]  }
  0xd1   :  { %569 = vmatprep.subr.bf16.mxu1 %v9542_v46  ;;  %6476 = vmatpush1.bf16.msra.mxu0 %v11025_v49  ;;  %v11103_v46 = vld [vmem:[#allocation8 + $0x2d8] ss:$28 sps:$4 sm:$0xff]   ;;  %v11076_v49 = vld [vmem:[#allocation8 + $0x1c8] ss:$28 sps:$4 sm:$0xff]  }
  0xd2   :  { %6477 = vmatprep.subr.bf16.mxu0 %v11033_v50  ;;  %v11084_v50 = vld [vmem:[#allocation8 + $0x204] ss:$28 sps:$4 sm:$0xff]   ;;  %v11096_v54 = vld [vmem:[#allocation8 + $0x274] ss:$28 sps:$4 sm:$0xff]   ;;  %v11117_v60 = vld [vmem:[#allocation8 + $0x34c] ss:$28 sps:$4 sm:$0xff]  }
  0xd3   :  { %9569 = vmatmul.mubr.msk.bf16.vlgmr.msra.gmra.mrb[8].mxu1 %vm442_vm0, %v13071_v17  ;;  %v11100_v59 = vld [vmem:[#allocation8 + $0x2a8] ss:$28 sps:$4 sm:$0xff]   ;;  %v11114_v2 = vld [vmem:[#allocation8 + $0x31c] ss:$28 sps:$4 sm:$0xff]  }
  0xd4   :  { %570 = vmatpush1.bf16.msra.mxu1 %v9541_v51  ;;  %601 = vmatprep.mubr.bf16.mxu1 %v12886_v0  ;;  %v11082_v51 = vld [vmem:[#allocation8 + $0x200] ss:$28 sps:$4 sm:$0xff]   ;;  %v11112_v3 = vld [vmem:[#allocation8 + $0x318] ss:$28 sps:$4 sm:$0xff]  }
  0xd5   :  { %571 = vmatprep.subr.bf16.mxu1 %v9558_v52  ;;  %6478 = vmatpush1.bf16.msra.mxu0 %v11031_v55  ;;  %v11090_v52 = vld [vmem:[#allocation8 + $0x23c] ss:$28 sps:$4 sm:$0xff]   ;;  %v11094_v55 = vld [vmem:[#allocation8 + $0x270] ss:$28 sps:$4 sm:$0xff]  }
  0xd6   :  { %6479 = vmatprep.subr.bf16.mxu0 %v11039_v56  ;;  %v11111_v56 = vld [vmem:[#allocation8 + $0x314] ss:$28 sps:$4 sm:$0xff]  }
  0xd8   :  { %572 = vmatpush1.bf16.msra.mxu1 %v9557_v57  ;;  %v11102_v57 = vld [vmem:[#allocation8 + $0x2ac] ss:$28 sps:$4 sm:$0xff]  }
  0xd9   :  { %651 = vmatprep.subr.bf16.mxu1 %v9546_v58  ;;  %6480 = vmatpush1.bf16.msra.mxu0 %v11037_v61  ;;  %v11109_v58 = vld [vmem:[#allocation8 + $0x310] ss:$28 sps:$4 sm:$0xff]   ;;  %v11108_v61 = vld [vmem:[#allocation8 + $0x2e4] ss:$28 sps:$4 sm:$0xff]  }
  0xda   :  { %6481 = vmatprep.subr.bf16.mxu0 %v11045_v62  ;;  %v11115_v62 = vld [vmem:[#allocation8 + $0x348] ss:$28 sps:$4 sm:$0xff]  }
  0xdb   :  { %9570 = vmatmul.mubr.msk.bf16.vlgmr.msra.gmra.mrb[12].mxu1 %vm442_vm0, %v13071_v17 }
  0xdc   :  { %652 = vmatpush1.bf16.msra.mxu1 %v9545_v63  ;;  %683 = vmatprep.mubr.bf16.mxu1 %v12886_v0  ;;  %v11106_v63 = vld [vmem:[#allocation8 + $0x2e0] ss:$28 sps:$4 sm:$0xff]  }
  0xdd   :  { %653 = vmatprep.subr.bf16.mxu1 %v9562_v1  ;;  %6482 = vmatpush1.bf16.msra.mxu0 %v11043_v4  ;;  %v11123_v1 = vld [vmem:[#allocation8 + $0x384] ss:$28 sps:$4 sm:$0xff]   ;;  %v11120_v4 = vld [vmem:[#allocation8 + $0x354] ss:$28 sps:$4 sm:$0xff]  }
  0xde   :  { %6483 = vmatprep.subr.bf16.mxu0 %v11051_v5  ;;  %v11118_v5 = vld [vmem:[#allocation8 + $0x350] ss:$28 sps:$4 sm:$0xff]  }
  0xe0   :  { %654 = vmatpush1.bf16.msra.mxu1 %v9561_v6  ;;  %v11126_v6 = vld [vmem:[#allocation8 + $0x38c] ss:$28 sps:$4 sm:$0xff]  }
  0xe1   :  { %733 = vmatprep.subr.bf16.mxu1 %v9550_v7  ;;  %6484 = vmatpush1.bf16.msra.mxu0 %v11049_v10  ;;  %v202_v7 = vlaneseq  ;;  %v13100_v10 = vld [vmem:[#allocation7] sm:$0xff] }
  0xe2   :  { %6485 = vmatprep.subr.bf16.mxu0 %v11057_v11 }
  0xe3   :  { %9572 = vmatmul.mubr.msk.bf16.vlgmr.msra.gmra.mrb[16].mxu1 %vm442_vm0, %v13071_v17  ;;  %v13095_v8 = vshrl.u32 %v202_v7, 7  ;;  %v11160_v7 = vld [vmem:[#allocation8 + $0x4d8] ss:$28 sps:$4 sm:$0xff]  }
  0xe4   :  { %734 = vmatpush1.bf16.msra.mxu1 %v9549_v12  ;;  %765 = vmatprep.mubr.bf16.mxu1 %v12886_v0 }
  0xe5   :  { %735 = vmatprep.subr.bf16.mxu1 %v9566_v13  ;;  %6486 = vmatpush1.bf16.msra.mxu0 %v11055_v14  ;;  %v13098_v9 = vsub.s32 0, %v13095_v8  ;;  %v13103_v11 = vsub.s32 1, %v13095_v8 }
  0xe6   :  { %6487 = vmatprep.subr.bf16.mxu0 %v11063_v15 }
  0xe7   :  { %v205_v12 = vrot.slane %v13100_v10, %v13098_v9  ;;  %v209_v13 = vrot.slane %v13100_v10, %v13103_v11 }
  0xe8   :  { %736 = vmatpush1.bf16.msra.mxu1 %v9565_v16 }
  0xe9   :  { %6803 = vmatprep.subr.bf16.mxu1 %v11030_v18  ;;  %6488 = vmatpush1.bf16.msra.mxu0 %v11061_v20  ;;  %v13110_v20 = vsub.s32 3, %v13095_v8 }
  0xea   :  { %6489 = vmatprep.subr.bf16.mxu0 %v11069_v21 }
  0xeb   :  { %9574 = vmatmul.mubr.msk.bf16.vlgmr.msra.gmra.mrb[20].mxu1 %vm442_vm0, %v13071_v17  ;;  %v11085_v17 = vld [vmem:[#allocation8 + $0x230] ss:$28 sps:$4 sm:$0xff]  }
  0xec   :  { %6804 = vmatpush1.bf16.msra.mxu1 %v11028_v19 }
  0xed   :  { %6805 = vmatprep.subr.bf16.mxu1 %v11036_v22  ;;  %6490 = vmatpush1.bf16.msra.mxu0 %v11067_v23 }
  0xee   :  { %6491 = vmatprep.subr.bf16.mxu0 %v11075_v24  ;;  %v11121_v24 = vld [vmem:[#allocation8 + $0x380] ss:$28 sps:$4 sm:$0xff]  }
  0xf0   :  { %6806 = vmatpush1.bf16.msra.mxu1 %v11034_v25  ;;  %v11124_v25 = vld [vmem:[#allocation8 + $0x388] ss:$28 sps:$4 sm:$0xff]  }
  0xf1   :  { %6807 = vmatprep.subr.bf16.mxu1 %v11042_v26  ;;  %6492 = vmatpush1.bf16.msra.mxu0 %v11073_v27  ;;  %v217_v27 = vrot.slane %v13100_v10, %v13110_v20 }
  0xf2   :  { %6493 = vmatprep.subr.bf16.mxu0 %v11081_v28 }
  0xf4   :  { %6808 = vmatpush1.bf16.msra.mxu1 %v11040_v29  ;;  %v11129_v29 = vld [vmem:[#allocation8 + $0x3bc] ss:$28 sps:$4 sm:$0xff]  }
  0xf5   :  { %6809 = vmatprep.subr.bf16.mxu1 %v11048_v30  ;;  %6494 = vmatpush1.bf16.msra.mxu0 %v11079_v31  ;;  %v11132_v30 = vld [vmem:[#allocation8 + $0x3c4] ss:$28 sps:$4 sm:$0xff]  }
  0xf6   :  { %6495 = vmatprep.subr.bf16.mxu0 %v11087_v32 }
  0xf8   :  { %6810 = vmatpush1.bf16.msra.mxu1 %v11046_v33  ;;  %v11127_v33 = vld [vmem:[#allocation8 + $0x3b8] ss:$28 sps:$4 sm:$0xff]  }
  0xf9   :  { %6811 = vmatprep.subr.bf16.mxu1 %v11054_v34  ;;  %6496 = vmatpush1.bf16.msra.mxu0 %v11085_v17  ;;  %v11130_v34 = vld [vmem:[#allocation8 + $0x3c0] ss:$28 sps:$4 sm:$0xff]  }
  0xfa   :  { %6497 = vmatprep.subr.bf16.mxu0 %v11093_v35 }
  0xfc   :  { %6812 = vmatpush1.bf16.msra.mxu1 %v11052_v36  ;;  %v11135_v36 = vld [vmem:[#allocation8 + $0x3f4] ss:$28 sps:$4 sm:$0xff]  }
  0xfd   :  { %6813 = vmatprep.subr.bf16.mxu1 %v11060_v37  ;;  %6498 = vmatpush1.bf16.msra.mxu0 %v11091_v38  ;;  %v11138_v37 = vld [vmem:[#allocation8 + $0x3fc] ss:$28 sps:$4 sm:$0xff]  }
  0xfe   :  { %6499 = vmatprep.subr.bf16.mxu0 %v11099_v39 }
 0x100   :  { %6814 = vmatpush1.bf16.msra.mxu1 %v11058_v40  ;;  %v11133_v40 = vld [vmem:[#allocation8 + $0x3f0] ss:$28 sps:$4 sm:$0xff]  }
 0x101   :  { %6815 = vmatprep.subr.bf16.mxu1 %v11066_v41  ;;  %6500 = vmatpush1.bf16.msra.mxu0 %v11097_v42  ;;  %v11136_v41 = vld [vmem:[#allocation8 + $0x3f8] ss:$28 sps:$4 sm:$0xff]  }
 0x102   :  { %6501 = vmatprep.subr.bf16.mxu0 %v11105_v43  ;;  %v11141_v43 = vld [vmem:[#allocation8 + $0x42c] ss:$28 sps:$4 sm:$0xff]  }
 0x104   :  { %6816 = vmatpush1.bf16.msra.mxu1 %v11064_v44  ;;  %v11144_v44 = vld [vmem:[#allocation8 + $0x434] ss:$28 sps:$4 sm:$0xff]  }
 0x105   :  { %6817 = vmatprep.subr.bf16.mxu1 %v11072_v45  ;;  %6502 = vmatpush1.bf16.msra.mxu0 %v11103_v46  ;;  %v11139_v46 = vld [vmem:[#allocation8 + $0x428] ss:$28 sps:$4 sm:$0xff]  }
 0x106   :  { %6503 = vmatprep.subr.bf16.mxu0 %v11111_v56 }
 0x108   :  { %6818 = vmatpush1.bf16.msra.mxu1 %v11070_v47 }
 0x109   :  { %6819 = vmatprep.subr.bf16.mxu1 %v11078_v48  ;;  %6504 = vmatpush1.bf16.msra.mxu0 %v11109_v58  ;;  %v11148_v58 = vld [vmem:[#allocation8 + $0x468] ss:$28 sps:$4 sm:$0xff]  }
 0x10a   :  { %6505 = vmatprep.subr.bf16.mxu0 %v11117_v60  ;;  %v11156_v60 = vld [vmem:[#allocation8 + $0x4a4] ss:$28 sps:$4 sm:$0xff]  }
 0x10c   :  { %6820 = vmatpush1.bf16.msra.mxu1 %v11076_v49  ;;  %v11142_v49 = vld [vmem:[#allocation8 + $0x430] ss:$28 sps:$4 sm:$0xff]  }
 0x10d   :  { %6821 = vmatprep.subr.bf16.mxu1 %v11084_v50  ;;  %6506 = vmatpush1.bf16.msra.mxu0 %v11115_v62  ;;  %v11147_v50 = vld [vmem:[#allocation8 + $0x464] ss:$28 sps:$4 sm:$0xff]   ;;  %v11151_v62 = vld [vmem:[#allocation8 + $0x498] ss:$28 sps:$4 sm:$0xff]  }
 0x10e   :  { %6516 = vmatprep.subr.bf16.mxu0 %v11123_v1 }
 0x110   :  { %6822 = vmatpush1.bf16.msra.mxu1 %v11082_v51 }
 0x111   :  { %6823 = vmatprep.subr.bf16.mxu1 %v11090_v52 }
 0x114   :  { %6824 = vmatpush1.bf16.msra.mxu1 %v11088_v53  ;;  %v11150_v53 = vld [vmem:[#allocation8 + $0x46c] ss:$28 sps:$4 sm:$0xff]  }
 0x115   :  { %6825 = vmatprep.subr.bf16.mxu1 %v11096_v54 }
 0x118   :  { %6826 = vmatpush1.bf16.msra.mxu1 %v11094_v55 }
 0x119   :  { %6827 = vmatprep.subr.bf16.mxu1 %v11102_v57  ;;  %v11145_v57 = vld [vmem:[#allocation8 + $0x460] ss:$28 sps:$4 sm:$0xff]  }
 0x11c   :  { %6828 = vmatpush1.bf16.msra.mxu1 %v11100_v59  ;;  %v11153_v59 = vld [vmem:[#allocation8 + $0x49c] ss:$28 sps:$4 sm:$0xff]  }
 0x11d   :  { %6829 = vmatprep.subr.bf16.mxu1 %v11108_v61 }
 0x120   :  { %6830 = vmatpush1.bf16.msra.mxu1 %v11106_v63  ;;  %v11154_v63 = vld [vmem:[#allocation8 + $0x4a0] ss:$28 sps:$4 sm:$0xff]  }
 0x121   :  { %6831 = vmatprep.subr.bf16.mxu1 %v11114_v2  ;;  %v11159_v2 = vld [vmem:[#allocation8 + $0x4d4] ss:$28 sps:$4 sm:$0xff]  }
 0x124   :  { %6832 = vmatpush1.bf16.msra.mxu1 %v11112_v3  ;;  %v11162_v3 = vld [vmem:[#allocation8 + $0x4dc] ss:$28 sps:$4 sm:$0xff]  }
 0x125   :  { %6833 = vmatprep.subr.bf16.mxu1 %v11120_v4 }
 0x128   :  { %6834 = vmatpush1.bf16.msra.mxu1 %v11118_v5 }
 0x129   :  { %6844 = vmatprep.subr.bf16.mxu1 %v11126_v6  ;;  %v11157_v6 = vld [vmem:[#allocation8 + $0x4d0] ss:$28 sps:$4 sm:$0xff]  }
 0x196   :  { %v480_v14 = vpop.f32.mrb[0].mxu1 }
 0x197   :  { %v481_v15 = vadd.f32 %v480_v14, %v205_v12  ;;  %v482_v16 = vpop.f32.mrb[1].mxu1  ;;  %v11165_v12 = vld [vmem:[#allocation8 + $0x50c] ss:$28 sps:$4 sm:$0xff]  }
 0x198   :  { %v483_v18 = vadd.f32 %v482_v16, %v209_v13  ;;  %v484_v19 = vpop.f32.mrb[2].mxu1  ;;  %v11168_v13 = vld [vmem:[#allocation8 + $0x514] ss:$28 sps:$4 sm:$0xff]   ;;  %v11163_v14 = vld [vmem:[#allocation8 + $0x508] ss:$28 sps:$4 sm:$0xff]  }
 0x199   :  { %v774_v21 = vmax.f32 %v481_v15, 0.0  ;;  %v485_v22 = vpop.f32.mrb[3].mxu1  ;;  %v11166_v15 = vld [vmem:[#allocation8 + $0x510] ss:$28 sps:$4 sm:$0xff]   ;;  %v11171_v16 = vld [vmem:[#allocation8 + $0x544] ss:$28 sps:$4 sm:$0xff]  }
 0x19a   :  { %v775_v23 = vmax.f32 %v483_v18, 0.0  ;;  %v11174_v18 = vld [vmem:[#allocation8 + $0x54c] ss:$28 sps:$4 sm:$0xff]   ;;  %v11169_v19 = vld [vmem:[#allocation8 + $0x540] ss:$28 sps:$4 sm:$0xff]  }
 0x19b   :  { %v13116_v28 = vpack.c.bf16 %v774_v21, %v774_v21  ;;  %v13126_v45 = vpop.f32.mrb[0].mxu0  ;;  %v11172_v21 = vld [vmem:[#allocation8 + $0x548] ss:$28 sps:$4 sm:$0xff]   ;;  %v11177_v22 = vld [vmem:[#allocation8 + $0x57c] ss:$28 sps:$4 sm:$0xff]  }
 0x19c   :  { %v13112_v26 = vpack.c.bf16 %v775_v23, %v775_v23  ;;  %v13134_v52 = vpop.f32.mrb[1].mxu0  ;;  %v11180_v23 = vld [vmem:[#allocation8 + $0x584] ss:$28 sps:$4 sm:$0xff]  }
 0x19d   :  { %v648_v55 = vpop.f32.mrb[2].mxu0 }
 0x19e   :  { %6507 = vmatprep.mubr.bf16.mxu0 %v13112_v26  ;;  %6835 = vmatprep.mubr.bf16.mxu1 %v13112_v26  ;;  %v13120_v31 = vpop.f32.mrb[4].mxu1  ;;  %v649_v56 = vpop.f32.mrb[3].mxu0 }
 0x19f   :  { %6508 = vmatmul.mubr.bf16.vlgmr.msra.gmra.mrb[8].mxu0 %v13116_v28  ;;  %6836 = vmatmul.mubr.bf16.vlgmr.msra.gmra.mrb[24].mxu1 %v13116_v28  ;;  %v523_v32 = vpop.f32.mrb[5].mxu1 }
 0x1a0   :  { %6517 = vmatpush1.bf16.msra.mxu0 %v11121_v24  ;;  %6845 = vmatpush1.bf16.msra.mxu1 %v11124_v25  ;;  %v524_v17 = vadd.f32 %v523_v32, %v217_v27  ;;  %v525_v35 = vpop.f32.mrb[6].mxu1  ;;  %v11175_v24 = vld [vmem:[#allocation8 + $0x578] ss:$28 sps:$4 sm:$0xff]   ;;  %v11178_v25 = vld [vmem:[#allocation8 + $0x580] ss:$28 sps:$4 sm:$0xff]  }
 0x1a1   :  { %6518 = vmatprep.subr.bf16.mxu0 %v11129_v29  ;;  %6846 = vmatprep.subr.bf16.mxu1 %v11132_v30  ;;  %v526_v38 = vpop.f32.mrb[7].mxu1  ;;  %v11183_v27 = vld [vmem:[#allocation8 + $0x5b4] ss:$28 sps:$4 sm:$0xff]   ;;  %v11186_v29 = vld [vmem:[#allocation8 + $0x5bc] ss:$28 sps:$4 sm:$0xff]  }
 0x1a2   :  { %v777_v39 = vmax.f32 %v524_v17, 0.0  ;;  %v11181_v30 = vld [vmem:[#allocation8 + $0x5b0] ss:$28 sps:$4 sm:$0xff]   ;;  %v11184_v32 = vld [vmem:[#allocation8 + $0x5b8] ss:$28 sps:$4 sm:$0xff]   ;;  %v13141_v38 = vsub.s32 2, %v13095_v8 }
 0x1a3   :  { %v13136_v61 = vpop.f32.mrb[4].mxu0  ;;  %v11187_v17 = vld [vmem:[#allocation8 + $0x5e8] ss:$28 sps:$4 sm:$0xff]   ;;  %v11190_v35 = vld [vmem:[#allocation8 + $0x5f0] ss:$28 sps:$4 sm:$0xff]  }
 0x1a4   :  { %6519 = vmatpush1.bf16.msra.mxu0 %v11127_v33  ;;  %6847 = vmatpush1.bf16.msra.mxu1 %v11130_v34  ;;  %v13124_v42 = vpack.c.bf16 %v777_v39, %v777_v39  ;;  %v13138_v1 = vpop.f32.mrb[5].mxu0  ;;  %v11189_v33 = vld [vmem:[#allocation8 + $0x5ec] ss:$28 sps:$4 sm:$0xff]   ;;  %v11192_v34 = vld [vmem:[#allocation8 + $0x5f4] ss:$28 sps:$4 sm:$0xff]  }
 0x1a5   :  { %6520 = vmatprep.subr.bf16.mxu0 %v11135_v36  ;;  %6848 = vmatprep.subr.bf16.mxu1 %v11138_v37  ;;  %v730_v4 = vpop.f32.mrb[6].mxu0  ;;  %v11195_v36 = vld [vmem:[#allocation8 + $0x624] ss:$28 sps:$4 sm:$0xff]   ;;  %v11198_v37 = vld [vmem:[#allocation8 + $0x62c] ss:$28 sps:$4 sm:$0xff]  }
 0x1a6   :  { %6548 = vmatprep.mubr.bf16.mxu0 %v13124_v42  ;;  %6876 = vmatprep.mubr.bf16.mxu1 %v13124_v42  ;;  %v13130_v47 = vpop.f32.mrb[8].mxu1  ;;  %v731_v5 = vpop.f32.mrb[7].mxu0  ;;  %v11193_v39 = vld [vmem:[#allocation8 + $0x620] ss:$28 sps:$4 sm:$0xff]  }
 0x1a7   :  { %v13132_v48 = vpop.f32.mrb[9].mxu1  ;;  %v11214_v5 = vld [vmem:[#allocation8 + $0x6d0] ss:$28 sps:$4 sm:$0xff]  }
 0x1a8   :  { %6521 = vmatpush1.bf16.msra.mxu0 %v11133_v40  ;;  %6849 = vmatpush1.bf16.msra.mxu1 %v11136_v41  ;;  %v566_v51 = vpop.f32.mrb[10].mxu1  ;;  %v11196_v40 = vld [vmem:[#allocation8 + $0x628] ss:$28 sps:$4 sm:$0xff]   ;;  %v11201_v41 = vld [vmem:[#allocation8 + $0x65c] ss:$28 sps:$4 sm:$0xff]  }
 0x1a9   :  { %6522 = vmatprep.subr.bf16.mxu0 %v11141_v43  ;;  %6850 = vmatprep.subr.bf16.mxu1 %v11144_v44  ;;  %v567_v54 = vpop.f32.mrb[11].mxu1  ;;  %v11204_v43 = vld [vmem:[#allocation8 + $0x664] ss:$28 sps:$4 sm:$0xff]   ;;  %v13144_v44 = vsub.s32 5, %v13095_v8  ;;  %v11207_v51 = vld [vmem:[#allocation8 + $0x694] ss:$28 sps:$4 sm:$0xff]  }
 0x1ab   :  { %v225_v55 = vrot.slane %v13100_v10, %v13144_v44 }
 0x1ac   :  { %6523 = vmatpush1.bf16.msra.mxu0 %v11139_v46  ;;  %6851 = vmatpush1.bf16.msra.mxu1 %v11142_v49  ;;  %v213_v46 = vrot.slane %v13100_v10, %v13141_v38  ;;  %v11199_v49 = vld [vmem:[#allocation8 + $0x658] ss:$28 sps:$4 sm:$0xff]   ;;  %v11211_v10 = vld [vmem:[#allocation8 + $0x6c8] ss:$28 sps:$4 sm:$0xff]  }
 0x1ad   :  { %6524 = vmatprep.subr.bf16.mxu0 %v11147_v50  ;;  %6852 = vmatprep.subr.bf16.mxu1 %v11150_v53  ;;  %v11202_v50 = vld [vmem:[#allocation8 + $0x660] ss:$28 sps:$4 sm:$0xff]  }
 0x1ae   :  { %v11210_v53 = vld [vmem:[#allocation8 + $0x69c] ss:$28 sps:$4 sm:$0xff]   ;;  %v13148_v54 = vpop.f32.mrb[12].mxu1  ;;  %v522_v56 = vadd.f32 %v13120_v31, %v213_v46  ;;  %v11219_v31 = vld [vmem:[#allocation8 + $0x704] ss:$28 sps:$4 sm:$0xff]  }
 0x1af   :  { %v11256_v46 = vld [vmem:[#allocation8 + $0x858] ss:$28 sps:$4 sm:$0xff]  }
 0x1b0   :  { %6525 = vmatpush1.bf16.msra.mxu0 %v11145_v57  ;;  %6853 = vmatpush1.bf16.msra.mxu1 %v11148_v58  ;;  %v11205_v57 = vld [vmem:[#allocation8 + $0x690] ss:$28 sps:$4 sm:$0xff]   ;;  %v11208_v58 = vld [vmem:[#allocation8 + $0x698] ss:$28 sps:$4 sm:$0xff]   ;;  %v776_v4 = vmax.f32 %v522_v56, 0.0 }
 0x1b1   :  { %6526 = vmatprep.subr.bf16.mxu0 %v11153_v59  ;;  %6854 = vmatprep.subr.bf16.mxu1 %v11156_v60  ;;  %v13153_v59 = vpop.f32.mrb[13].mxu1  ;;  %v11213_v60 = vld [vmem:[#allocation8 + $0x6cc] ss:$28 sps:$4 sm:$0xff]  }
 0x1b2   :  { %v11270_v56 = vld [vmem:[#allocation8 + $0x8cc] ss:$28 sps:$4 sm:$0xff]  }
 0x1b4   :  { %6527 = vmatpush1.bf16.msra.mxu0 %v11151_v62  ;;  %6855 = vmatpush1.bf16.msra.mxu1 %v11154_v63  ;;  %v11216_v62 = vld [vmem:[#allocation8 + $0x6d4] ss:$28 sps:$4 sm:$0xff]   ;;  %v607_v63 = vpop.f32.mrb[14].mxu1 }
 0x1b5   :  { %6528 = vmatprep.subr.bf16.mxu0 %v11159_v2  ;;  %6856 = vmatprep.subr.bf16.mxu1 %v11162_v3  ;;  %v565_v2 = vadd.f32 %v13132_v48, %v225_v55  ;;  %v608_v3 = vpop.f32.mrb[15].mxu1  ;;  %v11225_v48 = vld [vmem:[#allocation8 + $0x73c] ss:$28 sps:$4 sm:$0xff]   ;;  %v11267_v55 = vld [vmem:[#allocation8 + $0x8c4] ss:$28 sps:$4 sm:$0xff]  }
 0x1b6   :  { %v11271_v63 = vld [vmem:[#allocation8 + $0x8f8] ss:$28 sps:$4 sm:$0xff]  }
 0x1b7   :  { %v11279_v3 = vld [vmem:[#allocation8 + $0x934] ss:$28 sps:$4 sm:$0xff]  }
 0x1b8   :  { %6529 = vmatpush1.bf16.msra.mxu0 %v11157_v6  ;;  %6857 = vmatpush1.bf16.msra.mxu1 %v11160_v7  ;;  %v11222_v6 = vld [vmem:[#allocation8 + $0x70c] ss:$28 sps:$4 sm:$0xff]   ;;  %v11217_v7 = vld [vmem:[#allocation8 + $0x700] ss:$28 sps:$4 sm:$0xff]  }
 0x1b9   :  { %6530 = vmatprep.subr.bf16.mxu0 %v11165_v12  ;;  %6858 = vmatprep.subr.bf16.mxu1 %v11168_v13  ;;  %v11220_v12 = vld [vmem:[#allocation8 + $0x708] ss:$28 sps:$4 sm:$0xff]   ;;  %v779_v13 = vmax.f32 %v565_v2, 0.0  ;;  %v11274_v2 = vld [vmem:[#allocation8 + $0x900] ss:$28 sps:$4 sm:$0xff]  }
 0x1bc   :  { %6531 = vmatpush1.bf16.msra.mxu0 %v11163_v14  ;;  %6859 = vmatpush1.bf16.msra.mxu1 %v11166_v15  ;;  %v13156_v14 = vpack.c.bf16 %v776_v4, %v776_v4  ;;  %v11228_v15 = vld [vmem:[#allocation8 + $0x744] ss:$28 sps:$4 sm:$0xff]   ;;  %v11282_v4 = vld [vmem:[#allocation8 + $0x93c] ss:$28 sps:$4 sm:$0xff]  }
 0x1bd   :  { %6532 = vmatprep.subr.bf16.mxu0 %v11171_v16  ;;  %6860 = vmatprep.subr.bf16.mxu1 %v11174_v18  ;;  %v11223_v16 = vld [vmem:[#allocation8 + $0x738] ss:$28 sps:$4 sm:$0xff]   ;;  %v11226_v18 = vld [vmem:[#allocation8 + $0x740] ss:$28 sps:$4 sm:$0xff]  }
 0x1c0   :  { %6533 = vmatpush1.bf16.msra.mxu0 %v11169_v19  ;;  %6861 = vmatpush1.bf16.msra.mxu1 %v11172_v21  ;;  %v13158_v19 = vpack.c.bf16 %v779_v13, %v779_v13  ;;  %v11231_v21 = vld [vmem:[#allocation8 + $0x774] ss:$28 sps:$4 sm:$0xff]   ;;  %v11291_v13 = vld [vmem:[#allocation8 + $0x9a4] ss:$28 sps:$4 sm:$0xff]  }
 0x1c1   :  { %6534 = vmatprep.subr.bf16.mxu0 %v11177_v22  ;;  %6862 = vmatprep.subr.bf16.mxu1 %v11180_v23  ;;  %v11234_v22 = vld [vmem:[#allocation8 + $0x77c] ss:$28 sps:$4 sm:$0xff]   ;;  %v11229_v23 = vld [vmem:[#allocation8 + $0x770] ss:$28 sps:$4 sm:$0xff]  }
 0x1c4   :  { %6535 = vmatpush1.bf16.msra.mxu0 %v11175_v24  ;;  %6863 = vmatpush1.bf16.msra.mxu1 %v11178_v25  ;;  %v11232_v24 = vld [vmem:[#allocation8 + $0x778] ss:$28 sps:$4 sm:$0xff]   ;;  %v11237_v25 = vld [vmem:[#allocation8 + $0x7ac] ss:$28 sps:$4 sm:$0xff]  }
 0x1c5   :  { %6536 = vmatprep.subr.bf16.mxu0 %v11183_v27  ;;  %6864 = vmatprep.subr.bf16.mxu1 %v11186_v29  ;;  %v11240_v27 = vld [vmem:[#allocation8 + $0x7b4] ss:$28 sps:$4 sm:$0xff]   ;;  %v11235_v29 = vld [vmem:[#allocation8 + $0x7a8] ss:$28 sps:$4 sm:$0xff]  }
 0x1c8   :  { %6537 = vmatpush1.bf16.msra.mxu0 %v11181_v30  ;;  %6865 = vmatpush1.bf16.msra.mxu1 %v11184_v32  ;;  %v11238_v30 = vld [vmem:[#allocation8 + $0x7b0] ss:$28 sps:$4 sm:$0xff]   ;;  %v11243_v32 = vld [vmem:[#allocation8 + $0x7e4] ss:$28 sps:$4 sm:$0xff]  }
 0x1c9   :  { %6538 = vmatprep.subr.bf16.mxu0 %v11189_v33  ;;  %6866 = vmatprep.subr.bf16.mxu1 %v11192_v34  ;;  %v11246_v33 = vld [vmem:[#allocation8 + $0x7ec] ss:$28 sps:$4 sm:$0xff]   ;;  %v11241_v34 = vld [vmem:[#allocation8 + $0x7e0] ss:$28 sps:$4 sm:$0xff]  }
 0x1cc   :  { %6539 = vmatpush1.bf16.msra.mxu0 %v11187_v17  ;;  %6867 = vmatpush1.bf16.msra.mxu1 %v11190_v35  ;;  %v11244_v17 = vld [vmem:[#allocation8 + $0x7e8] ss:$28 sps:$4 sm:$0xff]   ;;  %v11249_v35 = vld [vmem:[#allocation8 + $0x81c] ss:$28 sps:$4 sm:$0xff]  }
 0x1cd   :  { %6540 = vmatprep.subr.bf16.mxu0 %v11195_v36  ;;  %6868 = vmatprep.subr.bf16.mxu1 %v11198_v37  ;;  %v11252_v36 = vld [vmem:[#allocation8 + $0x824] ss:$28 sps:$4 sm:$0xff]   ;;  %v11247_v37 = vld [vmem:[#allocation8 + $0x818] ss:$28 sps:$4 sm:$0xff]  }
 0x1d0   :  { %6541 = vmatpush1.bf16.msra.mxu0 %v11193_v39  ;;  %6869 = vmatpush1.bf16.msra.mxu1 %v11196_v40  ;;  %v11250_v39 = vld [vmem:[#allocation8 + $0x820] ss:$28 sps:$4 sm:$0xff]   ;;  %v11255_v40 = vld [vmem:[#allocation8 + $0x854] ss:$28 sps:$4 sm:$0xff]  }
 0x1d1   :  { %6542 = vmatprep.subr.bf16.mxu0 %v11201_v41  ;;  %6870 = vmatprep.subr.bf16.mxu1 %v11204_v43  ;;  %v11258_v41 = vld [vmem:[#allocation8 + $0x85c] ss:$28 sps:$4 sm:$0xff]   ;;  %v11253_v43 = vld [vmem:[#allocation8 + $0x850] ss:$28 sps:$4 sm:$0xff]  }
 0x1d4   :  { %6543 = vmatpush1.bf16.msra.mxu0 %v11199_v49  ;;  %6871 = vmatpush1.bf16.msra.mxu1 %v11202_v50  ;;  %v11261_v49 = vld [vmem:[#allocation8 + $0x88c] ss:$28 sps:$4 sm:$0xff]   ;;  %v11264_v50 = vld [vmem:[#allocation8 + $0x894] ss:$28 sps:$4 sm:$0xff]  }
 0x1d5   :  { %6544 = vmatprep.subr.bf16.mxu0 %v11207_v51  ;;  %6872 = vmatprep.subr.bf16.mxu1 %v11210_v53  ;;  %v11259_v51 = vld [vmem:[#allocation8 + $0x888] ss:$28 sps:$4 sm:$0xff]   ;;  %v11262_v53 = vld [vmem:[#allocation8 + $0x890] ss:$28 sps:$4 sm:$0xff]  }
 0x1d8   :  { %6545 = vmatpush1.bf16.msra.mxu0 %v11205_v57  ;;  %6873 = vmatpush1.bf16.msra.mxu1 %v11208_v58  ;;  %v11265_v57 = vld [vmem:[#allocation8 + $0x8c0] ss:$28 sps:$4 sm:$0xff]   ;;  %v11268_v58 = vld [vmem:[#allocation8 + $0x8c8] ss:$28 sps:$4 sm:$0xff]  }
 0x1d9   :  { %6546 = vmatprep.subr.bf16.mxu0 %v11213_v60  ;;  %6874 = vmatprep.subr.bf16.mxu1 %v11216_v62  ;;  %v11273_v60 = vld [vmem:[#allocation8 + $0x8fc] ss:$28 sps:$4 sm:$0xff]   ;;  %v11276_v62 = vld [vmem:[#allocation8 + $0x904] ss:$28 sps:$4 sm:$0xff]  }
 0x1dc   :  { %6547 = vmatpush1.bf16.msra.mxu0 %v11211_v10  ;;  %6875 = vmatpush1.bf16.msra.mxu1 %v11214_v5  ;;  %v11277_v10 = vld [vmem:[#allocation8 + $0x930] ss:$28 sps:$4 sm:$0xff]   ;;  %v11280_v5 = vld [vmem:[#allocation8 + $0x938] ss:$28 sps:$4 sm:$0xff]  }
 0x1dd   :  { %6557 = vmatprep.subr.bf16.mxu0 %v11219_v31  ;;  %6885 = vmatprep.subr.bf16.mxu1 %v11222_v6  ;;  %v11285_v31 = vld [vmem:[#allocation8 + $0x96c] ss:$28 sps:$4 sm:$0xff]   ;;  %v11288_v6 = vld [vmem:[#allocation8 + $0x974] ss:$28 sps:$4 sm:$0xff]  }
 0x1df   :  { %6549 = vmatmul.mubr.bf16.vlgmr.msra.gmra.mrb[8].mxu0 %v13156_v14  ;;  %6877 = vmatmul.mubr.bf16.vlgmr.msra.gmra.mrb[24].mxu1 %v13156_v14 }
 0x1e0   :  { %6558 = vmatpush1.bf16.msra.mxu0 %v11217_v7  ;;  %6886 = vmatpush1.bf16.msra.mxu1 %v11220_v12  ;;  %v11283_v7 = vld [vmem:[#allocation8 + $0x968] ss:$28 sps:$4 sm:$0xff]   ;;  %v11286_v12 = vld [vmem:[#allocation8 + $0x970] ss:$28 sps:$4 sm:$0xff]  }
 0x1e1   :  { %6559 = vmatprep.subr.bf16.mxu0 %v11225_v48  ;;  %6887 = vmatprep.subr.bf16.mxu1 %v11228_v15  ;;  %v11294_v48 = vld [vmem:[#allocation8 + $0x9ac] ss:$28 sps:$4 sm:$0xff]   ;;  %v11289_v15 = vld [vmem:[#allocation8 + $0x9a0] ss:$28 sps:$4 sm:$0xff]  }
 0x1e2   :  { %6589 = vmatprep.mubr.bf16.mxu0 %v13158_v19  ;;  %6917 = vmatprep.mubr.bf16.mxu1 %v13158_v19 }
 0x1e4   :  { %6560 = vmatpush1.bf16.msra.mxu0 %v11223_v16  ;;  %6888 = vmatpush1.bf16.msra.mxu1 %v11226_v18  ;;  %v11292_v16 = vld [vmem:[#allocation8 + $0x9a8] ss:$28 sps:$4 sm:$0xff]   ;;  %v13165_v18 = vsub.s32 4, %v13095_v8 }
 0x1e5   :  { %6561 = vmatprep.subr.bf16.mxu0 %v11231_v21  ;;  %6889 = vmatprep.subr.bf16.mxu1 %v11234_v22  ;;  %v11297_v21 = vld [vmem:[#allocation8 + $0x9dc] ss:$28 sps:$4 sm:$0xff]   ;;  %v11300_v22 = vld [vmem:[#allocation8 + $0x9e4] ss:$28 sps:$4 sm:$0xff]  }
 0x1e8   :  { %6562 = vmatpush1.bf16.msra.mxu0 %v11229_v23  ;;  %6890 = vmatpush1.bf16.msra.mxu1 %v11232_v24  ;;  %v11295_v23 = vld [vmem:[#allocation8 + $0x9d8] ss:$28 sps:$4 sm:$0xff]   ;;  %v11298_v24 = vld [vmem:[#allocation8 + $0x9e0] ss:$28 sps:$4 sm:$0xff]  }
 0x1e9   :  { %6563 = vmatprep.subr.bf16.mxu0 %v11237_v25  ;;  %6891 = vmatprep.subr.bf16.mxu1 %v11240_v27  ;;  %v13167_v25 = vld [vmem:[#allocation7] sm:$0xff] }
 0x1ea   :  { %v221_v27 = vrot.slane %v13167_v25, %v13165_v18 }
 0x1ec   :  { %6564 = vmatpush1.bf16.msra.mxu0 %v11235_v29  ;;  %6892 = vmatpush1.bf16.msra.mxu1 %v11238_v30  ;;  %v232_v29 = vsub.s32 7, %v13095_v8  ;;  %v11303_v30 = vld [vmem:[#allocation8 + $0xa14] ss:$28 sps:$4 sm:$0xff]  }
 0x1ed   :  { %6565 = vmatprep.subr.bf16.mxu0 %v11243_v32  ;;  %6893 = vmatprep.subr.bf16.mxu1 %v11246_v33  ;;  %v11306_v32 = vld [vmem:[#allocation8 + $0xa1c] ss:$28 sps:$4 sm:$0xff]   ;;  %v563_v33 = vadd.f32 %v13130_v47, %v221_v27  ;;  %v11315_v47 = vld [vmem:[#allocation8 + $0xa84] ss:$28 sps:$4 sm:$0xff]   ;;  %v11357_v27 = vld [vmem:[#allocation8 + $0xc0c] ss:$28 sps:$4 sm:$0xff]  }
 0x1f0   :  { %6566 = vmatpush1.bf16.msra.mxu0 %v11241_v34  ;;  %6894 = vmatpush1.bf16.msra.mxu1 %v11244_v17  ;;  %v11301_v34 = vld [vmem:[#allocation8 + $0xa10] ss:$28 sps:$4 sm:$0xff]   ;;  %v11304_v17 = vld [vmem:[#allocation8 + $0xa18] ss:$28 sps:$4 sm:$0xff]  }
 0x1f1   :  { %6567 = vmatprep.subr.bf16.mxu0 %v11249_v35  ;;  %6895 = vmatprep.subr.bf16.mxu1 %v11252_v36  ;;  %v233_v35 = vrot.slane %v13167_v25, %v232_v29  ;;  %v11309_v36 = vld [vmem:[#allocation8 + $0xa4c] ss:$28 sps:$4 sm:$0xff]  }
 0x1f4   :  { %6568 = vmatpush1.bf16.msra.mxu0 %v11247_v37  ;;  %6896 = vmatpush1.bf16.msra.mxu1 %v11250_v39  ;;  %v11312_v37 = vld [vmem:[#allocation8 + $0xa54] ss:$28 sps:$4 sm:$0xff]   ;;  %v778_v39 = vmax.f32 %v563_v33, 0.0 }
 0x1f5   :  { %6569 = vmatprep.subr.bf16.mxu0 %v11255_v40  ;;  %6897 = vmatprep.subr.bf16.mxu1 %v11258_v41  ;;  %v11307_v40 = vld [vmem:[#allocation8 + $0xa48] ss:$28 sps:$4 sm:$0xff]   ;;  %v11310_v41 = vld [vmem:[#allocation8 + $0xa50] ss:$28 sps:$4 sm:$0xff]  }
 0x1f6   :  { %v11358_v33 = vld [vmem:[#allocation8 + $0xc10] ss:$28 sps:$4 sm:$0xff]  }
 0x1f8   :  { %6570 = vmatpush1.bf16.msra.mxu0 %v11253_v43  ;;  %6898 = vmatpush1.bf16.msra.mxu1 %v11256_v46  ;;  %v606_v43 = vadd.f32 %v13153_v59, %v233_v35  ;;  %v11318_v46 = vld [vmem:[#allocation8 + $0xa8c] ss:$28 sps:$4 sm:$0xff]   ;;  %v11319_v59 = vld [vmem:[#allocation8 + $0xab8] ss:$28 sps:$4 sm:$0xff]   ;;  %v11361_v35 = vld [vmem:[#allocation8 + $0xc40] ss:$28 sps:$4 sm:$0xff]  }
 0x1f9   :  { %6571 = vmatprep.subr.bf16.mxu0 %v11261_v49  ;;  %6899 = vmatprep.subr.bf16.mxu1 %v11264_v50  ;;  %v11313_v49 = vld [vmem:[#allocation8 + $0xa80] ss:$28 sps:$4 sm:$0xff]   ;;  %v11316_v50 = vld [vmem:[#allocation8 + $0xa88] ss:$28 sps:$4 sm:$0xff]  }
 0x1fc   :  { %6572 = vmatpush1.bf16.msra.mxu0 %v11259_v51  ;;  %6900 = vmatpush1.bf16.msra.mxu1 %v11262_v53  ;;  %v781_v51 = vmax.f32 %v606_v43, 0.0  ;;  %v13177_v53 = vpack.c.bf16 %v778_v39, %v778_v39  ;;  %v11372_v39 = vld [vmem:[#allocation8 + $0xc84] ss:$28 sps:$4 sm:$0xff]   ;;  %v11375_v43 = vld [vmem:[#allocation8 + $0xcb4] ss:$28 sps:$4 sm:$0xff]  }
 0x1fd   :  { %6573 = vmatprep.subr.bf16.mxu0 %v11267_v55  ;;  %6901 = vmatprep.subr.bf16.mxu1 %v11270_v56  ;;  %v11321_v55 = vld [vmem:[#allocation8 + $0xabc] ss:$28 sps:$4 sm:$0xff]   ;;  %v11324_v56 = vld [vmem:[#allocation8 + $0xac4] ss:$28 sps:$4 sm:$0xff]  }
 0x200   :  { %6574 = vmatpush1.bf16.msra.mxu0 %v11265_v57  ;;  %6902 = vmatpush1.bf16.msra.mxu1 %v11268_v58  ;;  %v13179_v57 = vpack.c.bf16 %v781_v51, %v781_v51  ;;  %v11322_v58 = vld [vmem:[#allocation8 + $0xac0] ss:$28 sps:$4 sm:$0xff]   ;;  %v11384_v51 = vld [vmem:[#allocation8 + $0xcf4] ss:$28 sps:$4 sm:$0xff]  }
 0x201   :  { %6575 = vmatprep.subr.bf16.mxu0 %v11273_v60  ;;  %6903 = vmatprep.subr.bf16.mxu1 %v11276_v62  ;;  %v11327_v60 = vld [vmem:[#allocation8 + $0xaf4] ss:$28 sps:$4 sm:$0xff]   ;;  %v11330_v62 = vld [vmem:[#allocation8 + $0xafc] ss:$28 sps:$4 sm:$0xff]  }
 0x204   :  { %6576 = vmatpush1.bf16.msra.mxu0 %v11271_v63  ;;  %6904 = vmatpush1.bf16.msra.mxu1 %v11274_v2  ;;  %v11325_v63 = vld [vmem:[#allocation8 + $0xaf0] ss:$28 sps:$4 sm:$0xff]   ;;  %v11328_v2 = vld [vmem:[#allocation8 + $0xaf8] ss:$28 sps:$4 sm:$0xff]  }
 0x205   :  { %6577 = vmatprep.subr.bf16.mxu0 %v11279_v3  ;;  %6905 = vmatprep.subr.bf16.mxu1 %v11282_v4  ;;  %v11333_v3 = vld [vmem:[#allocation8 + $0xb2c] ss:$28 sps:$4 sm:$0xff]   ;;  %v11336_v4 = vld [vmem:[#allocation8 + $0xb34] ss:$28 sps:$4 sm:$0xff]  }
 0x208   :  { %6578 = vmatpush1.bf16.msra.mxu0 %v11277_v10  ;;  %6906 = vmatpush1.bf16.msra.mxu1 %v11280_v5  ;;  %v11331_v10 = vld [vmem:[#allocation8 + $0xb28] ss:$28 sps:$4 sm:$0xff]   ;;  %v11334_v5 = vld [vmem:[#allocation8 + $0xb30] ss:$28 sps:$4 sm:$0xff]  }
 0x209   :  { %6579 = vmatprep.subr.bf16.mxu0 %v11285_v31  ;;  %6907 = vmatprep.subr.bf16.mxu1 %v11288_v6  ;;  %v11339_v31 = vld [vmem:[#allocation8 + $0xb64] ss:$28 sps:$4 sm:$0xff]   ;;  %v11342_v6 = vld [vmem:[#allocation8 + $0xb6c] ss:$28 sps:$4 sm:$0xff]  }
 0x20c   :  { %6580 = vmatpush1.bf16.msra.mxu0 %v11283_v7  ;;  %6908 = vmatpush1.bf16.msra.mxu1 %v11286_v12  ;;  %v11337_v7 = vld [vmem:[#allocation8 + $0xb60] ss:$28 sps:$4 sm:$0xff]   ;;  %v11340_v12 = vld [vmem:[#allocation8 + $0xb68] ss:$28 sps:$4 sm:$0xff]  }
 0x20d   :  { %6581 = vmatprep.subr.bf16.mxu0 %v11291_v13  ;;  %6909 = vmatprep.subr.bf16.mxu1 %v11294_v48  ;;  %v11345_v13 = vld [vmem:[#allocation8 + $0xb9c] ss:$28 sps:$4 sm:$0xff]   ;;  %v11348_v48 = vld [vmem:[#allocation8 + $0xba4] ss:$28 sps:$4 sm:$0xff]  }
 0x210   :  { %6582 = vmatpush1.bf16.msra.mxu0 %v11289_v15  ;;  %6910 = vmatpush1.bf16.msra.mxu1 %v11292_v16  ;;  %v11343_v15 = vld [vmem:[#allocation8 + $0xb98] ss:$28 sps:$4 sm:$0xff]   ;;  %v11346_v16 = vld [vmem:[#allocation8 + $0xba0] ss:$28 sps:$4 sm:$0xff]  }
 0x211   :  { %6583 = vmatprep.subr.bf16.mxu0 %v11297_v21  ;;  %6911 = vmatprep.subr.bf16.mxu1 %v11300_v22  ;;  %v11351_v21 = vld [vmem:[#allocation8 + $0xbd4] ss:$28 sps:$4 sm:$0xff]   ;;  %v11354_v22 = vld [vmem:[#allocation8 + $0xbdc] ss:$28 sps:$4 sm:$0xff]  }
 0x214   :  { %6584 = vmatpush1.bf16.msra.mxu0 %v11295_v23  ;;  %6912 = vmatpush1.bf16.msra.mxu1 %v11298_v24  ;;  %v11349_v23 = vld [vmem:[#allocation8 + $0xbd0] ss:$28 sps:$4 sm:$0xff]   ;;  %v11352_v24 = vld [vmem:[#allocation8 + $0xbd8] ss:$28 sps:$4 sm:$0xff]  }
 0x215   :  { %6585 = vmatprep.subr.bf16.mxu0 %v11303_v30  ;;  %6913 = vmatprep.subr.bf16.mxu1 %v11306_v32  ;;  %v11360_v30 = vld [vmem:[#allocation8 + $0xc14] ss:$28 sps:$4 sm:$0xff]   ;;  %v11355_v32 = vld [vmem:[#allocation8 + $0xc08] ss:$28 sps:$4 sm:$0xff]  }
 0x218   :  { %6586 = vmatpush1.bf16.msra.mxu0 %v11301_v34  ;;  %6914 = vmatpush1.bf16.msra.mxu1 %v11304_v17  ;;  %v11363_v34 = vld [vmem:[#allocation8 + $0xc44] ss:$28 sps:$4 sm:$0xff]   ;;  %v11366_v17 = vld [vmem:[#allocation8 + $0xc4c] ss:$28 sps:$4 sm:$0xff]  }
 0x219   :  { %6587 = vmatprep.subr.bf16.mxu0 %v11309_v36  ;;  %6915 = vmatprep.subr.bf16.mxu1 %v11312_v37  ;;  %v11364_v36 = vld [vmem:[#allocation8 + $0xc48] ss:$28 sps:$4 sm:$0xff]   ;;  %v11369_v37 = vld [vmem:[#allocation8 + $0xc7c] ss:$28 sps:$4 sm:$0xff]  }
 0x21c   :  { %6588 = vmatpush1.bf16.msra.mxu0 %v11307_v40  ;;  %6916 = vmatpush1.bf16.msra.mxu1 %v11310_v41  ;;  %v11367_v40 = vld [vmem:[#allocation8 + $0xc78] ss:$28 sps:$4 sm:$0xff]   ;;  %v11370_v41 = vld [vmem:[#allocation8 + $0xc80] ss:$28 sps:$4 sm:$0xff]  }
 0x21d   :  { %6598 = vmatprep.subr.bf16.mxu0 %v11315_v47  ;;  %6926 = vmatprep.subr.bf16.mxu1 %v11318_v46  ;;  %v11378_v47 = vld [vmem:[#allocation8 + $0xcbc] ss:$28 sps:$4 sm:$0xff]   ;;  %v11373_v46 = vld [vmem:[#allocation8 + $0xcb0] ss:$28 sps:$4 sm:$0xff]  }
 0x21f   :  { %6590 = vmatmul.mubr.bf16.vlgmr.msra.gmra.mrb[8].mxu0 %v13177_v53  ;;  %6918 = vmatmul.mubr.bf16.vlgmr.msra.gmra.mrb[24].mxu1 %v13177_v53 }
 0x220   :  { %6599 = vmatpush1.bf16.msra.mxu0 %v11313_v49  ;;  %6927 = vmatpush1.bf16.msra.mxu1 %v11316_v50  ;;  %v11376_v49 = vld [vmem:[#allocation8 + $0xcb8] ss:$28 sps:$4 sm:$0xff]   ;;  %v11381_v50 = vld [vmem:[#allocation8 + $0xcec] ss:$28 sps:$4 sm:$0xff]  }
 0x221   :  { %6600 = vmatprep.subr.bf16.mxu0 %v11321_v55  ;;  %6928 = vmatprep.subr.bf16.mxu1 %v11324_v56  ;;  %v11379_v55 = vld [vmem:[#allocation8 + $0xce8] ss:$28 sps:$4 sm:$0xff]   ;;  %v11382_v56 = vld [vmem:[#allocation8 + $0xcf0] ss:$28 sps:$4 sm:$0xff]  }
 0x222   :  { %6630 = vmatprep.mubr.bf16.mxu0 %v13179_v57  ;;  %6958 = vmatprep.mubr.bf16.mxu1 %v13179_v57 }
 0x224   :  { %6601 = vmatpush1.bf16.msra.mxu0 %v11319_v59  ;;  %6929 = vmatpush1.bf16.msra.mxu1 %v11322_v58  ;;  %v11387_v59 = vld [vmem:[#allocation8 + $0xd24] ss:$28 sps:$4 sm:$0xff]   ;;  %v11390_v58 = vld [vmem:[#allocation8 + $0xd2c] ss:$28 sps:$4 sm:$0xff]  }
 0x225   :  { %6602 = vmatprep.subr.bf16.mxu0 %v11327_v60  ;;  %6930 = vmatprep.subr.bf16.mxu1 %v11330_v62  ;;  %v11385_v60 = vld [vmem:[#allocation8 + $0xd20] ss:$28 sps:$4 sm:$0xff]   ;;  %v11388_v62 = vld [vmem:[#allocation8 + $0xd28] ss:$28 sps:$4 sm:$0xff]  }
 0x228   :  { %6603 = vmatpush1.bf16.msra.mxu0 %v11325_v63  ;;  %6931 = vmatpush1.bf16.msra.mxu1 %v11328_v2  ;;  %v13186_v63 = vsub.s32 6, %v13095_v8  ;;  %v13188_v2 = vld [vmem:[#allocation7 + $0x8] sm:$0xff]  ;;  %v11699_v8 = vld [vmem:[#allocation8 + $0x1884] ss:$28 sps:$4 sm:$0xff]  }
 0x229   :  { %6604 = vmatprep.subr.bf16.mxu0 %v11333_v3  ;;  %6932 = vmatprep.subr.bf16.mxu1 %v11336_v4  ;;  %v11393_v3 = vld [vmem:[#allocation8 + $0xd5c] ss:$28 sps:$4 sm:$0xff]   ;;  %v11396_v4 = vld [vmem:[#allocation8 + $0xd64] ss:$28 sps:$4 sm:$0xff]  }
 0x22c   :  { %6605 = vmatpush1.bf16.msra.mxu0 %v11331_v10  ;;  %6933 = vmatpush1.bf16.msra.mxu1 %v11334_v5  ;;  %v11391_v10 = vld [vmem:[#allocation8 + $0xd58] ss:$28 sps:$4 sm:$0xff]   ;;  %v11394_v5 = vld [vmem:[#allocation8 + $0xd60] ss:$28 sps:$4 sm:$0xff]  }
 0x22d   :  { %6606 = vmatprep.subr.bf16.mxu0 %v11339_v31  ;;  %6934 = vmatprep.subr.bf16.mxu1 %v11342_v6  ;;  %v229_v31 = vrot.slane %v13167_v25, %v13186_v63  ;;  %v11399_v6 = vld [vmem:[#allocation8 + $0xd94] ss:$28 sps:$4 sm:$0xff]   ;;  %v11405_v25 = vld [vmem:[#allocation8 + $0xdcc] ss:$28 sps:$4 sm:$0xff]  }
 0x230   :  { %6607 = vmatpush1.bf16.msra.mxu0 %v11337_v7  ;;  %6935 = vmatpush1.bf16.msra.mxu1 %v11340_v12  ;;  %v11402_v7 = vld [vmem:[#allocation8 + $0xd9c] ss:$28 sps:$4 sm:$0xff]   ;;  %v241_v12 = vrot.slane %v13188_v2, %v13103_v11 }
 0x231   :  { %6608 = vmatprep.subr.bf16.mxu0 %v11345_v13  ;;  %6936 = vmatprep.subr.bf16.mxu1 %v11348_v48  ;;  %v604_v13 = vadd.f32 %v13148_v54, %v229_v31  ;;  %v11397_v48 = vld [vmem:[#allocation8 + $0xd90] ss:$28 sps:$4 sm:$0xff]   ;;  %v11411_v54 = vld [vmem:[#allocation8 + $0xe04] ss:$28 sps:$4 sm:$0xff]  }
 0x232   :  { %v11442_v31 = vld [vmem:[#allocation8 + $0xf20] ss:$28 sps:$4 sm:$0xff]  }
 0x234   :  { %6609 = vmatpush1.bf16.msra.mxu0 %v11343_v15  ;;  %6937 = vmatpush1.bf16.msra.mxu1 %v11346_v16  ;;  %v11400_v15 = vld [vmem:[#allocation8 + $0xd98] ss:$28 sps:$4 sm:$0xff]   ;;  %v13195_v16 = vpop.f32.mrb[16].mxu1 }
 0x235   :  { %6610 = vmatprep.subr.bf16.mxu0 %v11351_v21  ;;  %6938 = vmatprep.subr.bf16.mxu1 %v11354_v22  ;;  %v11408_v21 = vld [vmem:[#allocation8 + $0xdd4] ss:$28 sps:$4 sm:$0xff]   ;;  %v13197_v22 = vpop.f32.mrb[17].mxu1 }
 0x238   :  { %6611 = vmatpush1.bf16.msra.mxu0 %v11349_v23  ;;  %6939 = vmatpush1.bf16.msra.mxu1 %v11352_v24  ;;  %v647_v23 = vadd.f32 %v13134_v52, %v241_v12  ;;  %v780_v24 = vmax.f32 %v604_v13, 0.0  ;;  %v11450_v12 = vld [vmem:[#allocation8 + $0xf5c] ss:$28 sps:$4 sm:$0xff]  }
 0x239   :  { %6612 = vmatprep.subr.bf16.mxu0 %v11357_v27  ;;  %6940 = vmatprep.subr.bf16.mxu1 %v11360_v30  ;;  %v11403_v27 = vld [vmem:[#allocation8 + $0xdc8] ss:$28 sps:$4 sm:$0xff]   ;;  %v11406_v30 = vld [vmem:[#allocation8 + $0xdd0] ss:$28 sps:$4 sm:$0xff]   ;;  %v11448_v13 = vld [vmem:[#allocation8 + $0xf58] ss:$28 sps:$4 sm:$0xff]  }
 0x23c   :  { %6613 = vmatpush1.bf16.msra.mxu0 %v11355_v32  ;;  %6941 = vmatpush1.bf16.msra.mxu1 %v11358_v33  ;;  %v689_v32 = vpop.f32.mrb[18].mxu1 }
 0x23d   :  { %6614 = vmatprep.subr.bf16.mxu0 %v11363_v34  ;;  %6942 = vmatprep.subr.bf16.mxu1 %v11366_v17  ;;  %v690_v33 = vpop.f32.mrb[19].mxu1  ;;  %v11414_v34 = vld [vmem:[#allocation8 + $0xe0c] ss:$28 sps:$4 sm:$0xff]   ;;  %v783_v17 = vmax.f32 %v647_v23, 0.0  ;;  %v11459_v23 = vld [vmem:[#allocation8 + $0xfc4] ss:$28 sps:$4 sm:$0xff]  }
 0x23e   :  { %v11465_v32 = vld [vmem:[#allocation8 + $0xffc] ss:$28 sps:$4 sm:$0xff]  }
 0x23f   :  { %v13202_v52 = vpack.c.bf16 %v783_v17, %v783_v17  ;;  %v11463_v33 = vld [vmem:[#allocation8 + $0xff8] ss:$28 sps:$4 sm:$0xff]  }
 0x240   :  { %6615 = vmatpush1.bf16.msra.mxu0 %v11361_v35  ;;  %6943 = vmatpush1.bf16.msra.mxu1 %v11364_v36  ;;  %v11409_v35 = vld [vmem:[#allocation8 + $0xe00] ss:$28 sps:$4 sm:$0xff]   ;;  %v13200_v36 = vpack.c.bf16 %v780_v24, %v780_v24  ;;  %v11471_v17 = vld [vmem:[#allocation8 + $0x1034] ss:$28 sps:$4 sm:$0xff]  }
 0x241   :  { %6616 = vmatprep.subr.bf16.mxu0 %v11369_v37  ;;  %6944 = vmatprep.subr.bf16.mxu1 %v11372_v39  ;;  %v11412_v37 = vld [vmem:[#allocation8 + $0xe08] ss:$28 sps:$4 sm:$0xff]   ;;  %v11415_v39 = vld [vmem:[#allocation8 + $0xe38] ss:$28 sps:$4 sm:$0xff]   ;;  %v11457_v24 = vld [vmem:[#allocation8 + $0xfc0] ss:$28 sps:$4 sm:$0xff]  }
 0x244   :  { %6617 = vmatpush1.bf16.msra.mxu0 %v11367_v40  ;;  %6945 = vmatpush1.bf16.msra.mxu1 %v11370_v41  ;;  %v11417_v40 = vld [vmem:[#allocation8 + $0xe3c] ss:$28 sps:$4 sm:$0xff]   ;;  %v11420_v41 = vld [vmem:[#allocation8 + $0xe44] ss:$28 sps:$4 sm:$0xff]  }
 0x245   :  { %6618 = vmatprep.subr.bf16.mxu0 %v11375_v43  ;;  %6946 = vmatprep.subr.bf16.mxu1 %v11378_v47  ;;  %v11418_v43 = vld [vmem:[#allocation8 + $0xe40] ss:$28 sps:$4 sm:$0xff]   ;;  %v11423_v47 = vld [vmem:[#allocation8 + $0xe74] ss:$28 sps:$4 sm:$0xff]  }
 0x248   :  { %6619 = vmatpush1.bf16.msra.mxu0 %v11373_v46  ;;  %6947 = vmatpush1.bf16.msra.mxu1 %v11376_v49  ;;  %v11426_v46 = vld [vmem:[#allocation8 + $0xe7c] ss:$28 sps:$4 sm:$0xff]   ;;  %v11421_v49 = vld [vmem:[#allocation8 + $0xe70] ss:$28 sps:$4 sm:$0xff]  }
 0x249   :  { %6620 = vmatprep.subr.bf16.mxu0 %v11381_v50  ;;  %6948 = vmatprep.subr.bf16.mxu1 %v11384_v51  ;;  %v11424_v50 = vld [vmem:[#allocation8 + $0xe78] ss:$28 sps:$4 sm:$0xff]   ;;  %v11429_v51 = vld [vmem:[#allocation8 + $0xeac] ss:$28 sps:$4 sm:$0xff]  }
 0x24c   :  { %6621 = vmatpush1.bf16.msra.mxu0 %v11379_v55  ;;  %6949 = vmatpush1.bf16.msra.mxu1 %v11382_v56  ;;  %v11427_v55 = vld [vmem:[#allocation8 + $0xea8] ss:$28 sps:$4 sm:$0xff]   ;;  %v11432_v56 = vld [vmem:[#allocation8 + $0xeb4] ss:$28 sps:$4 sm:$0xff]  }
 0x24d   :  { %6622 = vmatprep.subr.bf16.mxu0 %v11387_v59  ;;  %6950 = vmatprep.subr.bf16.mxu1 %v11390_v58  ;;  %v11430_v59 = vld [vmem:[#allocation8 + $0xeb0] ss:$28 sps:$4 sm:$0xff]   ;;  %v11435_v58 = vld [vmem:[#allocation8 + $0xee4] ss:$28 sps:$4 sm:$0xff]  }
 0x250   :  { %6623 = vmatpush1.bf16.msra.mxu0 %v11385_v60  ;;  %6951 = vmatpush1.bf16.msra.mxu1 %v11388_v62  ;;  %v11433_v60 = vld [vmem:[#allocation8 + $0xee0] ss:$28 sps:$4 sm:$0xff]   ;;  %v11438_v62 = vld [vmem:[#allocation8 + $0xeec] ss:$28 sps:$4 sm:$0xff]  }
 0x251   :  { %6624 = vmatprep.subr.bf16.mxu0 %v11393_v3  ;;  %6952 = vmatprep.subr.bf16.mxu1 %v11396_v4  ;;  %v11436_v3 = vld [vmem:[#allocation8 + $0xee8] ss:$28 sps:$4 sm:$0xff]   ;;  %v11441_v4 = vld [vmem:[#allocation8 + $0xf1c] ss:$28 sps:$4 sm:$0xff]  }
 0x254   :  { %6625 = vmatpush1.bf16.msra.mxu0 %v11391_v10  ;;  %6953 = vmatpush1.bf16.msra.mxu1 %v11394_v5  ;;  %v11439_v10 = vld [vmem:[#allocation8 + $0xf18] ss:$28 sps:$4 sm:$0xff]   ;;  %v11444_v5 = vld [vmem:[#allocation8 + $0xf24] ss:$28 sps:$4 sm:$0xff]  }
 0x255   :  { %6626 = vmatprep.subr.bf16.mxu0 %v11399_v6  ;;  %6954 = vmatprep.subr.bf16.mxu1 %v11402_v7  ;;  %v11447_v6 = vld [vmem:[#allocation8 + $0xf54] ss:$28 sps:$4 sm:$0xff]  }
 0x256   :  { %v11445_v7 = vld [vmem:[#allocation8 + $0xf50] ss:$28 sps:$4 sm:$0xff]  }
 0x258   :  { %6627 = vmatpush1.bf16.msra.mxu0 %v11397_v48  ;;  %6955 = vmatpush1.bf16.msra.mxu1 %v11400_v15  ;;  %v11453_v48 = vld [vmem:[#allocation8 + $0xf8c] ss:$28 sps:$4 sm:$0xff]  }
 0x259   :  { %6628 = vmatprep.subr.bf16.mxu0 %v11405_v25  ;;  %6956 = vmatprep.subr.bf16.mxu1 %v11408_v21  ;;  %v11451_v15 = vld [vmem:[#allocation8 + $0xf88] ss:$28 sps:$4 sm:$0xff]   ;;  %v11456_v25 = vld [vmem:[#allocation8 + $0xf94] ss:$28 sps:$4 sm:$0xff]  }
 0x25a   :  { %v11454_v21 = vld [vmem:[#allocation8 + $0xf90] ss:$28 sps:$4 sm:$0xff]  }
 0x25c   :  { %6629 = vmatpush1.bf16.msra.mxu0 %v11403_v27  ;;  %6957 = vmatpush1.bf16.msra.mxu1 %v11406_v30  ;;  %v11462_v27 = vld [vmem:[#allocation8 + $0xfcc] ss:$28 sps:$4 sm:$0xff]  }
 0x25d   :  { %6639 = vmatprep.subr.bf16.mxu0 %v11411_v54  ;;  %6967 = vmatprep.subr.bf16.mxu1 %v11414_v34  ;;  %v11460_v30 = vld [vmem:[#allocation8 + $0xfc8] ss:$28 sps:$4 sm:$0xff]   ;;  %v11466_v34 = vld [vmem:[#allocation8 + $0x1000] ss:$28 sps:$4 sm:$0xff]  }
 0x25e   :  { %v11468_v54 = vld [vmem:[#allocation8 + $0x1004] ss:$28 sps:$4 sm:$0xff]  }
 0x25f   :  { %6631 = vmatmul.mubr.bf16.vlgmr.msra.gmra.mrb[8].mxu0 %v13200_v36  ;;  %6959 = vmatmul.mubr.bf16.vlgmr.msra.gmra.mrb[24].mxu1 %v13200_v36 }
 0x260   :  { %6640 = vmatpush1.bf16.msra.mxu0 %v11409_v35  ;;  %6671 = vmatprep.mubr.bf16.mxu0 %v13202_v52  ;;  %v11469_v35 = vld [vmem:[#allocation8 + $0x1030] ss:$28 sps:$4 sm:$0xff]  }
 0x261   :  { %6968 = vmatpush1.bf16.msra.mxu1 %v11412_v37  ;;  %6999 = vmatprep.mubr.bf16.mxu1 %v13202_v52  ;;  %v11474_v37 = vld [vmem:[#allocation8 + $0x103c] ss:$28 sps:$4 sm:$0xff]  }
 0x262   :  { %6641 = vmatprep.subr.bf16.mxu0 %v11417_v40  ;;  %6969 = vmatprep.subr.bf16.mxu1 %v11420_v41  ;;  %v11477_v40 = vld [vmem:[#allocation8 + $0x106c] ss:$28 sps:$4 sm:$0xff]  }
 0x263   :  { %v11475_v41 = vld [vmem:[#allocation8 + $0x1068] ss:$28 sps:$4 sm:$0xff]  }
 0x264   :  { %6642 = vmatpush1.bf16.msra.mxu0 %v11415_v39  ;;  %v11472_v39 = vld [vmem:[#allocation8 + $0x1038] ss:$28 sps:$4 sm:$0xff]  }
 0x265   :  { %6970 = vmatpush1.bf16.msra.mxu1 %v11418_v43  ;;  %6643 = vmatprep.subr.bf16.mxu0 %v11423_v47  ;;  %v11480_v43 = vld [vmem:[#allocation8 + $0x1074] ss:$28 sps:$4 sm:$0xff]  }
 0x266   :  { %6971 = vmatprep.subr.bf16.mxu1 %v11426_v46  ;;  %v11478_v47 = vld [vmem:[#allocation8 + $0x1070] ss:$28 sps:$4 sm:$0xff]   ;;  %v11483_v46 = vld [vmem:[#allocation8 + $0x10a4] ss:$28 sps:$4 sm:$0xff]  }
 0x268   :  { %6644 = vmatpush1.bf16.msra.mxu0 %v11421_v49  ;;  %v11481_v49 = vld [vmem:[#allocation8 + $0x10a0] ss:$28 sps:$4 sm:$0xff]  }
 0x269   :  { %6972 = vmatpush1.bf16.msra.mxu1 %v11424_v50  ;;  %6645 = vmatprep.subr.bf16.mxu0 %v11429_v51  ;;  %v11486_v50 = vld [vmem:[#allocation8 + $0x10ac] ss:$28 sps:$4 sm:$0xff]  }
 0x26a   :  { %6973 = vmatprep.subr.bf16.mxu1 %v11432_v56  ;;  %v11484_v51 = vld [vmem:[#allocation8 + $0x10a8] ss:$28 sps:$4 sm:$0xff]   ;;  %v11487_v56 = vld [vmem:[#allocation8 + $0x10d8] ss:$28 sps:$4 sm:$0xff]  }
 0x26c   :  { %6646 = vmatpush1.bf16.msra.mxu0 %v11427_v55  ;;  %v11489_v55 = vld [vmem:[#allocation8 + $0x10dc] ss:$28 sps:$4 sm:$0xff]  }
 0x26d   :  { %6974 = vmatpush1.bf16.msra.mxu1 %v11430_v59  ;;  %6647 = vmatprep.subr.bf16.mxu0 %v11435_v58  ;;  %v11492_v59 = vld [vmem:[#allocation8 + $0x10e4] ss:$28 sps:$4 sm:$0xff]   ;;  %v237_v58 = vrot.slane %v13188_v2, %v13098_v9 }
 0x26e   :  { %6975 = vmatprep.subr.bf16.mxu1 %v11438_v62  ;;  %v11495_v62 = vld [vmem:[#allocation8 + $0x1114] ss:$28 sps:$4 sm:$0xff]  }
 0x270   :  { %6648 = vmatpush1.bf16.msra.mxu0 %v11433_v60  ;;  %v11490_v60 = vld [vmem:[#allocation8 + $0x10e0] ss:$28 sps:$4 sm:$0xff]  }
 0x271   :  { %6976 = vmatpush1.bf16.msra.mxu1 %v11436_v3  ;;  %6649 = vmatprep.subr.bf16.mxu0 %v11441_v4  ;;  %v11493_v3 = vld [vmem:[#allocation8 + $0x1110] ss:$28 sps:$4 sm:$0xff]   ;;  %v11498_v4 = vld [vmem:[#allocation8 + $0x111c] ss:$28 sps:$4 sm:$0xff]  }
 0x272   :  { %6977 = vmatprep.subr.bf16.mxu1 %v11444_v5  ;;  %v645_v5 = vadd.f32 %v13126_v45, %v237_v58  ;;  %v11541_v58 = vld [vmem:[#allocation8 + $0x12d0] ss:$28 sps:$4 sm:$0xff]  }
 0x274   :  { %6650 = vmatpush1.bf16.msra.mxu0 %v11439_v10  ;;  %v249_v10 = vrot.slane %v13188_v2, %v13110_v20  ;;  %v11505_v2 = vld [vmem:[#allocation8 + $0x1180] ss:$28 sps:$4 sm:$0xff]  }
 0x275   :  { %6978 = vmatpush1.bf16.msra.mxu1 %v11442_v31  ;;  %6651 = vmatprep.subr.bf16.mxu0 %v11447_v6  ;;  %v11496_v31 = vld [vmem:[#allocation8 + $0x1118] ss:$28 sps:$4 sm:$0xff]   ;;  %v11501_v6 = vld [vmem:[#allocation8 + $0x114c] ss:$28 sps:$4 sm:$0xff]  }
 0x276   :  { %6979 = vmatprep.subr.bf16.mxu1 %v11450_v12  ;;  %v11504_v12 = vld [vmem:[#allocation8 + $0x1154] ss:$28 sps:$4 sm:$0xff]  }
 0x278   :  { %6652 = vmatpush1.bf16.msra.mxu0 %v11445_v7  ;;  %v11499_v7 = vld [vmem:[#allocation8 + $0x1148] ss:$28 sps:$4 sm:$0xff]  }
 0x279   :  { %6980 = vmatpush1.bf16.msra.mxu1 %v11448_v13  ;;  %6653 = vmatprep.subr.bf16.mxu0 %v11453_v48  ;;  %v688_v13 = vadd.f32 %v13197_v22, %v249_v10  ;;  %v782_v48 = vmax.f32 %v645_v5, 0.0  ;;  %v11552_v10 = vld [vmem:[#allocation8 + $0x1314] ss:$28 sps:$4 sm:$0xff]  }
 0x27a   :  { %6981 = vmatprep.subr.bf16.mxu1 %v11456_v25  ;;  %v11507_v25 = vld [vmem:[#allocation8 + $0x1184] ss:$28 sps:$4 sm:$0xff]   ;;  %v11550_v5 = vld [vmem:[#allocation8 + $0x1310] ss:$28 sps:$4 sm:$0xff]  }
 0x27b   :  { %v785_v45 = vmax.f32 %v688_v13, 0.0  ;;  %v11561_v13 = vld [vmem:[#allocation8 + $0x137c] ss:$28 sps:$4 sm:$0xff]  }
 0x27c   :  { %6654 = vmatpush1.bf16.msra.mxu0 %v11451_v15  ;;  %v11502_v15 = vld [vmem:[#allocation8 + $0x1150] ss:$28 sps:$4 sm:$0xff]  }
 0x27d   :  { %6982 = vmatpush1.bf16.msra.mxu1 %v11454_v21  ;;  %6655 = vmatprep.subr.bf16.mxu0 %v11459_v23  ;;  %v11510_v21 = vld [vmem:[#allocation8 + $0x118c] ss:$28 sps:$4 sm:$0xff]   ;;  %v13216_v22 = vpack.c.bf16 %v785_v45, %v785_v45  ;;  %v11570_v45 = vld [vmem:[#allocation8 + $0x13bc] ss:$28 sps:$4 sm:$0xff]  }
 0x27e   :  { %6983 = vmatprep.subr.bf16.mxu1 %v11462_v27  ;;  %v11508_v23 = vld [vmem:[#allocation8 + $0x1188] ss:$28 sps:$4 sm:$0xff]  }
 0x27f   :  { %v11516_v27 = vld [vmem:[#allocation8 + $0x11c4] ss:$28 sps:$4 sm:$0xff]  }
 0x280   :  { %6656 = vmatpush1.bf16.msra.mxu0 %v11457_v24  ;;  %v11513_v24 = vld [vmem:[#allocation8 + $0x11bc] ss:$28 sps:$4 sm:$0xff]  }
 0x281   :  { %6984 = vmatpush1.bf16.msra.mxu1 %v11460_v30  ;;  %6657 = vmatprep.subr.bf16.mxu0 %v11465_v32  ;;  %v13214_v30 = vpack.c.bf16 %v782_v48, %v782_v48  ;;  %v11511_v32 = vld [vmem:[#allocation8 + $0x11b8] ss:$28 sps:$4 sm:$0xff]  }
 0x282   :  { %6985 = vmatprep.subr.bf16.mxu1 %v11468_v54  ;;  %v11519_v54 = vld [vmem:[#allocation8 + $0x11f4] ss:$28 sps:$4 sm:$0xff]  }
 0x283   :  { %v11559_v48 = vld [vmem:[#allocation8 + $0x1378] ss:$28 sps:$4 sm:$0xff]  }
 0x284   :  { %6658 = vmatpush1.bf16.msra.mxu0 %v11463_v33  ;;  %v11514_v33 = vld [vmem:[#allocation8 + $0x11c0] ss:$28 sps:$4 sm:$0xff]  }
 0x285   :  { %6986 = vmatpush1.bf16.msra.mxu1 %v11466_v34  ;;  %6659 = vmatprep.subr.bf16.mxu0 %v11471_v17  ;;  %v11517_v34 = vld [vmem:[#allocation8 + $0x11f0] ss:$28 sps:$4 sm:$0xff]   ;;  %v11522_v17 = vld [vmem:[#allocation8 + $0x11fc] ss:$28 sps:$4 sm:$0xff]  }
 0x286   :  { %6987 = vmatprep.subr.bf16.mxu1 %v11474_v37  ;;  %v11525_v37 = vld [vmem:[#allocation8 + $0x122c] ss:$28 sps:$4 sm:$0xff]  }
 0x288   :  { %6660 = vmatpush1.bf16.msra.mxu0 %v11469_v35  ;;  %v11520_v35 = vld [vmem:[#allocation8 + $0x11f8] ss:$28 sps:$4 sm:$0xff]  }
 0x289   :  { %6988 = vmatpush1.bf16.msra.mxu1 %v11472_v39  ;;  %6661 = vmatprep.subr.bf16.mxu0 %v11477_v40  ;;  %v11523_v39 = vld [vmem:[#allocation8 + $0x1228] ss:$28 sps:$4 sm:$0xff]   ;;  %v11528_v40 = vld [vmem:[#allocation8 + $0x1234] ss:$28 sps:$4 sm:$0xff]  }
 0x28a   :  { %6989 = vmatprep.subr.bf16.mxu1 %v11480_v43  ;;  %v11531_v43 = vld [vmem:[#allocation8 + $0x1264] ss:$28 sps:$4 sm:$0xff]  }
 0x28c   :  { %6662 = vmatpush1.bf16.msra.mxu0 %v11475_v41  ;;  %v11526_v41 = vld [vmem:[#allocation8 + $0x1230] ss:$28 sps:$4 sm:$0xff]  }
 0x28d   :  { %6990 = vmatpush1.bf16.msra.mxu1 %v11478_v47  ;;  %6663 = vmatprep.subr.bf16.mxu0 %v11483_v46  ;;  %v11529_v47 = vld [vmem:[#allocation8 + $0x1260] ss:$28 sps:$4 sm:$0xff]   ;;  %v11534_v46 = vld [vmem:[#allocation8 + $0x126c] ss:$28 sps:$4 sm:$0xff]  }
 0x28e   :  { %6991 = vmatprep.subr.bf16.mxu1 %v11486_v50  ;;  %v11537_v50 = vld [vmem:[#allocation8 + $0x129c] ss:$28 sps:$4 sm:$0xff]  }
 0x290   :  { %6664 = vmatpush1.bf16.msra.mxu0 %v11481_v49  ;;  %v11532_v49 = vld [vmem:[#allocation8 + $0x1268] ss:$28 sps:$4 sm:$0xff]  }
 0x291   :  { %6992 = vmatpush1.bf16.msra.mxu1 %v11484_v51  ;;  %6665 = vmatprep.subr.bf16.mxu0 %v11489_v55  ;;  %v11535_v51 = vld [vmem:[#allocation8 + $0x1298] ss:$28 sps:$4 sm:$0xff]   ;;  %v11540_v55 = vld [vmem:[#allocation8 + $0x12a4] ss:$28 sps:$4 sm:$0xff]  }
 0x292   :  { %6993 = vmatprep.subr.bf16.mxu1 %v11492_v59  ;;  %v11543_v59 = vld [vmem:[#allocation8 + $0x12d4] ss:$28 sps:$4 sm:$0xff]  }
 0x294   :  { %6666 = vmatpush1.bf16.msra.mxu0 %v11487_v56  ;;  %v11538_v56 = vld [vmem:[#allocation8 + $0x12a0] ss:$28 sps:$4 sm:$0xff]  }
 0x295   :  { %6994 = vmatpush1.bf16.msra.mxu1 %v11490_v60  ;;  %6667 = vmatprep.subr.bf16.mxu0 %v11495_v62  ;;  %v11546_v60 = vld [vmem:[#allocation8 + $0x12dc] ss:$28 sps:$4 sm:$0xff]  }
 0x296   :  { %6995 = vmatprep.subr.bf16.mxu1 %v11498_v4  ;;  %v11544_v62 = vld [vmem:[#allocation8 + $0x12d8] ss:$28 sps:$4 sm:$0xff]   ;;  %v11547_v4 = vld [vmem:[#allocation8 + $0x1308] ss:$28 sps:$4 sm:$0xff]  }
 0x298   :  { %6668 = vmatpush1.bf16.msra.mxu0 %v11493_v3  ;;  %v11549_v3 = vld [vmem:[#allocation8 + $0x130c] ss:$28 sps:$4 sm:$0xff]  }
 0x299   :  { %6996 = vmatpush1.bf16.msra.mxu1 %v11496_v31  ;;  %6669 = vmatprep.subr.bf16.mxu0 %v11501_v6  ;;  %v11555_v31 = vld [vmem:[#allocation8 + $0x1344] ss:$28 sps:$4 sm:$0xff]  }
 0x29a   :  { %6997 = vmatprep.subr.bf16.mxu1 %v11504_v12  ;;  %v11553_v6 = vld [vmem:[#allocation8 + $0x1340] ss:$28 sps:$4 sm:$0xff]   ;;  %v11556_v12 = vld [vmem:[#allocation8 + $0x1348] ss:$28 sps:$4 sm:$0xff]  }
 0x29c   :  { %6670 = vmatpush1.bf16.msra.mxu0 %v11499_v7  ;;  %v11558_v7 = vld [vmem:[#allocation8 + $0x134c] ss:$28 sps:$4 sm:$0xff]  }
 0x29d   :  { %6998 = vmatpush1.bf16.msra.mxu1 %v11502_v15  ;;  %6680 = vmatprep.subr.bf16.mxu0 %v11507_v25  ;;  %v11564_v15 = vld [vmem:[#allocation8 + $0x1384] ss:$28 sps:$4 sm:$0xff]  }
 0x29e   :  { %7008 = vmatprep.subr.bf16.mxu1 %v11510_v21  ;;  %v11562_v25 = vld [vmem:[#allocation8 + $0x1380] ss:$28 sps:$4 sm:$0xff]   ;;  %v11567_v21 = vld [vmem:[#allocation8 + $0x13b4] ss:$28 sps:$4 sm:$0xff]  }
 0x29f   :  { %6672 = vmatmul.mubr.bf16.vlgmr.msra.gmra.mrb[8].mxu0 %v13214_v30 }
 0x2a0   :  { %7000 = vmatmul.mubr.bf16.vlgmr.msra.gmra.mrb[24].mxu1 %v13214_v30  ;;  %6681 = vmatpush1.bf16.msra.mxu0 %v11505_v2  ;;  %v11565_v2 = vld [vmem:[#allocation8 + $0x13b0] ss:$28 sps:$4 sm:$0xff]  }
 0x2a1   :  { %7009 = vmatpush1.bf16.msra.mxu1 %v11508_v23  ;;  %6682 = vmatprep.subr.bf16.mxu0 %v11513_v24  ;;  %v11568_v23 = vld [vmem:[#allocation8 + $0x13b8] ss:$28 sps:$4 sm:$0xff]   ;;  %v11573_v24 = vld [vmem:[#allocation8 + $0x13ec] ss:$28 sps:$4 sm:$0xff]  }
 0x2a2   :  { %7010 = vmatprep.subr.bf16.mxu1 %v11516_v27  ;;  %6712 = vmatprep.mubr.bf16.mxu0 %v13216_v22  ;;  %v11571_v27 = vld [vmem:[#allocation8 + $0x13e8] ss:$28 sps:$4 sm:$0xff]  }
 0x2a3   :  { %7040 = vmatprep.mubr.bf16.mxu1 %v13216_v22 }
 0x2a4   :  { %6683 = vmatpush1.bf16.msra.mxu0 %v11511_v32  ;;  %v11576_v32 = vld [vmem:[#allocation8 + $0x13f4] ss:$28 sps:$4 sm:$0xff]  }
 0x2a5   :  { %7011 = vmatpush1.bf16.msra.mxu1 %v11514_v33  ;;  %6684 = vmatprep.subr.bf16.mxu0 %v11519_v54  ;;  %v11574_v33 = vld [vmem:[#allocation8 + $0x13f0] ss:$28 sps:$4 sm:$0xff]   ;;  %v11579_v54 = vld [vmem:[#allocation8 + $0x1424] ss:$28 sps:$4 sm:$0xff]  }
 0x2a6   :  { %7012 = vmatprep.subr.bf16.mxu1 %v11522_v17  ;;  %v11577_v17 = vld [vmem:[#allocation8 + $0x1420] ss:$28 sps:$4 sm:$0xff]  }
 0x2a8   :  { %6685 = vmatpush1.bf16.msra.mxu0 %v11517_v34  ;;  %v13222_v34 = vpop.f32.mrb[20].mxu1 }
 0x2a9   :  { %7013 = vmatpush1.bf16.msra.mxu1 %v11520_v35  ;;  %6686 = vmatprep.subr.bf16.mxu0 %v11525_v37  ;;  %v11582_v35 = vld [vmem:[#allocation8 + $0x142c] ss:$28 sps:$4 sm:$0xff]   ;;  %v13224_v37 = vpop.f32.mrb[21].mxu1 }
 0x2aa   :  { %7014 = vmatprep.subr.bf16.mxu1 %v11528_v40 }
 0x2ac   :  { %6687 = vmatpush1.bf16.msra.mxu0 %v11523_v39  ;;  %v771_v39 = vpop.f32.mrb[22].mxu1 }
 0x2ad   :  { %7015 = vmatpush1.bf16.msra.mxu1 %v11526_v41  ;;  %6688 = vmatprep.subr.bf16.mxu0 %v11531_v43  ;;  %v772_v40 = vpop.f32.mrb[23].mxu1  ;;  %v11580_v41 = vld [vmem:[#allocation8 + $0x1428] ss:$28 sps:$4 sm:$0xff]   ;;  %v11585_v43 = vld [vmem:[#allocation8 + $0x145c] ss:$28 sps:$4 sm:$0xff]  }
 0x2ae   :  { %7016 = vmatprep.subr.bf16.mxu1 %v11534_v46  ;;  %v11588_v46 = vld [vmem:[#allocation8 + $0x1464] ss:$28 sps:$4 sm:$0xff]   ;;  %v11630_v40 = vld [vmem:[#allocation8 + $0x15ec] ss:$28 sps:$4 sm:$0xff]  }
 0x2af   :  { %v11627_v39 = vld [vmem:[#allocation8 + $0x15e4] ss:$28 sps:$4 sm:$0xff]  }
 0x2b0   :  { %6689 = vmatpush1.bf16.msra.mxu0 %v11529_v47  ;;  %v11583_v47 = vld [vmem:[#allocation8 + $0x1458] ss:$28 sps:$4 sm:$0xff]  }
 0x2b1   :  { %7017 = vmatpush1.bf16.msra.mxu1 %v11532_v49  ;;  %6690 = vmatprep.subr.bf16.mxu0 %v11537_v50  ;;  %v13226_v49 = vld [vmem:[#allocation7 + $0x8] sm:$0xff] }
 0x2b2   :  { %7018 = vmatprep.subr.bf16.mxu1 %v11540_v55  ;;  %v245_v50 = vrot.slane %v13226_v49, %v13141_v38  ;;  %v11591_v55 = vld [vmem:[#allocation8 + $0x1494] ss:$28 sps:$4 sm:$0xff]  }
 0x2b4   :  { %6691 = vmatpush1.bf16.msra.mxu0 %v11535_v51  ;;  %v11586_v51 = vld [vmem:[#allocation8 + $0x1460] ss:$28 sps:$4 sm:$0xff]  }
 0x2b5   :  { %7019 = vmatpush1.bf16.msra.mxu1 %v11538_v56  ;;  %6692 = vmatprep.subr.bf16.mxu0 %v11543_v59  ;;  %v11589_v56 = vld [vmem:[#allocation8 + $0x1490] ss:$28 sps:$4 sm:$0xff]   ;;  %v11594_v59 = vld [vmem:[#allocation8 + $0x149c] ss:$28 sps:$4 sm:$0xff]  }
 0x2b6   :  { %7020 = vmatprep.subr.bf16.mxu1 %v11546_v60  ;;  %v686_v60 = vadd.f32 %v13195_v16, %v245_v50  ;;  %v11631_v50 = vld [vmem:[#allocation8 + $0x1618] ss:$28 sps:$4 sm:$0xff]  }
 0x2b8   :  { %6693 = vmatpush1.bf16.msra.mxu0 %v11541_v58  ;;  %v257_v58 = vrot.slane %v13226_v49, %v13144_v44 }
 0x2b9   :  { %7021 = vmatpush1.bf16.msra.mxu1 %v11544_v62  ;;  %6694 = vmatprep.subr.bf16.mxu0 %v11549_v3  ;;  %v11592_v62 = vld [vmem:[#allocation8 + $0x1498] ss:$28 sps:$4 sm:$0xff]   ;;  %v11597_v3 = vld [vmem:[#allocation8 + $0x14cc] ss:$28 sps:$4 sm:$0xff]  }
 0x2ba   :  { %7022 = vmatprep.subr.bf16.mxu1 %v11552_v10  ;;  %v11600_v10 = vld [vmem:[#allocation8 + $0x14d4] ss:$28 sps:$4 sm:$0xff]  }
 0x2bc   :  { %6695 = vmatpush1.bf16.msra.mxu0 %v11547_v4  ;;  %v11595_v4 = vld [vmem:[#allocation8 + $0x14c8] ss:$28 sps:$4 sm:$0xff]  }
 0x2bd   :  { %7023 = vmatpush1.bf16.msra.mxu1 %v11550_v5  ;;  %6696 = vmatprep.subr.bf16.mxu0 %v11555_v31  ;;  %v729_v5 = vadd.f32 %v13138_v1, %v257_v58  ;;  %v784_v31 = vmax.f32 %v686_v60, 0.0  ;;  %v11607_v1 = vld [vmem:[#allocation8 + $0x1538] ss:$28 sps:$4 sm:$0xff]   ;;  %v11645_v60 = vld [vmem:[#allocation8 + $0x168c] ss:$28 sps:$4 sm:$0xff]  }
 0x2be   :  { %7024 = vmatprep.subr.bf16.mxu1 %v11558_v7  ;;  %v11603_v7 = vld [vmem:[#allocation8 + $0x1504] ss:$28 sps:$4 sm:$0xff]   ;;  %v11640_v58 = vld [vmem:[#allocation8 + $0x1658] ss:$28 sps:$4 sm:$0xff]  }
 0x2bf   :  { %v787_v16 = vmax.f32 %v729_v5, 0.0  ;;  %v11654_v5 = vld [vmem:[#allocation8 + $0x16cc] ss:$28 sps:$4 sm:$0xff]  }
 0x2c0   :  { %6697 = vmatpush1.bf16.msra.mxu0 %v11553_v6  ;;  %v11598_v6 = vld [vmem:[#allocation8 + $0x14d0] ss:$28 sps:$4 sm:$0xff]  }
 0x2c1   :  { %7025 = vmatpush1.bf16.msra.mxu1 %v11556_v12  ;;  %6698 = vmatprep.subr.bf16.mxu0 %v11561_v13  ;;  %v11606_v12 = vld [vmem:[#allocation8 + $0x150c] ss:$28 sps:$4 sm:$0xff]   ;;  %v11601_v13 = vld [vmem:[#allocation8 + $0x1500] ss:$28 sps:$4 sm:$0xff]  }
 0x2c2   :  { %7026 = vmatprep.subr.bf16.mxu1 %v11564_v15  ;;  %v11604_v15 = vld [vmem:[#allocation8 + $0x1508] ss:$28 sps:$4 sm:$0xff]  }
 0x2c4   :  { %6699 = vmatpush1.bf16.msra.mxu0 %v11559_v48  ;;  %v13234_v48 = vpack.c.bf16 %v784_v31, %v784_v31  ;;  %v11649_v31 = vld [vmem:[#allocation8 + $0x16c0] ss:$28 sps:$4 sm:$0xff]  }
 0x2c5   :  { %7027 = vmatpush1.bf16.msra.mxu1 %v11562_v25  ;;  %6700 = vmatprep.subr.bf16.mxu0 %v11567_v21  ;;  %v11609_v25 = vld [vmem:[#allocation8 + $0x153c] ss:$28 sps:$4 sm:$0xff]   ;;  %v13236_v21 = vpack.c.bf16 %v787_v16, %v787_v16 }
 0x2c6   :  { %7028 = vmatprep.subr.bf16.mxu1 %v11570_v45  ;;  %v11610_v45 = vld [vmem:[#allocation8 + $0x1540] ss:$28 sps:$4 sm:$0xff]  }
 0x2c7   :  { %v11658_v16 = vld [vmem:[#allocation8 + $0x1700] ss:$28 sps:$4 sm:$0xff]  }
 0x2c8   :  { %6701 = vmatpush1.bf16.msra.mxu0 %v11565_v2  ;;  %v11612_v2 = vld [vmem:[#allocation8 + $0x1544] ss:$28 sps:$4 sm:$0xff]  }
 0x2c9   :  { %7029 = vmatpush1.bf16.msra.mxu1 %v11568_v23  ;;  %6702 = vmatprep.subr.bf16.mxu0 %v11573_v24  ;;  %v11615_v23 = vld [vmem:[#allocation8 + $0x1574] ss:$28 sps:$4 sm:$0xff]   ;;  %v11618_v24 = vld [vmem:[#allocation8 + $0x157c] ss:$28 sps:$4 sm:$0xff]  }
 0x2ca   :  { %7030 = vmatprep.subr.bf16.mxu1 %v11576_v32  ;;  %v11616_v32 = vld [vmem:[#allocation8 + $0x1578] ss:$28 sps:$4 sm:$0xff]  }
 0x2cc   :  { %6703 = vmatpush1.bf16.msra.mxu0 %v11571_v27  ;;  %v11613_v27 = vld [vmem:[#allocation8 + $0x1570] ss:$28 sps:$4 sm:$0xff]  }
 0x2cd   :  { %7031 = vmatpush1.bf16.msra.mxu1 %v11574_v33  ;;  %6704 = vmatprep.subr.bf16.mxu0 %v11579_v54  ;;  %v11621_v33 = vld [vmem:[#allocation8 + $0x15ac] ss:$28 sps:$4 sm:$0xff]   ;;  %v11624_v54 = vld [vmem:[#allocation8 + $0x15b4] ss:$28 sps:$4 sm:$0xff]  }
 0x2ce   :  { %7032 = vmatprep.subr.bf16.mxu1 %v11582_v35  ;;  %v11622_v35 = vld [vmem:[#allocation8 + $0x15b0] ss:$28 sps:$4 sm:$0xff]  }
 0x2d0   :  { %6705 = vmatpush1.bf16.msra.mxu0 %v11577_v17  ;;  %v11619_v17 = vld [vmem:[#allocation8 + $0x15a8] ss:$28 sps:$4 sm:$0xff]  }
 0x2d1   :  { %7033 = vmatpush1.bf16.msra.mxu1 %v11580_v41  ;;  %6706 = vmatprep.subr.bf16.mxu0 %v11585_v43  ;;  %v11625_v41 = vld [vmem:[#allocation8 + $0x15e0] ss:$28 sps:$4 sm:$0xff]   ;;  %v11628_v43 = vld [vmem:[#allocation8 + $0x15e8] ss:$28 sps:$4 sm:$0xff]  }
 0x2d2   :  { %7034 = vmatprep.subr.bf16.mxu1 %v11588_v46  ;;  %v11636_v46 = vld [vmem:[#allocation8 + $0x1624] ss:$28 sps:$4 sm:$0xff]  }
 0x2d4   :  { %6707 = vmatpush1.bf16.msra.mxu0 %v11583_v47  ;;  %v11633_v47 = vld [vmem:[#allocation8 + $0x161c] ss:$28 sps:$4 sm:$0xff]  }
 0x2d5   :  { %7035 = vmatpush1.bf16.msra.mxu1 %v11586_v51  ;;  %6708 = vmatprep.subr.bf16.mxu0 %v11591_v55  ;;  %v11634_v51 = vld [vmem:[#allocation8 + $0x1620] ss:$28 sps:$4 sm:$0xff]   ;;  %v11639_v55 = vld [vmem:[#allocation8 + $0x1654] ss:$28 sps:$4 sm:$0xff]  }
 0x2d6   :  { %7036 = vmatprep.subr.bf16.mxu1 %v11594_v59  ;;  %v11637_v59 = vld [vmem:[#allocation8 + $0x1650] ss:$28 sps:$4 sm:$0xff]  }
 0x2d8   :  { %6709 = vmatpush1.bf16.msra.mxu0 %v11589_v56  ;;  %v11642_v56 = vld [vmem:[#allocation8 + $0x165c] ss:$28 sps:$4 sm:$0xff]  }
 0x2d9   :  { %7037 = vmatpush1.bf16.msra.mxu1 %v11592_v62  ;;  %6710 = vmatprep.subr.bf16.mxu0 %v11597_v3  ;;  %v11648_v62 = vld [vmem:[#allocation8 + $0x1694] ss:$28 sps:$4 sm:$0xff]   ;;  %v11643_v3 = vld [vmem:[#allocation8 + $0x1688] ss:$28 sps:$4 sm:$0xff]  }
 0x2da   :  { %7038 = vmatprep.subr.bf16.mxu1 %v11600_v10  ;;  %v11651_v10 = vld [vmem:[#allocation8 + $0x16c4] ss:$28 sps:$4 sm:$0xff]  }
 0x2dc   :  { %6711 = vmatpush1.bf16.msra.mxu0 %v11595_v4  ;;  %v11646_v4 = vld [vmem:[#allocation8 + $0x1690] ss:$28 sps:$4 sm:$0xff]  }
 0x2dd   :  { %7039 = vmatpush1.bf16.msra.mxu1 %v11598_v6  ;;  %6721 = vmatprep.subr.bf16.mxu0 %v11603_v7  ;;  %v11652_v6 = vld [vmem:[#allocation8 + $0x16c8] ss:$28 sps:$4 sm:$0xff]   ;;  %v11657_v7 = vld [vmem:[#allocation8 + $0x16fc] ss:$28 sps:$4 sm:$0xff]  }
 0x2de   :  { %7049 = vmatprep.subr.bf16.mxu1 %v11606_v12  ;;  %v11660_v12 = vld [vmem:[#allocation8 + $0x1704] ss:$28 sps:$4 sm:$0xff]  }
 0x2df   :  { %6713 = vmatmul.mubr.bf16.vlgmr.msra.gmra.mrb[8].mxu0 %v13234_v48 }
 0x2e0   :  { %7041 = vmatmul.mubr.bf16.vlgmr.msra.gmra.mrb[24].mxu1 %v13234_v48  ;;  %6722 = vmatpush1.bf16.msra.mxu0 %v11601_v13  ;;  %v11655_v13 = vld [vmem:[#allocation8 + $0x16f8] ss:$28 sps:$4 sm:$0xff]  }
 0x2e1   :  { %6753 = vmatprep.mubr.bf16.mxu0 %v13236_v21  ;;  %7050 = vmatpush1.bf16.msra.mxu1 %v11604_v15  ;;  %v11663_v15 = vld [vmem:[#allocation8 + $0x1734] ss:$28 sps:$4 sm:$0xff]  }
 0x2e2   :  { %7081 = vmatprep.mubr.bf16.mxu1 %v13236_v21  ;;  %6723 = vmatprep.subr.bf16.mxu0 %v11609_v25  ;;  %v11666_v25 = vld [vmem:[#allocation8 + $0x173c] ss:$28 sps:$4 sm:$0xff]  }
 0x2e3   :  { %7051 = vmatprep.subr.bf16.mxu1 %v11612_v2  ;;  %v11664_v2 = vld [vmem:[#allocation8 + $0x1738] ss:$28 sps:$4 sm:$0xff]  }
 0x2e4   :  { %6724 = vmatpush1.bf16.msra.mxu0 %v11607_v1  ;;  %v11661_v1 = vld [vmem:[#allocation8 + $0x1730] ss:$28 sps:$4 sm:$0xff]  }
 0x2e5   :  { %7052 = vmatpush1.bf16.msra.mxu1 %v11610_v45  ;;  %6725 = vmatprep.subr.bf16.mxu0 %v11615_v23  ;;  %v11669_v45 = vld [vmem:[#allocation8 + $0x176c] ss:$28 sps:$4 sm:$0xff]   ;;  %v11672_v23 = vld [vmem:[#allocation8 + $0x1774] ss:$28 sps:$4 sm:$0xff]  }
 0x2e6   :  { %7053 = vmatprep.subr.bf16.mxu1 %v11618_v24  ;;  %v11667_v24 = vld [vmem:[#allocation8 + $0x1768] ss:$28 sps:$4 sm:$0xff]  }
 0x2e8   :  { %6726 = vmatpush1.bf16.msra.mxu0 %v11613_v27  ;;  %v11670_v27 = vld [vmem:[#allocation8 + $0x1770] ss:$28 sps:$4 sm:$0xff]  }
 0x2e9   :  { %7054 = vmatpush1.bf16.msra.mxu1 %v11616_v32  ;;  %6727 = vmatprep.subr.bf16.mxu0 %v11621_v33  ;;  %v11675_v32 = vld [vmem:[#allocation8 + $0x17a4] ss:$28 sps:$4 sm:$0xff]   ;;  %v11678_v33 = vld [vmem:[#allocation8 + $0x17ac] ss:$28 sps:$4 sm:$0xff]  }
 0x2ea   :  { %7055 = vmatprep.subr.bf16.mxu1 %v11624_v54  ;;  %v11673_v54 = vld [vmem:[#allocation8 + $0x17a0] ss:$28 sps:$4 sm:$0xff]  }
 0x2ec   :  { %6728 = vmatpush1.bf16.msra.mxu0 %v11619_v17  ;;  %v11676_v17 = vld [vmem:[#allocation8 + $0x17a8] ss:$28 sps:$4 sm:$0xff]  }
 0x2ed   :  { %7056 = vmatpush1.bf16.msra.mxu1 %v11622_v35  ;;  %6729 = vmatprep.subr.bf16.mxu0 %v11627_v39  ;;  %v11681_v35 = vld [vmem:[#allocation8 + $0x17dc] ss:$28 sps:$4 sm:$0xff]   ;;  %v11684_v39 = vld [vmem:[#allocation8 + $0x17e4] ss:$28 sps:$4 sm:$0xff]  }
 0x2ee   :  { %7057 = vmatprep.subr.bf16.mxu1 %v11630_v40  ;;  %v11679_v40 = vld [vmem:[#allocation8 + $0x17d8] ss:$28 sps:$4 sm:$0xff]  }
 0x2f0   :  { %6730 = vmatpush1.bf16.msra.mxu0 %v11625_v41  ;;  %v253_v41 = vrot.slane %v13226_v49, %v13165_v18 }
 0x2f1   :  { %7058 = vmatpush1.bf16.msra.mxu1 %v11628_v43  ;;  %6731 = vmatprep.subr.bf16.mxu0 %v11633_v47  ;;  %v11682_v43 = vld [vmem:[#allocation8 + $0x17e0] ss:$28 sps:$4 sm:$0xff]   ;;  %v11687_v47 = vld [vmem:[#allocation8 + $0x1814] ss:$28 sps:$4 sm:$0xff]  }
 0x2f2   :  { %7059 = vmatprep.subr.bf16.mxu1 %v11636_v46  ;;  %v11690_v46 = vld [vmem:[#allocation8 + $0x181c] ss:$28 sps:$4 sm:$0xff]  }
 0x2f4   :  { %6732 = vmatpush1.bf16.msra.mxu0 %v11631_v50  ;;  %v265_v50 = vrot.slane %v13226_v49, %v232_v29  ;;  %v11702_v29 = vld [vmem:[#allocation8 + $0x188c] ss:$28 sps:$4 sm:$0xff]  }
 0x2f5   :  { %7060 = vmatpush1.bf16.msra.mxu1 %v11634_v51  ;;  %6733 = vmatprep.subr.bf16.mxu0 %v11639_v55  ;;  %v11685_v51 = vld [vmem:[#allocation8 + $0x1810] ss:$28 sps:$4 sm:$0xff]   ;;  %v727_v55 = vadd.f32 %v13136_v61, %v253_v41  ;;  %v11700_v61 = vld [vmem:[#allocation8 + $0x1888] ss:$28 sps:$4 sm:$0xff]  }
 0x2f6   :  { %7061 = vmatprep.subr.bf16.mxu1 %v11642_v56  ;;  %v11688_v56 = vld [vmem:[#allocation8 + $0x1818] ss:$28 sps:$4 sm:$0xff]  }
 0x2f7   :  { %v11735_v41 = vld [vmem:[#allocation8 + $0x19d4] ss:$28 sps:$4 sm:$0xff]  }
 0x2f8   :  { %6734 = vmatpush1.bf16.msra.mxu0 %v11637_v59  ;;  %v11693_v59 = vld [vmem:[#allocation8 + $0x184c] ss:$28 sps:$4 sm:$0xff]  }
 0x2f9   :  { %7062 = vmatpush1.bf16.msra.mxu1 %v11640_v58  ;;  %6735 = vmatprep.subr.bf16.mxu0 %v11645_v60  ;;  %v11696_v58 = vld [vmem:[#allocation8 + $0x1854] ss:$28 sps:$4 sm:$0xff]   ;;  %v770_v60 = vadd.f32 %v13224_v37, %v265_v50  ;;  %v11741_v50 = vld [vmem:[#allocation8 + $0x1a0c] ss:$28 sps:$4 sm:$0xff]  }
 0x2fa   :  { %7063 = vmatprep.subr.bf16.mxu1 %v11648_v62  ;;  %v11691_v62 = vld [vmem:[#allocation8 + $0x1848] ss:$28 sps:$4 sm:$0xff]  }
 0x2fc   :  { %6736 = vmatpush1.bf16.msra.mxu0 %v11643_v3  ;;  %v11694_v3 = vld [vmem:[#allocation8 + $0x1850] ss:$28 sps:$4 sm:$0xff]  }
 0x2fd   :  { %7064 = vmatpush1.bf16.msra.mxu1 %v11646_v4  ;;  %6737 = vmatprep.subr.bf16.mxu0 %v11651_v10  ;;  %v786_v4 = vmax.f32 %v727_v55, 0.0  ;;  %v789_v10 = vmax.f32 %v770_v60, 0.0  ;;  %v11739_v55 = vld [vmem:[#allocation8 + $0x1a08] ss:$28 sps:$4 sm:$0xff]   ;;  %v11745_v60 = vld [vmem:[#allocation8 + $0x1a40] ss:$28 sps:$4 sm:$0xff]  }
 0x2fe   :  { %7065 = vmatprep.subr.bf16.mxu1 %v11654_v5  ;;  %v11697_v5 = vld [vmem:[#allocation8 + $0x1880] ss:$28 sps:$4 sm:$0xff]  }
 0x2ff   :  { %v13251_v37 = vpack.c.bf16 %v789_v10, %v789_v10  ;;  %v11759_v10 = vld [vmem:[#allocation8 + $0x1ab4] ss:$28 sps:$4 sm:$0xff]  }
 0x300   :  { %6738 = vmatpush1.bf16.msra.mxu0 %v11649_v31  ;;  %v11705_v31 = vld [vmem:[#allocation8 + $0x18bc] ss:$28 sps:$4 sm:$0xff]  }
 0x301   :  { %7066 = vmatpush1.bf16.msra.mxu1 %v11652_v6  ;;  %6739 = vmatprep.subr.bf16.mxu0 %v11657_v7  ;;  %v11708_v6 = vld [vmem:[#allocation8 + $0x18c4] ss:$28 sps:$4 sm:$0xff]   ;;  %v13249_v7 = vpack.c.bf16 %v786_v4, %v786_v4 }
 0x302   :  { %7067 = vmatprep.subr.bf16.mxu1 %v11660_v12  ;;  %v11703_v12 = vld [vmem:[#allocation8 + $0x18b8] ss:$28 sps:$4 sm:$0xff]   ;;  %v11756_v4 = vld [vmem:[#allocation8 + $0x1a84] ss:$28 sps:$4 sm:$0xff]  }
 0x304   :  { %6740 = vmatpush1.bf16.msra.mxu0 %v11655_v13  ;;  %v11706_v13 = vld [vmem:[#allocation8 + $0x18c0] ss:$28 sps:$4 sm:$0xff]  }
 0x305   :  { %7068 = vmatpush1.bf16.msra.mxu1 %v11658_v16  ;;  %6741 = vmatprep.subr.bf16.mxu0 %v11663_v15  ;;  %v11711_v16 = vld [vmem:[#allocation8 + $0x18f4] ss:$28 sps:$4 sm:$0xff]   ;;  %v11714_v15 = vld [vmem:[#allocation8 + $0x18fc] ss:$28 sps:$4 sm:$0xff]  }
 0x306   :  { %7069 = vmatprep.subr.bf16.mxu1 %v11666_v25  ;;  %v11709_v25 = vld [vmem:[#allocation8 + $0x18f0] ss:$28 sps:$4 sm:$0xff]  }
 0x308   :  { %6742 = vmatpush1.bf16.msra.mxu0 %v11661_v1  ;;  %v11712_v1 = vld [vmem:[#allocation8 + $0x18f8] ss:$28 sps:$4 sm:$0xff]  }
 0x309   :  { %7070 = vmatpush1.bf16.msra.mxu1 %v11664_v2  ;;  %6743 = vmatprep.subr.bf16.mxu0 %v11669_v45  ;;  %v11717_v2 = vld [vmem:[#allocation8 + $0x192c] ss:$28 sps:$4 sm:$0xff]   ;;  %v11720_v45 = vld [vmem:[#allocation8 + $0x1934] ss:$28 sps:$4 sm:$0xff]  }
 0x30a   :  { %7071 = vmatprep.subr.bf16.mxu1 %v11672_v23  ;;  %v11715_v23 = vld [vmem:[#allocation8 + $0x1928] ss:$28 sps:$4 sm:$0xff]  }
 0x30c   :  { %6744 = vmatpush1.bf16.msra.mxu0 %v11667_v24  ;;  %v11718_v24 = vld [vmem:[#allocation8 + $0x1930] ss:$28 sps:$4 sm:$0xff]  }
 0x30d   :  { %7072 = vmatpush1.bf16.msra.mxu1 %v11670_v27  ;;  %6745 = vmatprep.subr.bf16.mxu0 %v11675_v32  ;;  %v11723_v27 = vld [vmem:[#allocation8 + $0x1964] ss:$28 sps:$4 sm:$0xff]   ;;  %v11726_v32 = vld [vmem:[#allocation8 + $0x196c] ss:$28 sps:$4 sm:$0xff]  }
 0x30e   :  { %7073 = vmatprep.subr.bf16.mxu1 %v11678_v33  ;;  %v11721_v33 = vld [vmem:[#allocation8 + $0x1960] ss:$28 sps:$4 sm:$0xff]  }
 0x310   :  { %6746 = vmatpush1.bf16.msra.mxu0 %v11673_v54  ;;  %v11724_v54 = vld [vmem:[#allocation8 + $0x1968] ss:$28 sps:$4 sm:$0xff]  }
 0x311   :  { %7074 = vmatpush1.bf16.msra.mxu1 %v11676_v17  ;;  %6747 = vmatprep.subr.bf16.mxu0 %v11681_v35  ;;  %v11729_v17 = vld [vmem:[#allocation8 + $0x199c] ss:$28 sps:$4 sm:$0xff]   ;;  %v11732_v35 = vld [vmem:[#allocation8 + $0x19a4] ss:$28 sps:$4 sm:$0xff]  }
 0x312   :  { %7075 = vmatprep.subr.bf16.mxu1 %v11684_v39  ;;  %v11727_v39 = vld [vmem:[#allocation8 + $0x1998] ss:$28 sps:$4 sm:$0xff]  }
 0x314   :  { %6748 = vmatpush1.bf16.msra.mxu0 %v11679_v40  ;;  %v11730_v40 = vld [vmem:[#allocation8 + $0x19a0] ss:$28 sps:$4 sm:$0xff]  }
 0x315   :  { %7076 = vmatpush1.bf16.msra.mxu1 %v11682_v43  ;;  %6749 = vmatprep.subr.bf16.mxu0 %v11687_v47  ;;  %v11738_v43 = vld [vmem:[#allocation8 + $0x19dc] ss:$28 sps:$4 sm:$0xff]   ;;  %v11733_v47 = vld [vmem:[#allocation8 + $0x19d0] ss:$28 sps:$4 sm:$0xff]  }
 0x316   :  { %7077 = vmatprep.subr.bf16.mxu1 %v11690_v46  ;;  %v11736_v46 = vld [vmem:[#allocation8 + $0x19d8] ss:$28 sps:$4 sm:$0xff]  }
 0x318   :  { %6750 = vmatpush1.bf16.msra.mxu0 %v11685_v51  ;;  %v11744_v51 = vld [vmem:[#allocation8 + $0x1a14] ss:$28 sps:$4 sm:$0xff]  }
 0x319   :  { %7078 = vmatpush1.bf16.msra.mxu1 %v11688_v56  ;;  %6751 = vmatprep.subr.bf16.mxu0 %v11693_v59  ;;  %v11742_v56 = vld [vmem:[#allocation8 + $0x1a10] ss:$28 sps:$4 sm:$0xff]   ;;  %v11747_v59 = vld [vmem:[#allocation8 + $0x1a44] ss:$28 sps:$4 sm:$0xff]  }
 0x31a   :  { %7079 = vmatprep.subr.bf16.mxu1 %v11696_v58  ;;  %v11750_v58 = vld [vmem:[#allocation8 + $0x1a4c] ss:$28 sps:$4 sm:$0xff]  }
 0x31c   :  { %6752 = vmatpush1.bf16.msra.mxu0 %v11691_v62  ;;  %v11748_v62 = vld [vmem:[#allocation8 + $0x1a48] ss:$28 sps:$4 sm:$0xff]  }
 0x31d   :  { %7080 = vmatpush1.bf16.msra.mxu1 %v11694_v3  ;;  %6762 = vmatprep.subr.bf16.mxu0 %v11699_v8  ;;  %v11753_v3 = vld [vmem:[#allocation8 + $0x1a7c] ss:$28 sps:$4 sm:$0xff]  }
 0x31e   :  { %7090 = vmatprep.subr.bf16.mxu1 %v11702_v29  ;;  %v11751_v8 = vld [vmem:[#allocation8 + $0x1a78] ss:$28 sps:$4 sm:$0xff]   ;;  %v11754_v29 = vld [vmem:[#allocation8 + $0x1a80] ss:$28 sps:$4 sm:$0xff]  }
 0x31f   :  { %6754 = vmatmul.mubr.bf16.vlgmr.msra.gmra.mrb[8].mxu0 %v13249_v7 }
 0x320   :  { %7082 = vmatmul.mubr.bf16.vlgmr.msra.gmra.mrb[24].mxu1 %v13249_v7  ;;  %6763 = vmatpush1.bf16.msra.mxu0 %v11697_v5  ;;  %v11762_v5 = vld [vmem:[#allocation8 + $0x1abc] ss:$28 sps:$4 sm:$0xff]  }
 0x321   :  { %7091 = vmatpush1.bf16.msra.mxu1 %v11700_v61  ;;  %6764 = vmatprep.subr.bf16.mxu0 %v11705_v31  ;;  %v11757_v61 = vld [vmem:[#allocation8 + $0x1ab0] ss:$28 sps:$4 sm:$0xff]   ;;  %v11760_v31 = vld [vmem:[#allocation8 + $0x1ab8] ss:$28 sps:$4 sm:$0xff]  }
 0x322   :  { %7092 = vmatprep.subr.bf16.mxu1 %v11708_v6  ;;  %6794 = vmatprep.mubr.bf16.mxu0 %v13251_v37  ;;  %v11765_v6 = vld [vmem:[#allocation8 + $0x1aec] ss:$28 sps:$4 sm:$0xff]  }
 0x323   :  { %7122 = vmatprep.mubr.bf16.mxu1 %v13251_v37 }
 0x324   :  { %6765 = vmatpush1.bf16.msra.mxu0 %v11703_v12  ;;  %v11768_v12 = vld [vmem:[#allocation8 + $0x1af4] ss:$28 sps:$4 sm:$0xff]  }
 0x325   :  { %7093 = vmatpush1.bf16.msra.mxu1 %v11706_v13  ;;  %6766 = vmatprep.subr.bf16.mxu0 %v11711_v16  ;;  %v11763_v13 = vld [vmem:[#allocation8 + $0x1ae8] ss:$28 sps:$4 sm:$0xff]   ;;  %v11766_v16 = vld [vmem:[#allocation8 + $0x1af0] ss:$28 sps:$4 sm:$0xff]  }
 0x326   :  { %7094 = vmatprep.subr.bf16.mxu1 %v11714_v15  ;;  %v11771_v15 = vld [vmem:[#allocation8 + $0x1b24] ss:$28 sps:$4 sm:$0xff]  }
 0x328   :  { %6767 = vmatpush1.bf16.msra.mxu0 %v11709_v25  ;;  %v11774_v25 = vld [vmem:[#allocation8 + $0x1b2c] ss:$28 sps:$4 sm:$0xff]  }
 0x329   :  { %7095 = vmatpush1.bf16.msra.mxu1 %v11712_v1  ;;  %6768 = vmatprep.subr.bf16.mxu0 %v11717_v2  ;;  %v11769_v1 = vld [vmem:[#allocation8 + $0x1b20] ss:$28 sps:$4 sm:$0xff]   ;;  %v11772_v2 = vld [vmem:[#allocation8 + $0x1b28] ss:$28 sps:$4 sm:$0xff]  }
 0x32a   :  { %7096 = vmatprep.subr.bf16.mxu1 %v11720_v45  ;;  %v11777_v45 = vld [vmem:[#allocation8 + $0x1b5c] ss:$28 sps:$4 sm:$0xff]  }
 0x32c   :  { %6769 = vmatpush1.bf16.msra.mxu0 %v11715_v23  ;;  %v11780_v23 = vld [vmem:[#allocation8 + $0x1b64] ss:$28 sps:$4 sm:$0xff]  }
 0x32d   :  { %7097 = vmatpush1.bf16.msra.mxu1 %v11718_v24  ;;  %6770 = vmatprep.subr.bf16.mxu0 %v11723_v27  ;;  %v11775_v24 = vld [vmem:[#allocation8 + $0x1b58] ss:$28 sps:$4 sm:$0xff]   ;;  %v261_v27 = vrot.slane %v13226_v49, %v13186_v63  ;;  %v11790_v49 = vld [vmem:[#allocation8 + $0x1bd0] ss:$28 sps:$4 sm:$0xff]  }
 0x32e   :  { %7098 = vmatprep.subr.bf16.mxu1 %v11726_v32  ;;  %v11778_v32 = vld [vmem:[#allocation8 + $0x1b60] ss:$28 sps:$4 sm:$0xff]  }
 0x330   :  { %6771 = vmatpush1.bf16.msra.mxu0 %v11721_v33  ;;  %v11783_v33 = vld [vmem:[#allocation8 + $0x1b94] ss:$28 sps:$4 sm:$0xff]  }
 0x331   :  { %7099 = vmatpush1.bf16.msra.mxu1 %v11724_v54  ;;  %6772 = vmatprep.subr.bf16.mxu0 %v11729_v17  ;;  %v11786_v54 = vld [vmem:[#allocation8 + $0x1b9c] ss:$28 sps:$4 sm:$0xff]   ;;  %v11781_v17 = vld [vmem:[#allocation8 + $0x1b90] ss:$28 sps:$4 sm:$0xff]  }
 0x332   :  { %7100 = vmatprep.subr.bf16.mxu1 %v11732_v35  ;;  %v768_v35 = vadd.f32 %v13222_v34, %v261_v27  ;;  %v11797_v34 = vld [vmem:[#allocation8 + $0x18] ss:$28 sps:$4 sm:$0xff]   ;;  %v11831_v27 = vld [vmem:[#allocation8 + $0x360] ss:$28 sps:$4 sm:$0xff]  }
 0x334   :  { %6773 = vmatpush1.bf16.msra.mxu0 %v11727_v39  ;;  %v11784_v39 = vld [vmem:[#allocation8 + $0x1b98] ss:$28 sps:$4 sm:$0xff]  }
 0x335   :  { %7101 = vmatpush1.bf16.msra.mxu1 %v11730_v40  ;;  %6774 = vmatprep.subr.bf16.mxu0 %v11735_v41  ;;  %v11789_v40 = vld [vmem:[#allocation8 + $0x1bcc] ss:$28 sps:$4 sm:$0xff]   ;;  %v11792_v41 = vld [vmem:[#allocation8 + $0x1bd4] ss:$28 sps:$4 sm:$0xff]  }
 0x336   :  { %7102 = vmatprep.subr.bf16.mxu1 %v11738_v43  ;;  %v11787_v43 = vld [vmem:[#allocation8 + $0x1bc8] ss:$28 sps:$4 sm:$0xff]  }
 0x338   :  { %6775 = vmatpush1.bf16.msra.mxu0 %v11733_v47  ;;  %v788_v47 = vmax.f32 %v768_v35, 0.0  ;;  %v11833_v35 = vld [vmem:[#allocation8 + $0x1d0] ss:$28 sps:$4 sm:$0xff]  }
 0x339   :  { %7103 = vmatpush1.bf16.msra.mxu1 %v11736_v46  ;;  %6776 = vmatprep.subr.bf16.mxu0 %v11741_v50  ;;  %v11795_v46 = vld [vmem:[#allocation8 + $0x14] ss:$28 sps:$4 sm:$0xff]  }
 0x33a   :  { %7104 = vmatprep.subr.bf16.mxu1 %v11744_v51  ;;  %v11796_v50 = vld [vmem:[#allocation8 + $0x1d8] ss:$28 sps:$4 sm:$0xff]   ;;  %v11793_v51 = vld [vmem:[#allocation8 + $0x10] ss:$28 sps:$4 sm:$0xff]  }
 0x33c   :  { %6777 = vmatpush1.bf16.msra.mxu0 %v11739_v55  ;;  %v13260_v55 = vpack.c.bf16 %v788_v47, %v788_v47  ;;  %v11842_v47 = vld [vmem:[#allocation8 + $0x3d0] ss:$28 sps:$4 sm:$0xff]  }
 0x33d   :  { %7105 = vmatpush1.bf16.msra.mxu1 %v11742_v56  ;;  %6778 = vmatprep.subr.bf16.mxu0 %v11747_v59  ;;  %v11800_v56 = vld [vmem:[#allocation8 + $0x4c] ss:$28 sps:$4 sm:$0xff]  }
 0x33e   :  { %7106 = vmatprep.subr.bf16.mxu1 %v11750_v58  ;;  %v11801_v59 = vld [vmem:[#allocation8 + $0x210] ss:$28 sps:$4 sm:$0xff]   ;;  %v11798_v58 = vld [vmem:[#allocation8 + $0x48] ss:$28 sps:$4 sm:$0xff]  }
 0x340   :  { %6779 = vmatpush1.bf16.msra.mxu0 %v11745_v60  ;;  %v11802_v60 = vld [vmem:[#allocation8 + $0x50] ss:$28 sps:$4 sm:$0xff]  }
 0x341   :  { %7107 = vmatpush1.bf16.msra.mxu1 %v11748_v62  ;;  %6780 = vmatprep.subr.bf16.mxu0 %v11753_v3  ;;  %v11805_v62 = vld [vmem:[#allocation8 + $0x84] ss:$28 sps:$4 sm:$0xff]  }
 0x342   :  { %7108 = vmatprep.subr.bf16.mxu1 %v11756_v4  ;;  %v11806_v3 = vld [vmem:[#allocation8 + $0x248] ss:$28 sps:$4 sm:$0xff]   ;;  %v11803_v4 = vld [vmem:[#allocation8 + $0x80] ss:$28 sps:$4 sm:$0xff]  }
 0x344   :  { %6781 = vmatpush1.bf16.msra.mxu0 %v11751_v8  ;;  %v11807_v8 = vld [vmem:[#allocation8 + $0x88] ss:$28 sps:$4 sm:$0xff]  }
 0x345   :  { %7109 = vmatpush1.bf16.msra.mxu1 %v11754_v29  ;;  %6782 = vmatprep.subr.bf16.mxu0 %v11759_v10  ;;  %v11810_v29 = vld [vmem:[#allocation8 + $0xbc] ss:$28 sps:$4 sm:$0xff]  }
 0x346   :  { %7110 = vmatprep.subr.bf16.mxu1 %v11762_v5  ;;  %v11811_v10 = vld [vmem:[#allocation8 + $0x280] ss:$28 sps:$4 sm:$0xff]   ;;  %v11808_v5 = vld [vmem:[#allocation8 + $0xb8] ss:$28 sps:$4 sm:$0xff]  }
 0x348   :  { %6783 = vmatpush1.bf16.msra.mxu0 %v11757_v61  ;;  %v11812_v61 = vld [vmem:[#allocation8 + $0xc0] ss:$28 sps:$4 sm:$0xff]  }
 0x349   :  { %7111 = vmatpush1.bf16.msra.mxu1 %v11760_v31  ;;  %6784 = vmatprep.subr.bf16.mxu0 %v11765_v6  ;;  %v11815_v31 = vld [vmem:[#allocation8 + $0xf4] ss:$28 sps:$4 sm:$0xff]  }
 0x34a   :  { %7112 = vmatprep.subr.bf16.mxu1 %v11768_v12  ;;  %v11816_v6 = vld [vmem:[#allocation8 + $0x2b8] ss:$28 sps:$4 sm:$0xff]  }
 0x34b   :  { %v11817_v12 = vld [vmem:[#allocation8 + $0xf8] ss:$28 sps:$4 sm:$0xff]  }
 0x34c   :  { %6785 = vmatpush1.bf16.msra.mxu0 %v11763_v13  ;;  %v11820_v13 = vld [vmem:[#allocation8 + $0x12c] ss:$28 sps:$4 sm:$0xff]  }
 0x34d   :  { %7113 = vmatpush1.bf16.msra.mxu1 %v11766_v16  ;;  %6786 = vmatprep.subr.bf16.mxu0 %v11771_v15  ;;  %v11821_v16 = vld [vmem:[#allocation8 + $0x2f0] ss:$28 sps:$4 sm:$0xff]   ;;  %v11818_v15 = vld [vmem:[#allocation8 + $0x128] ss:$28 sps:$4 sm:$0xff]  }
 0x34e   :  { %7114 = vmatprep.subr.bf16.mxu1 %v11774_v25  ;;  %v11822_v25 = vld [vmem:[#allocation8 + $0x130] ss:$28 sps:$4 sm:$0xff]  }
 0x350   :  { %6787 = vmatpush1.bf16.msra.mxu0 %v11769_v1  ;;  %v11825_v1 = vld [vmem:[#allocation8 + $0x164] ss:$28 sps:$4 sm:$0xff]  }
 0x351   :  { %7115 = vmatpush1.bf16.msra.mxu1 %v11772_v2  ;;  %6788 = vmatprep.subr.bf16.mxu0 %v11777_v45  ;;  %v11826_v2 = vld [vmem:[#allocation8 + $0x328] ss:$28 sps:$4 sm:$0xff]   ;;  %v11823_v45 = vld [vmem:[#allocation8 + $0x160] ss:$28 sps:$4 sm:$0xff]  }
 0x352   :  { %7116 = vmatprep.subr.bf16.mxu1 %v11780_v23  ;;  %v11827_v23 = vld [vmem:[#allocation8 + $0x168] ss:$28 sps:$4 sm:$0xff]  }
 0x354   :  { %6789 = vmatpush1.bf16.msra.mxu0 %v11775_v24  ;;  %v11830_v24 = vld [vmem:[#allocation8 + $0x19c] ss:$28 sps:$4 sm:$0xff]  }
 0x355   :  { %7117 = vmatpush1.bf16.msra.mxu1 %v11778_v32  ;;  %6790 = vmatprep.subr.bf16.mxu0 %v11783_v33  ;;  %v11828_v32 = vld [vmem:[#allocation8 + $0x198] ss:$28 sps:$4 sm:$0xff]   ;;  %v11832_v33 = vld [vmem:[#allocation8 + $0x1a0] ss:$28 sps:$4 sm:$0xff]  }
 0x356   :  { %7118 = vmatprep.subr.bf16.mxu1 %v11786_v54  ;;  %v11835_v54 = vld [vmem:[#allocation8 + $0x1d4] ss:$28 sps:$4 sm:$0xff]  }
 0x358   :  { %6791 = vmatpush1.bf16.msra.mxu0 %v11781_v17  ;;  %v11836_v17 = vld [vmem:[#allocation8 + $0x558] ss:$28 sps:$4 sm:$0xff]  }
 0x359   :  { %7119 = vmatpush1.bf16.msra.mxu1 %v11784_v39  ;;  %6792 = vmatprep.subr.bf16.mxu0 %v11789_v40  ;;  %v11837_v39 = vld [vmem:[#allocation8 + $0x398] ss:$28 sps:$4 sm:$0xff]   ;;  %v11840_v40 = vld [vmem:[#allocation8 + $0x20c] ss:$28 sps:$4 sm:$0xff]  }
 0x35a   :  { %7120 = vmatprep.subr.bf16.mxu1 %v11792_v41  ;;  %v11841_v41 = vld [vmem:[#allocation8 + $0x590] ss:$28 sps:$4 sm:$0xff]  }
 0x35c   :  { %6793 = vmatpush1.bf16.msra.mxu0 %v11787_v43  ;;  %v11838_v43 = vld [vmem:[#allocation8 + $0x208] ss:$28 sps:$4 sm:$0xff]  }
 0x35d   :  { %7121 = vmatpush1.bf16.msra.mxu1 %v11790_v49  ;;  %7131 = vmatprep.subr.bf16.mxu0 %v11795_v46  ;;  %v11845_v49 = vld [vmem:[#allocation8 + $0x244] ss:$28 sps:$4 sm:$0xff]  }
 0x35e   :  { %10680 = vmatprep.subr.bf16.mxu1 %v11796_v50  ;;  %v11846_v46 = vld [vmem:[#allocation8 + $0x5c8] ss:$28 sps:$4 sm:$0xff]   ;;  %v11843_v50 = vld [vmem:[#allocation8 + $0x240] ss:$28 sps:$4 sm:$0xff]  }
 0x35f   :  { %6795 = vmatmul.mubr.bf16.vlgmr.msra.gmra.mrb[8].mxu0 %v13260_v55 }
 0x360   :  { %7123 = vmatmul.mubr.bf16.vlgmr.msra.gmra.mrb[24].mxu1 %v13260_v55  ;;  %7132 = vmatpush1.bf16.msra.mxu0 %v11793_v51  ;;  %v11847_v51 = vld [vmem:[#allocation8 + $0x408] ss:$28 sps:$4 sm:$0xff]  }
 0x361   :  { %7163 = vmatprep.mubr.bf16.mxu0 %v13112_v26  ;;  %10681 = vmatpush3.bf16.msra.mxu1 %v11797_v34  ;;  %v11850_v34 = vld [vmem:[#allocation8 + $0x27c] ss:$28 sps:$4 sm:$0xff]  }
 0x362   :  { %7491 = vmatprep.mubr.bf16.mxu1 %v13112_v26  ;;  %7133 = vmatprep.subr.bf16.mxu0 %v11800_v56  ;;  %v11813_v26 = vld [vmem:[#allocation8 + $0xf0] ss:$28 sps:$4 sm:$0xff]   ;;  %v11851_v56 = vld [vmem:[#allocation8 + $0x600] ss:$28 sps:$4 sm:$0xff]  }
 0x363   :  { %10682 = vmatprep.subr.bf16.mxu1 %v11801_v59  ;;  %v11848_v59 = vld [vmem:[#allocation8 + $0x278] ss:$28 sps:$4 sm:$0xff]  }
 0x364   :  { %7134 = vmatpush1.bf16.msra.mxu0 %v11798_v58  ;;  %v11852_v58 = vld [vmem:[#allocation8 + $0x440] ss:$28 sps:$4 sm:$0xff]  }
 0x365   :  { %10683 = vmatpush3.bf16.msra.mxu1 %v11802_v60  ;;  %7135 = vmatprep.subr.bf16.mxu0 %v11805_v62  ;;  %v11855_v60 = vld [vmem:[#allocation8 + $0x2b4] ss:$28 sps:$4 sm:$0xff]  }
 0x366   :  { %10684 = vmatprep.subr.bf16.mxu1 %v11806_v3  ;;  %v11856_v62 = vld [vmem:[#allocation8 + $0x638] ss:$28 sps:$4 sm:$0xff]   ;;  %v11853_v3 = vld [vmem:[#allocation8 + $0x2b0] ss:$28 sps:$4 sm:$0xff]  }
 0x368   :  { %7136 = vmatpush1.bf16.msra.mxu0 %v11803_v4  ;;  %v11857_v4 = vld [vmem:[#allocation8 + $0x478] ss:$28 sps:$4 sm:$0xff]  }
 0x369   :  { %10685 = vmatpush3.bf16.msra.mxu1 %v11807_v8  ;;  %7137 = vmatprep.subr.bf16.mxu0 %v11810_v29  ;;  %v11860_v8 = vld [vmem:[#allocation8 + $0x2ec] ss:$28 sps:$4 sm:$0xff]  }
 0x36a   :  { %10686 = vmatprep.subr.bf16.mxu1 %v11811_v10  ;;  %v11861_v29 = vld [vmem:[#allocation8 + $0x670] ss:$28 sps:$4 sm:$0xff]   ;;  %v11858_v10 = vld [vmem:[#allocation8 + $0x2e8] ss:$28 sps:$4 sm:$0xff]  }
 0x36c   :  { %7138 = vmatpush1.bf16.msra.mxu0 %v11808_v5  ;;  %v11862_v5 = vld [vmem:[#allocation8 + $0x4b0] ss:$28 sps:$4 sm:$0xff]  }
 0x36d   :  { %10687 = vmatpush3.bf16.msra.mxu1 %v11812_v61  ;;  %7139 = vmatprep.subr.bf16.mxu0 %v11815_v31  ;;  %v11865_v61 = vld [vmem:[#allocation8 + $0x324] ss:$28 sps:$4 sm:$0xff]  }
 0x36e   :  { %10688 = vmatprep.subr.bf16.mxu1 %v11816_v6  ;;  %v11866_v31 = vld [vmem:[#allocation8 + $0x6a8] ss:$28 sps:$4 sm:$0xff]   ;;  %v11863_v6 = vld [vmem:[#allocation8 + $0x320] ss:$28 sps:$4 sm:$0xff]  }
 0x370   :  { %7140 = vmatpush1.bf16.msra.mxu0 %v11813_v26  ;;  %v11867_v26 = vld [vmem:[#allocation8 + $0x4e8] ss:$28 sps:$4 sm:$0xff]  }
 0x371   :  { %10689 = vmatpush3.bf16.msra.mxu1 %v11817_v12  ;;  %7141 = vmatprep.subr.bf16.mxu0 %v11820_v13  ;;  %v11870_v12 = vld [vmem:[#allocation8 + $0x35c] ss:$28 sps:$4 sm:$0xff]  }
 0x372   :  { %10690 = vmatprep.subr.bf16.mxu1 %v11821_v16  ;;  %v11871_v13 = vld [vmem:[#allocation8 + $0x6e0] ss:$28 sps:$4 sm:$0xff]   ;;  %v11868_v16 = vld [vmem:[#allocation8 + $0x358] ss:$28 sps:$4 sm:$0xff]  }
 0x374   :  { %7142 = vmatpush1.bf16.msra.mxu0 %v11818_v15  ;;  %v11872_v15 = vld [vmem:[#allocation8 + $0x520] ss:$28 sps:$4 sm:$0xff]  }
 0x375   :  { %10691 = vmatpush3.bf16.msra.mxu1 %v11822_v25  ;;  %7143 = vmatprep.subr.bf16.mxu0 %v11825_v1  ;;  %v11875_v25 = vld [vmem:[#allocation8 + $0x394] ss:$28 sps:$4 sm:$0xff]  }
 0x376   :  { %10692 = vmatprep.subr.bf16.mxu1 %v11826_v2  ;;  %v11876_v1 = vld [vmem:[#allocation8 + $0x8d8] ss:$28 sps:$4 sm:$0xff]   ;;  %v11873_v2 = vld [vmem:[#allocation8 + $0x390] ss:$28 sps:$4 sm:$0xff]  }
 0x378   :  { %7144 = vmatpush1.bf16.msra.mxu0 %v11823_v45  ;;  %v11877_v45 = vld [vmem:[#allocation8 + $0x718] ss:$28 sps:$4 sm:$0xff]  }
 0x379   :  { %10693 = vmatpush3.bf16.msra.mxu1 %v11827_v23  ;;  %7145 = vmatprep.subr.bf16.mxu0 %v11830_v24  ;;  %v11880_v23 = vld [vmem:[#allocation8 + $0x3cc] ss:$28 sps:$4 sm:$0xff]  }
 0x37a   :  { %10694 = vmatprep.subr.bf16.mxu1 %v11831_v27  ;;  %v11881_v24 = vld [vmem:[#allocation8 + $0x910] ss:$28 sps:$4 sm:$0xff]   ;;  %v11878_v27 = vld [vmem:[#allocation8 + $0x3c8] ss:$28 sps:$4 sm:$0xff]  }
 0x37c   :  { %7146 = vmatpush1.bf16.msra.mxu0 %v11828_v32  ;;  %v11882_v32 = vld [vmem:[#allocation8 + $0x750] ss:$28 sps:$4 sm:$0xff]  }
 0x37d   :  { %10695 = vmatpush3.bf16.msra.mxu1 %v11832_v33  ;;  %7147 = vmatprep.subr.bf16.mxu0 %v11835_v54  ;;  %v11885_v33 = vld [vmem:[#allocation8 + $0x404] ss:$28 sps:$4 sm:$0xff]  }
 0x37e   :  { %10702 = vmatprep.subr.bf16.mxu1 %v11836_v17  ;;  %v11886_v54 = vld [vmem:[#allocation8 + $0x948] ss:$28 sps:$4 sm:$0xff]   ;;  %v11883_v17 = vld [vmem:[#allocation8 + $0x400] ss:$28 sps:$4 sm:$0xff]  }
 0x380   :  { %7492 = vmatmul.mubr.bf16.vlgmr.msra.gmra.mrb[28].mxu1 %v13116_v28  ;;  %7148 = vmatpush1.bf16.msra.mxu0 %v11833_v35  ;;  %v11890_v35 = vld [vmem:[#allocation8 + $0x43c] ss:$28 sps:$4 sm:$0xff]  }
 0x381   :  { %10703 = vmatpush3.bf16.msra.mxu1 %v11837_v39  ;;  %7531 = vmatprep.mubr.bf16.mxu1 %v13124_v42  ;;  %v11891_v39 = vld [vmem:[#allocation8 + $0x980] ss:$28 sps:$4 sm:$0xff]  }
 0x382   :  { %7149 = vmatprep.subr.bf16.mxu0 %v11840_v40  ;;  %10704 = vmatprep.subr.bf16.mxu1 %v11841_v41  ;;  %v11888_v40 = vld [vmem:[#allocation8 + $0x438] ss:$28 sps:$4 sm:$0xff]  }
 0x383   :  { %v11895_v41 = vld [vmem:[#allocation8 + $0x474] ss:$28 sps:$4 sm:$0xff]  }
 0x384   :  { %7150 = vmatpush1.bf16.msra.mxu0 %v11838_v43  ;;  %v11896_v43 = vld [vmem:[#allocation8 + $0x9b8] ss:$28 sps:$4 sm:$0xff]  }
 0x385   :  { %10705 = vmatpush3.bf16.msra.mxu1 %v11842_v47  ;;  %7151 = vmatprep.subr.bf16.mxu0 %v11845_v49  ;;  %v11893_v47 = vld [vmem:[#allocation8 + $0x470] ss:$28 sps:$4 sm:$0xff]   ;;  %v11897_v49 = vld [vmem:[#allocation8 + $0x7f8] ss:$28 sps:$4 sm:$0xff]  }
 0x386   :  { %10706 = vmatprep.subr.bf16.mxu1 %v11846_v46  ;;  %v11900_v46 = vld [vmem:[#allocation8 + $0x4ac] ss:$28 sps:$4 sm:$0xff]  }
 0x388   :  { %7152 = vmatpush1.bf16.msra.mxu0 %v11843_v50  ;;  %v11901_v50 = vld [vmem:[#allocation8 + $0x9f0] ss:$28 sps:$4 sm:$0xff]  }
 0x389   :  { %10707 = vmatpush3.bf16.msra.mxu1 %v11847_v51  ;;  %7153 = vmatprep.subr.bf16.mxu0 %v11850_v34  ;;  %v11898_v51 = vld [vmem:[#allocation8 + $0x4a8] ss:$28 sps:$4 sm:$0xff]   ;;  %v11902_v34 = vld [vmem:[#allocation8 + $0x830] ss:$28 sps:$4 sm:$0xff]  }
 0x38a   :  { %10708 = vmatprep.subr.bf16.mxu1 %v11851_v56  ;;  %v11905_v56 = vld [vmem:[#allocation8 + $0x4e4] ss:$28 sps:$4 sm:$0xff]  }
 0x38c   :  { %7154 = vmatpush1.bf16.msra.mxu0 %v11848_v59  ;;  %v11906_v59 = vld [vmem:[#allocation8 + $0xa28] ss:$28 sps:$4 sm:$0xff]  }
 0x38d   :  { %10709 = vmatpush3.bf16.msra.mxu1 %v11852_v58  ;;  %7155 = vmatprep.subr.bf16.mxu0 %v11855_v60  ;;  %v11903_v58 = vld [vmem:[#allocation8 + $0x4e0] ss:$28 sps:$4 sm:$0xff]   ;;  %v11907_v60 = vld [vmem:[#allocation8 + $0x868] ss:$28 sps:$4 sm:$0xff]  }
 0x38e   :  { %10710 = vmatprep.subr.bf16.mxu1 %v11856_v62  ;;  %v11910_v62 = vld [vmem:[#allocation8 + $0x51c] ss:$28 sps:$4 sm:$0xff]  }
 0x390   :  { %7156 = vmatpush1.bf16.msra.mxu0 %v11853_v3  ;;  %v11911_v3 = vld [vmem:[#allocation8 + $0xa60] ss:$28 sps:$4 sm:$0xff]  }
 0x391   :  { %10711 = vmatpush3.bf16.msra.mxu1 %v11857_v4  ;;  %7157 = vmatprep.subr.bf16.mxu0 %v11860_v8  ;;  %v11908_v4 = vld [vmem:[#allocation8 + $0x518] ss:$28 sps:$4 sm:$0xff]   ;;  %v11912_v8 = vld [vmem:[#allocation8 + $0x8a0] ss:$28 sps:$4 sm:$0xff]  }
 0x392   :  { %10712 = vmatprep.subr.bf16.mxu1 %v11861_v29  ;;  %v11915_v29 = vld [vmem:[#allocation8 + $0x554] ss:$28 sps:$4 sm:$0xff]  }
 0x394   :  { %7158 = vmatpush1.bf16.msra.mxu0 %v11858_v10  ;;  %v11916_v10 = vld [vmem:[#allocation8 + $0xc58] ss:$28 sps:$4 sm:$0xff]  }
 0x395   :  { %10713 = vmatpush3.bf16.msra.mxu1 %v11862_v5  ;;  %7159 = vmatprep.subr.bf16.mxu0 %v11865_v61  ;;  %v11913_v5 = vld [vmem:[#allocation8 + $0x550] ss:$28 sps:$4 sm:$0xff]   ;;  %v11917_v61 = vld [vmem:[#allocation8 + $0xa98] ss:$28 sps:$4 sm:$0xff]  }
 0x396   :  { %10714 = vmatprep.subr.bf16.mxu1 %v11866_v31  ;;  %v11920_v31 = vld [vmem:[#allocation8 + $0x58c] ss:$28 sps:$4 sm:$0xff]  }
 0x398   :  { %7160 = vmatpush1.bf16.msra.mxu0 %v11863_v6  ;;  %v11921_v6 = vld [vmem:[#allocation8 + $0xc90] ss:$28 sps:$4 sm:$0xff]  }
 0x399   :  { %10715 = vmatpush3.bf16.msra.mxu1 %v11867_v26  ;;  %7161 = vmatprep.subr.bf16.mxu0 %v11870_v12  ;;  %v11918_v26 = vld [vmem:[#allocation8 + $0x588] ss:$28 sps:$4 sm:$0xff]   ;;  %v11922_v12 = vld [vmem:[#allocation8 + $0xad0] ss:$28 sps:$4 sm:$0xff]  }
 0x39a   :  { %10716 = vmatprep.subr.bf16.mxu1 %v11871_v13  ;;  %v11925_v13 = vld [vmem:[#allocation8 + $0x5c4] ss:$28 sps:$4 sm:$0xff]  }
 0x39c   :  { %7162 = vmatpush1.bf16.msra.mxu0 %v11868_v16  ;;  %v11926_v16 = vld [vmem:[#allocation8 + $0xcc8] ss:$28 sps:$4 sm:$0xff]  }
 0x39d   :  { %10717 = vmatpush3.bf16.msra.mxu1 %v11872_v15  ;;  %7172 = vmatprep.subr.bf16.mxu0 %v11875_v25  ;;  %v11923_v15 = vld [vmem:[#allocation8 + $0x5c0] ss:$28 sps:$4 sm:$0xff]   ;;  %v11927_v25 = vld [vmem:[#allocation8 + $0xb08] ss:$28 sps:$4 sm:$0xff]  }
 0x39e   :  { %10724 = vmatprep.subr.bf16.mxu1 %v11876_v1  ;;  %v11930_v1 = vld [vmem:[#allocation8 + $0x5fc] ss:$28 sps:$4 sm:$0xff]  }
 0x39f   :  { %7164 = vmatmul.mubr.bf16.vlgmr.msra.gmra.mrb[12].mxu0 %v13116_v28  ;;  %v11887_v28 = vld [vmem:[#allocation8 + $0x788] ss:$28 sps:$4 sm:$0xff]  }
 0x3a0   :  { %7532 = vmatmul.mubr.bf16.vlgmr.msra.gmra.mrb[32].mxu1 %v13156_v14  ;;  %7173 = vmatpush1.bf16.msra.mxu0 %v11873_v2  ;;  %v11931_v2 = vld [vmem:[#allocation8 + $0xd00] ss:$28 sps:$4 sm:$0xff]  }
 0x3a1   :  { %7204 = vmatprep.mubr.bf16.mxu0 %v13124_v42  ;;  %10725 = vmatpush3.bf16.msra.mxu1 %v11877_v45  ;;  %v11892_v42 = vld [vmem:[#allocation8 + $0x7c0] ss:$28 sps:$4 sm:$0xff]   ;;  %v11928_v45 = vld [vmem:[#allocation8 + $0x5f8] ss:$28 sps:$4 sm:$0xff]  }
 0x3a2   :  { %7571 = vmatprep.mubr.bf16.mxu1 %v13158_v19  ;;  %7174 = vmatprep.subr.bf16.mxu0 %v11880_v23  ;;  %v11932_v23 = vld [vmem:[#allocation8 + $0xb40] ss:$28 sps:$4 sm:$0xff]  }
 0x3a3   :  { %10726 = vmatprep.subr.bf16.mxu1 %v11881_v24  ;;  %v11935_v24 = vld [vmem:[#allocation8 + $0x634] ss:$28 sps:$4 sm:$0xff]  }
 0x3a4   :  { %7175 = vmatpush1.bf16.msra.mxu0 %v11878_v27  ;;  %v11936_v27 = vld [vmem:[#allocation8 + $0xd38] ss:$28 sps:$4 sm:$0xff]  }
 0x3a5   :  { %10727 = vmatpush3.bf16.msra.mxu1 %v11882_v32  ;;  %7176 = vmatprep.subr.bf16.mxu0 %v11885_v33  ;;  %v11933_v32 = vld [vmem:[#allocation8 + $0x630] ss:$28 sps:$4 sm:$0xff]   ;;  %v11937_v33 = vld [vmem:[#allocation8 + $0xb78] ss:$28 sps:$4 sm:$0xff]  }
 0x3a6   :  { %10728 = vmatprep.subr.bf16.mxu1 %v11886_v54  ;;  %v11940_v54 = vld [vmem:[#allocation8 + $0x66c] ss:$28 sps:$4 sm:$0xff]  }
 0x3a8   :  { %7177 = vmatpush1.bf16.msra.mxu0 %v11883_v17  ;;  %v11941_v17 = vld [vmem:[#allocation8 + $0xd70] ss:$28 sps:$4 sm:$0xff]  }
 0x3a9   :  { %10729 = vmatpush3.bf16.msra.mxu1 %v11887_v28  ;;  %7178 = vmatprep.subr.bf16.mxu0 %v11890_v35  ;;  %v11938_v28 = vld [vmem:[#allocation8 + $0x668] ss:$28 sps:$4 sm:$0xff]   ;;  %v11942_v35 = vld [vmem:[#allocation8 + $0xbb0] ss:$28 sps:$4 sm:$0xff]  }
 0x3aa   :  { %10730 = vmatprep.subr.bf16.mxu1 %v11891_v39  ;;  %v11945_v39 = vld [vmem:[#allocation8 + $0x6a4] ss:$28 sps:$4 sm:$0xff]  }
 0x3ac   :  { %7179 = vmatpush1.bf16.msra.mxu0 %v11888_v40  ;;  %v11946_v40 = vld [vmem:[#allocation8 + $0xda8] ss:$28 sps:$4 sm:$0xff]  }
 0x3ad   :  { %10731 = vmatpush3.bf16.msra.mxu1 %v11892_v42  ;;  %7180 = vmatprep.subr.bf16.mxu0 %v11895_v41  ;;  %v11943_v42 = vld [vmem:[#allocation8 + $0x6a0] ss:$28 sps:$4 sm:$0xff]   ;;  %v11947_v41 = vld [vmem:[#allocation8 + $0xbe8] ss:$28 sps:$4 sm:$0xff]  }
 0x3ae   :  { %10732 = vmatprep.subr.bf16.mxu1 %v11896_v43  ;;  %v11950_v43 = vld [vmem:[#allocation8 + $0x6dc] ss:$28 sps:$4 sm:$0xff]  }
 0x3b0   :  { %7181 = vmatpush1.bf16.msra.mxu0 %v11893_v47  ;;  %v11951_v47 = vld [vmem:[#allocation8 + $0xde0] ss:$28 sps:$4 sm:$0xff]  }
 0x3b1   :  { %10733 = vmatpush3.bf16.msra.mxu1 %v11897_v49  ;;  %7182 = vmatprep.subr.bf16.mxu0 %v11900_v46  ;;  %v11948_v49 = vld [vmem:[#allocation8 + $0x6d8] ss:$28 sps:$4 sm:$0xff]   ;;  %v11952_v46 = vld [vmem:[#allocation8 + $0xc20] ss:$28 sps:$4 sm:$0xff]  }
 0x3b2   :  { %10734 = vmatprep.subr.bf16.mxu1 %v11901_v50  ;;  %v11955_v50 = vld [vmem:[#allocation8 + $0x714] ss:$28 sps:$4 sm:$0xff]  }
 0x3b4   :  { %7183 = vmatpush1.bf16.msra.mxu0 %v11898_v51  ;;  %v11956_v51 = vld [vmem:[#allocation8 + $0xfd8] ss:$28 sps:$4 sm:$0xff]  }
 0x3b5   :  { %10735 = vmatpush3.bf16.msra.mxu1 %v11902_v34  ;;  %7184 = vmatprep.subr.bf16.mxu0 %v11905_v56  ;;  %v11953_v34 = vld [vmem:[#allocation8 + $0x710] ss:$28 sps:$4 sm:$0xff]   ;;  %v11957_v56 = vld [vmem:[#allocation8 + $0xe18] ss:$28 sps:$4 sm:$0xff]  }
 0x3b6   :  { %10736 = vmatprep.subr.bf16.mxu1 %v11906_v59  ;;  %v11960_v59 = vld [vmem:[#allocation8 + $0x74c] ss:$28 sps:$4 sm:$0xff]  }
 0x3b8   :  { %7185 = vmatpush1.bf16.msra.mxu0 %v11903_v58  ;;  %v11961_v58 = vld [vmem:[#allocation8 + $0x1010] ss:$28 sps:$4 sm:$0xff]  }
 0x3b9   :  { %10737 = vmatpush3.bf16.msra.mxu1 %v11907_v60  ;;  %7186 = vmatprep.subr.bf16.mxu0 %v11910_v62  ;;  %v11958_v60 = vld [vmem:[#allocation8 + $0x748] ss:$28 sps:$4 sm:$0xff]   ;;  %v11962_v62 = vld [vmem:[#allocation8 + $0xe50] ss:$28 sps:$4 sm:$0xff]  }
 0x3ba   :  { %10738 = vmatprep.subr.bf16.mxu1 %v11911_v3  ;;  %v11965_v3 = vld [vmem:[#allocation8 + $0x784] ss:$28 sps:$4 sm:$0xff]  }
 0x3bc   :  { %7187 = vmatpush1.bf16.msra.mxu0 %v11908_v4  ;;  %v11966_v4 = vld [vmem:[#allocation8 + $0x1048] ss:$28 sps:$4 sm:$0xff]  }
 0x3bd   :  { %10739 = vmatpush3.bf16.msra.mxu1 %v11912_v8  ;;  %7188 = vmatprep.subr.bf16.mxu0 %v11915_v29  ;;  %v11963_v8 = vld [vmem:[#allocation8 + $0x780] ss:$28 sps:$4 sm:$0xff]  }
 0x3be   :  { %10746 = vmatprep.subr.bf16.mxu1 %v11916_v10  ;;  %v11970_v29 = vld [vmem:[#allocation8 + $0x7bc] ss:$28 sps:$4 sm:$0xff]  }
 0x3bf   :  { %v11971_v10 = vld [vmem:[#allocation8 + $0x1080] ss:$28 sps:$4 sm:$0xff]  }
 0x3c0   :  { %7572 = vmatmul.mubr.bf16.vlgmr.msra.gmra.mrb[36].mxu1 %v13177_v53  ;;  %7189 = vmatpush1.bf16.msra.mxu0 %v11913_v5  ;;  %v11968_v5 = vld [vmem:[#allocation8 + $0x7b8] ss:$28 sps:$4 sm:$0xff]  }
 0x3c1   :  { %10747 = vmatpush3.bf16.msra.mxu1 %v11917_v61  ;;  %7611 = vmatprep.mubr.bf16.mxu1 %v13179_v57  ;;  %v11975_v61 = vld [vmem:[#allocation8 + $0x7f4] ss:$28 sps:$4 sm:$0xff]  }
 0x3c2   :  { %7190 = vmatprep.subr.bf16.mxu0 %v11920_v31  ;;  %10748 = vmatprep.subr.bf16.mxu1 %v11921_v6  ;;  %v11976_v31 = vld [vmem:[#allocation8 + $0x10b8] ss:$28 sps:$4 sm:$0xff]   ;;  %v11973_v6 = vld [vmem:[#allocation8 + $0x7f0] ss:$28 sps:$4 sm:$0xff]  }
 0x3c4   :  { %7191 = vmatpush1.bf16.msra.mxu0 %v11918_v26  ;;  %v11977_v26 = vld [vmem:[#allocation8 + $0xef8] ss:$28 sps:$4 sm:$0xff]  }
 0x3c5   :  { %10749 = vmatpush3.bf16.msra.mxu1 %v11922_v12  ;;  %7192 = vmatprep.subr.bf16.mxu0 %v11925_v13  ;;  %v11980_v12 = vld [vmem:[#allocation8 + $0x82c] ss:$28 sps:$4 sm:$0xff]  }
 0x3c6   :  { %10750 = vmatprep.subr.bf16.mxu1 %v11926_v16  ;;  %v11981_v13 = vld [vmem:[#allocation8 + $0x10f0] ss:$28 sps:$4 sm:$0xff]   ;;  %v11978_v16 = vld [vmem:[#allocation8 + $0x828] ss:$28 sps:$4 sm:$0xff]  }
 0x3c8   :  { %7193 = vmatpush1.bf16.msra.mxu0 %v11923_v15  ;;  %v11982_v15 = vld [vmem:[#allocation8 + $0xf30] ss:$28 sps:$4 sm:$0xff]  }
 0x3c9   :  { %10751 = vmatpush3.bf16.msra.mxu1 %v11927_v25  ;;  %7194 = vmatprep.subr.bf16.mxu0 %v11930_v1  ;;  %v11985_v25 = vld [vmem:[#allocation8 + $0x864] ss:$28 sps:$4 sm:$0xff]  }
 0x3ca   :  { %10752 = vmatprep.subr.bf16.mxu1 %v11931_v2  ;;  %v11986_v1 = vld [vmem:[#allocation8 + $0x1128] ss:$28 sps:$4 sm:$0xff]   ;;  %v11983_v2 = vld [vmem:[#allocation8 + $0x860] ss:$28 sps:$4 sm:$0xff]  }
 0x3cc   :  { %7195 = vmatpush1.bf16.msra.mxu0 %v11928_v45  ;;  %v11987_v45 = vld [vmem:[#allocation8 + $0xf68] ss:$28 sps:$4 sm:$0xff]  }
 0x3cd   :  { %10753 = vmatpush3.bf16.msra.mxu1 %v11932_v23  ;;  %7196 = vmatprep.subr.bf16.mxu0 %v11935_v24  ;;  %v11990_v23 = vld [vmem:[#allocation8 + $0x89c] ss:$28 sps:$4 sm:$0xff]  }
 0x3ce   :  { %10754 = vmatprep.subr.bf16.mxu1 %v11936_v27  ;;  %v11991_v24 = vld [vmem:[#allocation8 + $0x1160] ss:$28 sps:$4 sm:$0xff]   ;;  %v11988_v27 = vld [vmem:[#allocation8 + $0x898] ss:$28 sps:$4 sm:$0xff]  }
 0x3d0   :  { %7197 = vmatpush1.bf16.msra.mxu0 %v11933_v32  ;;  %v11992_v32 = vld [vmem:[#allocation8 + $0xfa0] ss:$28 sps:$4 sm:$0xff]  }
 0x3d1   :  { %10755 = vmatpush3.bf16.msra.mxu1 %v11937_v33  ;;  %7198 = vmatprep.subr.bf16.mxu0 %v11940_v54  ;;  %v11995_v33 = vld [vmem:[#allocation8 + $0x8d4] ss:$28 sps:$4 sm:$0xff]  }
 0x3d2   :  { %10756 = vmatprep.subr.bf16.mxu1 %v11941_v17  ;;  %v11996_v54 = vld [vmem:[#allocation8 + $0x1358] ss:$28 sps:$4 sm:$0xff]   ;;  %v11993_v17 = vld [vmem:[#allocation8 + $0x8d0] ss:$28 sps:$4 sm:$0xff]  }
 0x3d4   :  { %7199 = vmatpush1.bf16.msra.mxu0 %v11938_v28  ;;  %v11997_v28 = vld [vmem:[#allocation8 + $0x1198] ss:$28 sps:$4 sm:$0xff]  }
 0x3d5   :  { %10757 = vmatpush3.bf16.msra.mxu1 %v11942_v35  ;;  %7200 = vmatprep.subr.bf16.mxu0 %v11945_v39  ;;  %v12000_v35 = vld [vmem:[#allocation8 + $0x90c] ss:$28 sps:$4 sm:$0xff]  }
 0x3d6   :  { %10758 = vmatprep.subr.bf16.mxu1 %v11946_v40  ;;  %v12001_v39 = vld [vmem:[#allocation8 + $0x1390] ss:$28 sps:$4 sm:$0xff]   ;;  %v11998_v40 = vld [vmem:[#allocation8 + $0x908] ss:$28 sps:$4 sm:$0xff]  }
 0x3d8   :  { %7201 = vmatpush1.bf16.msra.mxu0 %v11943_v42  ;;  %v12002_v42 = vld [vmem:[#allocation8 + $0x11d0] ss:$28 sps:$4 sm:$0xff]  }
 0x3d9   :  { %10759 = vmatpush3.bf16.msra.mxu1 %v11947_v41  ;;  %7202 = vmatprep.subr.bf16.mxu0 %v11950_v43  ;;  %v12005_v41 = vld [vmem:[#allocation8 + $0x944] ss:$28 sps:$4 sm:$0xff]  }
 0x3da   :  { %10760 = vmatprep.subr.bf16.mxu1 %v11951_v47  ;;  %v12006_v43 = vld [vmem:[#allocation8 + $0x13c8] ss:$28 sps:$4 sm:$0xff]   ;;  %v12003_v47 = vld [vmem:[#allocation8 + $0x940] ss:$28 sps:$4 sm:$0xff]  }
 0x3dc   :  { %7203 = vmatpush1.bf16.msra.mxu0 %v11948_v49  ;;  %v12007_v49 = vld [vmem:[#allocation8 + $0x1208] ss:$28 sps:$4 sm:$0xff]  }
 0x3dd   :  { %10761 = vmatpush3.bf16.msra.mxu1 %v11952_v46  ;;  %7213 = vmatprep.subr.bf16.mxu0 %v11955_v50  ;;  %v12010_v46 = vld [vmem:[#allocation8 + $0x97c] ss:$28 sps:$4 sm:$0xff]  }
 0x3de   :  { %10768 = vmatprep.subr.bf16.mxu1 %v11956_v51  ;;  %v12011_v50 = vld [vmem:[#allocation8 + $0x1400] ss:$28 sps:$4 sm:$0xff]   ;;  %v12008_v51 = vld [vmem:[#allocation8 + $0x978] ss:$28 sps:$4 sm:$0xff]  }
 0x3df   :  { %7205 = vmatmul.mubr.bf16.vlgmr.msra.gmra.mrb[12].mxu0 %v13156_v14  ;;  %v11967_v14 = vld [vmem:[#allocation8 + $0xe88] ss:$28 sps:$4 sm:$0xff]  }
 0x3e0   :  { %7612 = vmatmul.mubr.bf16.vlgmr.msra.gmra.mrb[40].mxu1 %v13200_v36  ;;  %7214 = vmatpush1.bf16.msra.mxu0 %v11953_v34  ;;  %v12012_v34 = vld [vmem:[#allocation8 + $0x1240] ss:$28 sps:$4 sm:$0xff]  }
 0x3e1   :  { %7245 = vmatprep.mubr.bf16.mxu0 %v13158_v19  ;;  %10769 = vmatpush3.bf16.msra.mxu1 %v11957_v56  ;;  %v11972_v19 = vld [vmem:[#allocation8 + $0xec0] ss:$28 sps:$4 sm:$0xff]   ;;  %v12015_v56 = vld [vmem:[#allocation8 + $0x9b4] ss:$28 sps:$4 sm:$0xff]  }
 0x3e2   :  { %7651 = vmatprep.mubr.bf16.mxu1 %v13202_v52  ;;  %7215 = vmatprep.subr.bf16.mxu0 %v11960_v59  ;;  %v12016_v59 = vld [vmem:[#allocation8 + $0x1438] ss:$28 sps:$4 sm:$0xff]  }
 0x3e3   :  { %10770 = vmatprep.subr.bf16.mxu1 %v11961_v58  ;;  %v12013_v58 = vld [vmem:[#allocation8 + $0x9b0] ss:$28 sps:$4 sm:$0xff]  }
 0x3e4   :  { %7216 = vmatpush1.bf16.msra.mxu0 %v11958_v60  ;;  %v12017_v60 = vld [vmem:[#allocation8 + $0x1278] ss:$28 sps:$4 sm:$0xff]  }
 0x3e5   :  { %10771 = vmatpush3.bf16.msra.mxu1 %v11962_v62  ;;  %7217 = vmatprep.subr.bf16.mxu0 %v11965_v3  ;;  %v12020_v62 = vld [vmem:[#allocation8 + $0x9ec] ss:$28 sps:$4 sm:$0xff]  }
 0x3e6   :  { %10772 = vmatprep.subr.bf16.mxu1 %v11966_v4  ;;  %v12021_v3 = vld [vmem:[#allocation8 + $0x1470] ss:$28 sps:$4 sm:$0xff]   ;;  %v12018_v4 = vld [vmem:[#allocation8 + $0x9e8] ss:$28 sps:$4 sm:$0xff]  }
 0x3e8   :  { %7218 = vmatpush1.bf16.msra.mxu0 %v11963_v8  ;;  %v12022_v8 = vld [vmem:[#allocation8 + $0x12b0] ss:$28 sps:$4 sm:$0xff]  }
 0x3e9   :  { %10773 = vmatpush3.bf16.msra.mxu1 %v11967_v14  ;;  %7219 = vmatprep.subr.bf16.mxu0 %v11970_v29  ;;  %v12025_v14 = vld [vmem:[#allocation8 + $0xa24] ss:$28 sps:$4 sm:$0xff]  }
 0x3ea   :  { %10774 = vmatprep.subr.bf16.mxu1 %v11971_v10  ;;  %v12026_v29 = vld [vmem:[#allocation8 + $0x14a8] ss:$28 sps:$4 sm:$0xff]   ;;  %v12023_v10 = vld [vmem:[#allocation8 + $0xa20] ss:$28 sps:$4 sm:$0xff]  }
 0x3ec   :  { %7220 = vmatpush1.bf16.msra.mxu0 %v11968_v5  ;;  %v12027_v5 = vld [vmem:[#allocation8 + $0x12e8] ss:$28 sps:$4 sm:$0xff]  }
 0x3ed   :  { %10775 = vmatpush3.bf16.msra.mxu1 %v11972_v19  ;;  %7221 = vmatprep.subr.bf16.mxu0 %v11975_v61  ;;  %v12030_v19 = vld [vmem:[#allocation8 + $0xa5c] ss:$28 sps:$4 sm:$0xff]  }
 0x3ee   :  { %10776 = vmatprep.subr.bf16.mxu1 %v11976_v31  ;;  %v12031_v61 = vld [vmem:[#allocation8 + $0x14e0] ss:$28 sps:$4 sm:$0xff]   ;;  %v12028_v31 = vld [vmem:[#allocation8 + $0xa58] ss:$28 sps:$4 sm:$0xff]  }
 0x3f0   :  { %7222 = vmatpush1.bf16.msra.mxu0 %v11973_v6  ;;  %v12032_v6 = vld [vmem:[#allocation8 + $0x1320] ss:$28 sps:$4 sm:$0xff]  }
 0x3f1   :  { %10777 = vmatpush3.bf16.msra.mxu1 %v11977_v26  ;;  %7223 = vmatprep.subr.bf16.mxu0 %v11980_v12  ;;  %v12035_v26 = vld [vmem:[#allocation8 + $0xa94] ss:$28 sps:$4 sm:$0xff]  }
 0x3f2   :  { %10778 = vmatprep.subr.bf16.mxu1 %v11981_v13  ;;  %v12036_v12 = vld [vmem:[#allocation8 + $0x16d8] ss:$28 sps:$4 sm:$0xff]   ;;  %v12033_v13 = vld [vmem:[#allocation8 + $0xa90] ss:$28 sps:$4 sm:$0xff]  }
 0x3f4   :  { %7224 = vmatpush1.bf16.msra.mxu0 %v11978_v16  ;;  %v12037_v16 = vld [vmem:[#allocation8 + $0x1518] ss:$28 sps:$4 sm:$0xff]  }
 0x3f5   :  { %10779 = vmatpush3.bf16.msra.mxu1 %v11982_v15  ;;  %7225 = vmatprep.subr.bf16.mxu0 %v11985_v25  ;;  %v12040_v15 = vld [vmem:[#allocation8 + $0xacc] ss:$28 sps:$4 sm:$0xff]  }
 0x3f6   :  { %10780 = vmatprep.subr.bf16.mxu1 %v11986_v1  ;;  %v12041_v25 = vld [vmem:[#allocation8 + $0x1710] ss:$28 sps:$4 sm:$0xff]   ;;  %v12038_v1 = vld [vmem:[#allocation8 + $0xac8] ss:$28 sps:$4 sm:$0xff]  }
 0x3f8   :  { %7226 = vmatpush1.bf16.msra.mxu0 %v11983_v2  ;;  %v12042_v2 = vld [vmem:[#allocation8 + $0x1550] ss:$28 sps:$4 sm:$0xff]  }
 0x3f9   :  { %10781 = vmatpush3.bf16.msra.mxu1 %v11987_v45  ;;  %7227 = vmatprep.subr.bf16.mxu0 %v11990_v23  ;;  %v12045_v45 = vld [vmem:[#allocation8 + $0xb04] ss:$28 sps:$4 sm:$0xff]  }
 0x3fa   :  { %10782 = vmatprep.subr.bf16.mxu1 %v11991_v24  ;;  %v12046_v23 = vld [vmem:[#allocation8 + $0x1748] ss:$28 sps:$4 sm:$0xff]   ;;  %v12043_v24 = vld [vmem:[#allocation8 + $0xb00] ss:$28 sps:$4 sm:$0xff]  }
 0x3fc   :  { %7228 = vmatpush1.bf16.msra.mxu0 %v11988_v27  ;;  %v12050_v27 = vld [vmem:[#allocation8 + $0xb3c] ss:$28 sps:$4 sm:$0xff]  }
 0x3fd   :  { %10783 = vmatpush3.bf16.msra.mxu1 %v11992_v32  ;;  %7229 = vmatprep.subr.bf16.mxu0 %v11995_v33  ;;  %v12051_v32 = vld [vmem:[#allocation8 + $0x1780] ss:$28 sps:$4 sm:$0xff]   ;;  %v12048_v33 = vld [vmem:[#allocation8 + $0xb38] ss:$28 sps:$4 sm:$0xff]  }
 0x3fe   :  { %10790 = vmatprep.subr.bf16.mxu1 %v11996_v54  ;;  %v12055_v54 = vld [vmem:[#allocation8 + $0xb74] ss:$28 sps:$4 sm:$0xff]  }
 0x400   :  { %7652 = vmatmul.mubr.bf16.vlgmr.msra.gmra.mrb[44].mxu1 %v13214_v30  ;;  %7230 = vmatpush1.bf16.msra.mxu0 %v11993_v17  ;;  %v12056_v17 = vld [vmem:[#allocation8 + $0x17b8] ss:$28 sps:$4 sm:$0xff]  }
 0x401   :  { %10791 = vmatpush3.bf16.msra.mxu1 %v11997_v28  ;;  %7691 = vmatprep.mubr.bf16.mxu1 %v13216_v22  ;;  %v12053_v28 = vld [vmem:[#allocation8 + $0xb70] ss:$28 sps:$4 sm:$0xff]  }
 0x402   :  { %7231 = vmatprep.subr.bf16.mxu0 %v12000_v35  ;;  %10792 = vmatprep.subr.bf16.mxu1 %v12001_v39  ;;  %v12057_v35 = vld [vmem:[#allocation8 + $0x15f8] ss:$28 sps:$4 sm:$0xff]   ;;  %v12060_v39 = vld [vmem:[#allocation8 + $0xbac] ss:$28 sps:$4 sm:$0xff]  }
 0x404   :  { %7232 = vmatpush1.bf16.msra.mxu0 %v11998_v40  ;;  %v12061_v40 = vld [vmem:[#allocation8 + $0x17f0] ss:$28 sps:$4 sm:$0xff]  }
 0x405   :  { %10793 = vmatpush3.bf16.msra.mxu1 %v12002_v42  ;;  %7233 = vmatprep.subr.bf16.mxu0 %v12005_v41  ;;  %v12058_v42 = vld [vmem:[#allocation8 + $0xba8] ss:$28 sps:$4 sm:$0xff]   ;;  %v12062_v41 = vld [vmem:[#allocation8 + $0x1630] ss:$28 sps:$4 sm:$0xff]  }
 0x406   :  { %10794 = vmatprep.subr.bf16.mxu1 %v12006_v43  ;;  %v12065_v43 = vld [vmem:[#allocation8 + $0xbe4] ss:$28 sps:$4 sm:$0xff]  }
 0x408   :  { %7234 = vmatpush1.bf16.msra.mxu0 %v12003_v47 }
 0x409   :  { %10795 = vmatpush3.bf16.msra.mxu1 %v12007_v49  ;;  %7235 = vmatprep.subr.bf16.mxu0 %v12010_v46  ;;  %v12066_v49 = vld [vmem:[#allocation8 + $0x1828] ss:$28 sps:$4 sm:$0xff]  }
 0x40a   :  { %10796 = vmatprep.subr.bf16.mxu1 %v12011_v50 }
 0x40c   :  { %7236 = vmatpush1.bf16.msra.mxu0 %v12008_v51 }
 0x40d   :  { %10797 = vmatpush3.bf16.msra.mxu1 %v12012_v34  ;;  %7237 = vmatprep.subr.bf16.mxu0 %v12015_v56  ;;  %v12063_v56 = vld [vmem:[#allocation8 + $0xbe0] ss:$28 sps:$4 sm:$0xff]  }
 0x40e   :  { %10798 = vmatprep.subr.bf16.mxu1 %v12016_v59 }
 0x410   :  { %7238 = vmatpush1.bf16.msra.mxu0 %v12013_v58 }
 0x411   :  { %10799 = vmatpush3.bf16.msra.mxu1 %v12017_v60  ;;  %7239 = vmatprep.subr.bf16.mxu0 %v12020_v62  ;;  %v12067_v60 = vld [vmem:[#allocation8 + $0x1668] ss:$28 sps:$4 sm:$0xff]   ;;  %v12070_v62 = vld [vmem:[#allocation8 + $0xc1c] ss:$28 sps:$4 sm:$0xff]  }
 0x412   :  { %10800 = vmatprep.subr.bf16.mxu1 %v12021_v3 }
 0x414   :  { %7240 = vmatpush1.bf16.msra.mxu0 %v12018_v4  ;;  %v12071_v4 = vld [vmem:[#allocation8 + $0x1860] ss:$28 sps:$4 sm:$0xff]  }
 0x415   :  { %10801 = vmatpush3.bf16.msra.mxu1 %v12022_v8  ;;  %7241 = vmatprep.subr.bf16.mxu0 %v12025_v14  ;;  %v12068_v8 = vld [vmem:[#allocation8 + $0xc18] ss:$28 sps:$4 sm:$0xff]   ;;  %v12072_v14 = vld [vmem:[#allocation8 + $0x16a0] ss:$28 sps:$4 sm:$0xff]  }
 0x416   :  { %10802 = vmatprep.subr.bf16.mxu1 %v12026_v29  ;;  %v12075_v29 = vld [vmem:[#allocation8 + $0xc54] ss:$28 sps:$4 sm:$0xff]  }
 0x418   :  { %7242 = vmatpush1.bf16.msra.mxu0 %v12023_v10  ;;  %v12076_v10 = vld [vmem:[#allocation8 + $0x1a58] ss:$28 sps:$4 sm:$0xff]  }
 0x419   :  { %10803 = vmatpush3.bf16.msra.mxu1 %v12027_v5  ;;  %7243 = vmatprep.subr.bf16.mxu0 %v12030_v19  ;;  %v12073_v5 = vld [vmem:[#allocation8 + $0xc50] ss:$28 sps:$4 sm:$0xff]   ;;  %v12077_v19 = vld [vmem:[#allocation8 + $0x1898] ss:$28 sps:$4 sm:$0xff]  }
 0x41a   :  { %10804 = vmatprep.subr.bf16.mxu1 %v12031_v61  ;;  %v12080_v61 = vld [vmem:[#allocation8 + $0xc8c] ss:$28 sps:$4 sm:$0xff]  }
 0x41c   :  { %7244 = vmatpush1.bf16.msra.mxu0 %v12028_v31  ;;  %v12081_v31 = vld [vmem:[#allocation8 + $0x1a90] ss:$28 sps:$4 sm:$0xff]  }
 0x41d   :  { %10805 = vmatpush3.bf16.msra.mxu1 %v12032_v6  ;;  %7254 = vmatprep.subr.bf16.mxu0 %v12035_v26  ;;  %v12078_v6 = vld [vmem:[#allocation8 + $0xc88] ss:$28 sps:$4 sm:$0xff]   ;;  %v12082_v26 = vld [vmem:[#allocation8 + $0x18d0] ss:$28 sps:$4 sm:$0xff]  }
 0x41e   :  { %10812 = vmatprep.subr.bf16.mxu1 %v12036_v12  ;;  %v12085_v12 = vld [vmem:[#allocation8 + $0xcc4] ss:$28 sps:$4 sm:$0xff]  }
 0x41f   :  { %7246 = vmatmul.mubr.bf16.vlgmr.msra.gmra.mrb[12].mxu0 %v13177_v53  ;;  %v12047_v53 = vld [vmem:[#allocation8 + $0x1588] ss:$28 sps:$4 sm:$0xff]  }
 0x420   :  { %7692 = vmatmul.mubr.bf16.vlgmr.msra.gmra.mrb[48].mxu1 %v13234_v48  ;;  %7255 = vmatpush1.bf16.msra.mxu0 %v12033_v13  ;;  %v12086_v13 = vld [vmem:[#allocation8 + $0x1ac8] ss:$28 sps:$4 sm:$0xff]  }
 0x421   :  { %7286 = vmatprep.mubr.bf16.mxu0 %v13179_v57  ;;  %10813 = vmatpush3.bf16.msra.mxu1 %v12037_v16  ;;  %v12052_v57 = vld [vmem:[#allocation8 + $0x15c0] ss:$28 sps:$4 sm:$0xff]  }
 0x422   :  { %7731 = vmatprep.mubr.bf16.mxu1 %v13236_v21  ;;  %7256 = vmatprep.subr.bf16.mxu0 %v12040_v15  ;;  %v12083_v16 = vld [vmem:[#allocation8 + $0xcc0] ss:$28 sps:$4 sm:$0xff]   ;;  %v12087_v15 = vld [vmem:[#allocation8 + $0x1908] ss:$28 sps:$4 sm:$0xff]  }
 0x423   :  { %10814 = vmatprep.subr.bf16.mxu1 %v12041_v25  ;;  %v12090_v25 = vld [vmem:[#allocation8 + $0xcfc] ss:$28 sps:$4 sm:$0xff]  }
 0x424   :  { %7257 = vmatpush1.bf16.msra.mxu0 %v12038_v1  ;;  %v12091_v1 = vld [vmem:[#allocation8 + $0x1b00] ss:$28 sps:$4 sm:$0xff]  }
 0x425   :  { %10815 = vmatpush3.bf16.msra.mxu1 %v12042_v2  ;;  %7258 = vmatprep.subr.bf16.mxu0 %v12045_v45  ;;  %v12088_v2 = vld [vmem:[#allocation8 + $0xcf8] ss:$28 sps:$4 sm:$0xff]   ;;  %v12092_v45 = vld [vmem:[#allocation8 + $0x1940] ss:$28 sps:$4 sm:$0xff]  }
 0x426   :  { %10816 = vmatprep.subr.bf16.mxu1 %v12046_v23  ;;  %v12095_v23 = vld [vmem:[#allocation8 + $0xd34] ss:$28 sps:$4 sm:$0xff]  }
 0x428   :  { %7259 = vmatpush1.bf16.msra.mxu0 %v12043_v24  ;;  %v12096_v24 = vld [vmem:[#allocation8 + $0x1b38] ss:$28 sps:$4 sm:$0xff]  }
 0x429   :  { %10817 = vmatpush3.bf16.msra.mxu1 %v12047_v53  ;;  %7260 = vmatprep.subr.bf16.mxu0 %v12050_v27  ;;  %v12093_v53 = vld [vmem:[#allocation8 + $0xd30] ss:$28 sps:$4 sm:$0xff]   ;;  %v12097_v27 = vld [vmem:[#allocation8 + $0x1978] ss:$28 sps:$4 sm:$0xff]  }
 0x42a   :  { %10818 = vmatprep.subr.bf16.mxu1 %v12051_v32  ;;  %v12100_v32 = vld [vmem:[#allocation8 + $0xd6c] ss:$28 sps:$4 sm:$0xff]  }
 0x42c   :  { %7261 = vmatpush1.bf16.msra.mxu0 %v12048_v33  ;;  %v12101_v33 = vld [vmem:[#allocation8 + $0x1b70] ss:$28 sps:$4 sm:$0xff]  }
 0x42d   :  { %10819 = vmatpush3.bf16.msra.mxu1 %v12052_v57  ;;  %7262 = vmatprep.subr.bf16.mxu0 %v12055_v54  ;;  %v12098_v57 = vld [vmem:[#allocation8 + $0xd68] ss:$28 sps:$4 sm:$0xff]  }
 0x42e   :  { %10820 = vmatprep.subr.bf16.mxu1 %v12056_v17  ;;  %v13294_v54 = vld [vmem:[#allocation10] sm:$0xff]  ;;  %v12102_v17 = vld [vmem:[#allocation8 + $0x19b0] ss:$28 sps:$4 sm:$0xff]  }
 0x430   :  { %7263 = vmatpush1.bf16.msra.mxu0 %v12053_v28  ;;  %v12105_v28 = vld [vmem:[#allocation8 + $0xda4] ss:$28 sps:$4 sm:$0xff]  }
 0x431   :  { %10821 = vmatpush3.bf16.msra.mxu1 %v12057_v35  ;;  %7264 = vmatprep.subr.bf16.mxu0 %v12060_v39  ;;  %v12106_v35 = vld [vmem:[#allocation8 + $0x1ba8] ss:$28 sps:$4 sm:$0xff]  }
 0x432   :  { %v13284_v47 = vpop.f32.mrb[8].mxu0  ;;  %10822 = vmatprep.subr.bf16.mxu1 %v12061_v40  ;;  %v1839_v40 = vrot.slane %v13294_v54, %v13103_v11 }
 0x433   :  { %v13286_v46 = vpop.f32.mrb[24].mxu1  ;;  %v13288_v50 = vpop.f32.mrb[9].mxu0 }
 0x434   :  { %v13290_v51 = vpop.f32.mrb[25].mxu1  ;;  %v6800_v34 = vpop.f32.mrb[10].mxu0  ;;  %7265 = vmatpush1.bf16.msra.mxu0 %v12058_v42 }
 0x435   :  { %v7128_v59 = vpop.f32.mrb[26].mxu1  ;;  %10823 = vmatpush3.bf16.msra.mxu1 %v12062_v41  ;;  %v6801_v58 = vpop.f32.mrb[11].mxu0  ;;  %7266 = vmatprep.subr.bf16.mxu0 %v12065_v43  ;;  %v12103_v41 = vld [vmem:[#allocation8 + $0xda0] ss:$28 sps:$4 sm:$0xff]   ;;  %v12107_v34 = vld [vmem:[#allocation8 + $0x19e8] ss:$28 sps:$4 sm:$0xff]  }
 0x436   :  { %v7129_v3 = vpop.f32.mrb[27].mxu1  ;;  %10824 = vmatprep.subr.bf16.mxu1 %v12066_v49  ;;  %v12111_v58 = vld [vmem:[#allocation8 + $0x1be0] ss:$28 sps:$4 sm:$0xff]  }
 0x437   :  { %v12112_v3 = vld [vmem:[#allocation8 + $0x1a20] ss:$28 sps:$4 sm:$0xff]  }
 0x438   :  { %7267 = vmatpush1.bf16.msra.mxu0 %v12063_v56  ;;  %v12110_v56 = vld [vmem:[#allocation8 + $0xddc] ss:$28 sps:$4 sm:$0xff]  }
 0x439   :  { %10825 = vmatpush3.bf16.msra.mxu1 %v12067_v60  ;;  %7268 = vmatprep.subr.bf16.mxu0 %v12070_v62  ;;  %v10901_v60 = vadd.f32 %v13288_v50, %v1839_v40  ;;  %v12108_v62 = vld [vmem:[#allocation8 + $0xdd8] ss:$28 sps:$4 sm:$0xff]  }
 0x43a   :  { %10826 = vmatprep.subr.bf16.mxu1 %v12071_v4  ;;  %v12115_v4 = vld [vmem:[#allocation8 + $0xe14] ss:$28 sps:$4 sm:$0xff]  }
 0x43c   :  { %7269 = vmatpush1.bf16.msra.mxu0 %v12068_v8  ;;  %v12118_v8 = vld [vmem:[#allocation11 + $0x4] ss:$8 sps:$4 sm:$0xff]  }
 0x43d   :  { %10827 = vmatpush3.bf16.msra.mxu1 %v12072_v14  ;;  %7270 = vmatprep.subr.bf16.mxu0 %v12075_v29  ;;  %v7780_v14 = vmax.f32 %v10901_v60, 0.0  ;;  %v12113_v29 = vld [vmem:[#allocation8 + $0xe10] ss:$28 sps:$4 sm:$0xff]  }
 0x43e   :  { %10834 = vmatprep.subr.bf16.mxu1 %v12076_v10  ;;  %v12116_v10 = vld [vmem:[#allocation11] ss:$8 sps:$4 sm:$0xff]  }
 0x43f   :  { %v7787_v50 = vpack.c.bf16 %v7780_v14, %v7780_v14  ;;  %v12163_v60 = vld [vmem:[#allocation8 + $0xfd4] ss:$28 sps:$4 sm:$0xff]   ;;  %v12167_v14 = vld [vmem:[#allocation8 + $0x1008] ss:$28 sps:$4 sm:$0xff]  }
 0x440   :  { %7732 = vmatmul.mubr.bf16.vlgmr.msra.gmra.mrb[52].mxu1 %v13249_v7  ;;  %7271 = vmatpush1.bf16.msra.mxu0 %v12073_v5  ;;  %v12121_v5 = vld [vmem:[#allocation8 + $0xe4c] ss:$28 sps:$4 sm:$0xff]  }
 0x441   :  { %10835 = vmatpush3.bf16.msra.mxu1 %v12077_v19  ;;  %7771 = vmatprep.mubr.bf16.mxu1 %v13251_v37  ;;  %v12124_v19 = vld [vmem:[#allocation11 + $0x14] ss:$8 sps:$4 sm:$0xff]  }
 0x442   :  { %7272 = vmatprep.subr.bf16.mxu0 %v12080_v61  ;;  %10836 = vmatprep.subr.bf16.mxu1 %v12081_v31  ;;  %v12119_v61 = vld [vmem:[#allocation8 + $0xe48] ss:$28 sps:$4 sm:$0xff]   ;;  %v12122_v31 = vld [vmem:[#allocation11 + $0x10] ss:$8 sps:$4 sm:$0xff]  }
 0x444   :  { %7273 = vmatpush1.bf16.msra.mxu0 %v12078_v6  ;;  %v12127_v6 = vld [vmem:[#allocation8 + $0xe84] ss:$28 sps:$4 sm:$0xff]  }
 0x445   :  { %10837 = vmatpush3.bf16.msra.mxu1 %v12082_v26  ;;  %7274 = vmatprep.subr.bf16.mxu0 %v12085_v12  ;;  %v12130_v26 = vld [vmem:[#allocation11 + $0x24] ss:$8 sps:$4 sm:$0xff]   ;;  %v12125_v12 = vld [vmem:[#allocation8 + $0xe80] ss:$28 sps:$4 sm:$0xff]  }
 0x446   :  { %10838 = vmatprep.subr.bf16.mxu1 %v12086_v13  ;;  %v12133_v13 = vld [vmem:[#allocation8 + $0xebc] ss:$28 sps:$4 sm:$0xff]  }
 0x448   :  { %7275 = vmatpush1.bf16.msra.mxu0 %v12083_v16  ;;  %v12136_v16 = vld [vmem:[#allocation11 + $0x34] ss:$8 sps:$4 sm:$0xff]  }
 0x449   :  { %10839 = vmatpush3.bf16.msra.mxu1 %v12087_v15  ;;  %7276 = vmatprep.subr.bf16.mxu0 %v12090_v25  ;;  %v12131_v15 = vld [vmem:[#allocation8 + $0xeb8] ss:$28 sps:$4 sm:$0xff]  }
 0x44a   :  { %10840 = vmatprep.subr.bf16.mxu1 %v12091_v1  ;;  %v12139_v25 = vld [vmem:[#allocation8 + $0xef4] ss:$28 sps:$4 sm:$0xff]  }
 0x44b   :  { %v12142_v1 = vld [vmem:[#allocation11 + $0x44] ss:$8 sps:$4 sm:$0xff]  }
 0x44c   :  { %7277 = vmatpush1.bf16.msra.mxu0 %v12088_v2  ;;  %v12137_v2 = vld [vmem:[#allocation8 + $0xef0] ss:$28 sps:$4 sm:$0xff]  }
 0x44d   :  { %10841 = vmatpush3.bf16.msra.mxu1 %v12092_v45  ;;  %7278 = vmatprep.subr.bf16.mxu0 %v12095_v23  ;;  %v12140_v45 = vld [vmem:[#allocation11 + $0x40] ss:$8 sps:$4 sm:$0xff]  }
 0x44e   :  { %10842 = vmatprep.subr.bf16.mxu1 %v12096_v24  ;;  %v12145_v23 = vld [vmem:[#allocation8 + $0xf2c] ss:$28 sps:$4 sm:$0xff]   ;;  %v12148_v24 = vld [vmem:[#allocation11 + $0x54] ss:$8 sps:$4 sm:$0xff]  }
 0x450   :  { %7279 = vmatpush1.bf16.msra.mxu0 %v12093_v53  ;;  %v12143_v53 = vld [vmem:[#allocation8 + $0xf28] ss:$28 sps:$4 sm:$0xff]  }
 0x451   :  { %10843 = vmatpush3.bf16.msra.mxu1 %v12097_v27  ;;  %7280 = vmatprep.subr.bf16.mxu0 %v12100_v32  ;;  %v1859_v27 = vrot.slane %v13294_v54, %v13186_v63  ;;  %v12146_v32 = vld [vmem:[#allocation11 + $0x50] ss:$8 sps:$4 sm:$0xff]   ;;  %v12160_v63 = vld [vmem:[#allocation11 + $0x74] ss:$8 sps:$4 sm:$0xff]  }
 0x452   :  { %10844 = vmatprep.subr.bf16.mxu1 %v12101_v33  ;;  %v12151_v33 = vld [vmem:[#allocation8 + $0xf64] ss:$28 sps:$4 sm:$0xff]  }
 0x453   :  { %v10696_v39 = vpop.f32.mrb[28].mxu1 }
 0x454   :  { %v10697_v42 = vpop.f32.mrb[29].mxu1  ;;  %7281 = vmatpush1.bf16.msra.mxu0 %v12098_v57  ;;  %v12154_v57 = vld [vmem:[#allocation11 + $0x64] ss:$8 sps:$4 sm:$0xff]  }
 0x455   :  { %v13298_v43 = vadd.f32 %v10697_v42, %v10696_v39  ;;  %v10699_v49 = vpop.f32.mrb[30].mxu1  ;;  %10845 = vmatpush3.bf16.msra.mxu1 %v12102_v17  ;;  %7282 = vmatprep.subr.bf16.mxu0 %v12105_v28 }
 0x456   :  { %v10700_v59 = vpop.f32.mrb[31].mxu1  ;;  %10846 = vmatprep.subr.bf16.mxu1 %v12106_v35  ;;  %v12149_v35 = vld [vmem:[#allocation8 + $0xf60] ss:$28 sps:$4 sm:$0xff]  }
 0x457   :  { %v7494_v39 = vadd.f32 %v13298_v43, %v1859_v27  ;;  %v12157_v49 = vld [vmem:[#allocation8 + $0xf9c] ss:$28 sps:$4 sm:$0xff]   ;;  %v12161_v43 = vld [vmem:[#allocation8 + $0xfd0] ss:$28 sps:$4 sm:$0xff]  }
 0x458   :  { %7283 = vmatpush1.bf16.msra.mxu0 %v12103_v41  ;;  %v12152_v41 = vld [vmem:[#allocation11 + $0x60] ss:$8 sps:$4 sm:$0xff]   ;;  %v12155_v59 = vld [vmem:[#allocation8 + $0xf98] ss:$28 sps:$4 sm:$0xff]  }
 0x459   :  { %10847 = vmatpush3.bf16.msra.mxu1 %v12107_v34  ;;  %7284 = vmatprep.subr.bf16.mxu0 %v12110_v56 }
 0x45a   :  { %10848 = vmatprep.subr.bf16.mxu1 %v12111_v58  ;;  %v12158_v58 = vld [vmem:[#allocation11 + $0x70] ss:$8 sps:$4 sm:$0xff]  }
 0x45c   :  { %7285 = vmatpush1.bf16.msra.mxu0 %v12108_v62  ;;  %v12166_v62 = vld [vmem:[#allocation11 + $0x84] ss:$8 sps:$4 sm:$0xff]  }
 0x45d   :  { %10849 = vmatpush3.bf16.msra.mxu1 %v12112_v3  ;;  %7295 = vmatprep.subr.bf16.mxu0 %v12115_v4  ;;  %v12164_v3 = vld [vmem:[#allocation11 + $0x80] ss:$8 sps:$4 sm:$0xff]  }
 0x45e   :  { %8477 = vmatprep.subr.bf16.mxu1 %v12118_v8  ;;  %v12169_v4 = vld [vmem:[#allocation8 + $0x100c] ss:$28 sps:$4 sm:$0xff]   ;;  %v12172_v8 = vld [vmem:[#allocation11 + $0x94] ss:$8 sps:$4 sm:$0xff]  }
 0x45f   :  { %7287 = vmatmul.mubr.bf16.vlgmr.msra.gmra.mrb[12].mxu0 %v13200_v36  ;;  %v12128_v36 = vld [vmem:[#allocation11 + $0x20] ss:$8 sps:$4 sm:$0xff]  }
 0x460   :  { %7772 = vmatmul.mubr.bf16.vlgmr.msra.gmra.mrb[56].mxu1 %v13260_v55  ;;  %7296 = vmatpush1.bf16.msra.mxu0 %v12113_v29  ;;  %v12170_v29 = vld [vmem:[#allocation11 + $0x90] ss:$8 sps:$4 sm:$0xff]  }
 0x461   :  { %7327 = vmatprep.mubr.bf16.mxu0 %v13202_v52  ;;  %8478 = vmatpush1.bf16.msra.mxu1 %v12116_v10  ;;  %v12134_v52 = vld [vmem:[#allocation11 + $0x30] ss:$8 sps:$4 sm:$0xff]  }
 0x462   :  { %8509 = vmatprep.mubr.bf16.mxu1 %v7787_v50  ;;  %7297 = vmatprep.subr.bf16.mxu0 %v12121_v5  ;;  %v12175_v10 = vld [vmem:[#allocation8 + $0x1044] ss:$28 sps:$4 sm:$0xff]   ;;  %v12178_v5 = vld [vmem:[#allocation11 + $0xa4] ss:$8 sps:$4 sm:$0xff]   ;;  %v12176_v50 = vld [vmem:[#allocation11 + $0xa0] ss:$8 sps:$4 sm:$0xff]  }
 0x463   :  { %8479 = vmatprep.subr.bf16.mxu1 %v12124_v19  ;;  %v12173_v19 = vld [vmem:[#allocation8 + $0x1040] ss:$28 sps:$4 sm:$0xff]  }
 0x464   :  { %7298 = vmatpush1.bf16.msra.mxu0 %v12119_v61  ;;  %v12181_v61 = vld [vmem:[#allocation8 + $0x107c] ss:$28 sps:$4 sm:$0xff]  }
 0x465   :  { %8480 = vmatpush1.bf16.msra.mxu1 %v12122_v31  ;;  %7299 = vmatprep.subr.bf16.mxu0 %v12127_v6  ;;  %v12184_v31 = vld [vmem:[#allocation11 + $0xb4] ss:$8 sps:$4 sm:$0xff]   ;;  %v12179_v6 = vld [vmem:[#allocation8 + $0x1078] ss:$28 sps:$4 sm:$0xff]  }
 0x466   :  { %8481 = vmatprep.subr.bf16.mxu1 %v12130_v26  ;;  %v12182_v26 = vld [vmem:[#allocation11 + $0xb0] ss:$8 sps:$4 sm:$0xff]  }
 0x468   :  { %7300 = vmatpush1.bf16.msra.mxu0 %v12125_v12  ;;  %v12187_v12 = vld [vmem:[#allocation8 + $0x10b4] ss:$28 sps:$4 sm:$0xff]  }
 0x469   :  { %8482 = vmatpush1.bf16.msra.mxu1 %v12128_v36  ;;  %7301 = vmatprep.subr.bf16.mxu0 %v12133_v13  ;;  %v12190_v36 = vld [vmem:[#allocation11 + $0xc4] ss:$8 sps:$4 sm:$0xff]  }
 0x46a   :  { %8483 = vmatprep.subr.bf16.mxu1 %v12136_v16  ;;  %v12185_v13 = vld [vmem:[#allocation8 + $0x10b0] ss:$28 sps:$4 sm:$0xff]  }
 0x46b   :  { %v12188_v16 = vld [vmem:[#allocation11 + $0xc0] ss:$8 sps:$4 sm:$0xff]  }
 0x46c   :  { %7302 = vmatpush1.bf16.msra.mxu0 %v12131_v15  ;;  %v12193_v15 = vld [vmem:[#allocation8 + $0x10ec] ss:$28 sps:$4 sm:$0xff]  }
 0x46d   :  { %8484 = vmatpush1.bf16.msra.mxu1 %v12134_v52  ;;  %7303 = vmatprep.subr.bf16.mxu0 %v12139_v25  ;;  %v12196_v52 = vld [vmem:[#allocation11 + $0xd4] ss:$8 sps:$4 sm:$0xff]  }
 0x46e   :  { %8485 = vmatprep.subr.bf16.mxu1 %v12142_v1  ;;  %v12191_v25 = vld [vmem:[#allocation8 + $0x10e8] ss:$28 sps:$4 sm:$0xff]   ;;  %v12194_v1 = vld [vmem:[#allocation11 + $0xd0] ss:$8 sps:$4 sm:$0xff]  }
 0x470   :  { %7304 = vmatpush1.bf16.msra.mxu0 %v12137_v2  ;;  %v12199_v2 = vld [vmem:[#allocation8 + $0x1124] ss:$28 sps:$4 sm:$0xff]  }
 0x471   :  { %8486 = vmatpush1.bf16.msra.mxu1 %v12140_v45  ;;  %7305 = vmatprep.subr.bf16.mxu0 %v12145_v23  ;;  %v1835_v45 = vrot.slane %v13294_v54, %v13098_v9  ;;  %v12202_v23 = vld [vmem:[#allocation11 + $0xe4] ss:$8 sps:$4 sm:$0xff]  }
 0x472   :  { %8487 = vmatprep.subr.bf16.mxu1 %v12148_v24 }
 0x473   :  { %v10718_v17 = vpop.f32.mrb[32].mxu1 }
 0x474   :  { %v10719_v28 = vpop.f32.mrb[33].mxu1  ;;  %7306 = vmatpush1.bf16.msra.mxu0 %v12143_v53  ;;  %v1847_v53 = vrot.slane %v13294_v54, %v13110_v20 }
 0x475   :  { %v10720_v40 = vadd.f32 %v10719_v28, %v10718_v17  ;;  %v10721_v42 = vpop.f32.mrb[34].mxu1  ;;  %8488 = vmatpush1.bf16.msra.mxu1 %v12146_v32  ;;  %7307 = vmatprep.subr.bf16.mxu0 %v12151_v33  ;;  %v12197_v32 = vld [vmem:[#allocation8 + $0x1120] ss:$28 sps:$4 sm:$0xff]   ;;  %v12200_v17 = vld [vmem:[#allocation11 + $0xe0] ss:$8 sps:$4 sm:$0xff]  }
 0x476   :  { %v10722_v34 = vpop.f32.mrb[35].mxu1  ;;  %8489 = vmatprep.subr.bf16.mxu1 %v12154_v57  ;;  %v12205_v28 = vld [vmem:[#allocation8 + $0x115c] ss:$28 sps:$4 sm:$0xff]  }
 0x477   :  { %v13307_v56 = vadd.f32 %v10720_v40, %v7494_v39  ;;  %v12208_v40 = vld [vmem:[#allocation11 + $0xf4] ss:$8 sps:$4 sm:$0xff]   ;;  %v12206_v34 = vld [vmem:[#allocation11 + $0xf0] ss:$8 sps:$4 sm:$0xff]  }
 0x478   :  { %7308 = vmatpush1.bf16.msra.mxu0 %v12149_v35  ;;  %v10900_v35 = vadd.f32 %v13284_v47, %v1835_v45  ;;  %v12209_v47 = vld [vmem:[#allocation8 + $0x1190] ss:$28 sps:$4 sm:$0xff]  }
 0x479   :  { %8490 = vmatpush1.bf16.msra.mxu1 %v12152_v41  ;;  %7309 = vmatprep.subr.bf16.mxu0 %v12157_v49  ;;  %v10903_v41 = vadd.f32 %v13290_v51, %v1847_v53  ;;  %v12203_v49 = vld [vmem:[#allocation8 + $0x1158] ss:$28 sps:$4 sm:$0xff]   ;;  %v12220_v51 = vld [vmem:[#allocation11 + $0x114] ss:$8 sps:$4 sm:$0xff]  }
 0x47a   :  { %8491 = vmatprep.subr.bf16.mxu1 %v12160_v63  ;;  %v12211_v63 = vld [vmem:[#allocation8 + $0x1194] ss:$28 sps:$4 sm:$0xff]   ;;  %v12253_v53 = vld [vmem:[#allocation8 + $0x131c] ss:$28 sps:$4 sm:$0xff]  }
 0x47c   :  { %7310 = vmatpush1.bf16.msra.mxu0 %v12155_v59  ;;  %v7779_v59 = vmax.f32 %v10900_v35, 0.0  ;;  %v12262_v35 = vld [vmem:[#allocation11 + $0x184] ss:$8 sps:$4 sm:$0xff]  }
 0x47d   :  { %8492 = vmatpush1.bf16.msra.mxu1 %v12158_v58  ;;  %7311 = vmatprep.subr.bf16.mxu0 %v12163_v60  ;;  %v12214_v58 = vld [vmem:[#allocation11 + $0x104] ss:$8 sps:$4 sm:$0xff]   ;;  %v7782_v60 = vmax.f32 %v10903_v41, 0.0 }
 0x47e   :  { %8493 = vmatprep.subr.bf16.mxu1 %v12166_v62  ;;  %v12212_v62 = vld [vmem:[#allocation11 + $0x100] ss:$8 sps:$4 sm:$0xff]  }
 0x47f   :  { %v12265_v41 = vld [vmem:[#allocation8 + $0x138c] ss:$28 sps:$4 sm:$0xff]  }
 0x480   :  { %7312 = vmatpush1.bf16.msra.mxu0 %v12161_v43  ;;  %v7786_v43 = vpack.c.bf16 %v7779_v59, %v7779_v59  ;;  %v12274_v59 = vld [vmem:[#allocation11 + $0x1a4] ss:$8 sps:$4 sm:$0xff]  }
 0x481   :  { %8494 = vmatpush1.bf16.msra.mxu1 %v12164_v3  ;;  %7313 = vmatprep.subr.bf16.mxu0 %v12169_v4  ;;  %v7789_v3 = vpack.c.bf16 %v7782_v60, %v7782_v60  ;;  %v12215_v4 = vld [vmem:[#allocation8 + $0x11c8] ss:$28 sps:$4 sm:$0xff]  }
 0x482   :  { %8495 = vmatprep.subr.bf16.mxu1 %v12172_v8  ;;  %v12218_v8 = vld [vmem:[#allocation11 + $0x110] ss:$8 sps:$4 sm:$0xff]   ;;  %v12272_v60 = vld [vmem:[#allocation11 + $0x1a0] ss:$8 sps:$4 sm:$0xff]  }
 0x484   :  { %7314 = vmatpush1.bf16.msra.mxu0 %v12167_v14  ;;  %v12223_v14 = vld [vmem:[#allocation8 + $0x1204] ss:$28 sps:$4 sm:$0xff]  }
 0x485   :  { %8496 = vmatpush1.bf16.msra.mxu1 %v12170_v29  ;;  %7315 = vmatprep.subr.bf16.mxu0 %v12175_v10  ;;  %v12226_v29 = vld [vmem:[#allocation11 + $0x124] ss:$8 sps:$4 sm:$0xff]   ;;  %v12221_v10 = vld [vmem:[#allocation8 + $0x1200] ss:$28 sps:$4 sm:$0xff]  }
 0x486   :  { %8497 = vmatprep.subr.bf16.mxu1 %v12178_v5  ;;  %v12224_v5 = vld [vmem:[#allocation11 + $0x120] ss:$8 sps:$4 sm:$0xff]  }
 0x488   :  { %7316 = vmatpush1.bf16.msra.mxu0 %v12173_v19  ;;  %v12232_v19 = vld [vmem:[#allocation11 + $0x134] ss:$8 sps:$4 sm:$0xff]  }
 0x489   :  { %8498 = vmatpush1.bf16.msra.mxu1 %v12176_v50  ;;  %7317 = vmatprep.subr.bf16.mxu0 %v12181_v61  ;;  %v12227_v50 = vld [vmem:[#allocation8 + $0x1238] ss:$28 sps:$4 sm:$0xff]  }
 0x48a   :  { %8499 = vmatprep.subr.bf16.mxu1 %v12184_v31  ;;  %v12235_v61 = vld [vmem:[#allocation8 + $0x1274] ss:$28 sps:$4 sm:$0xff]  }
 0x48b   :  { %v12238_v31 = vld [vmem:[#allocation11 + $0x144] ss:$8 sps:$4 sm:$0xff]  }
 0x48c   :  { %7318 = vmatpush1.bf16.msra.mxu0 %v12179_v6  ;;  %v12233_v6 = vld [vmem:[#allocation8 + $0x1270] ss:$28 sps:$4 sm:$0xff]  }
 0x48d   :  { %8500 = vmatpush1.bf16.msra.mxu1 %v12182_v26  ;;  %7319 = vmatprep.subr.bf16.mxu0 %v12187_v12  ;;  %v12236_v26 = vld [vmem:[#allocation11 + $0x140] ss:$8 sps:$4 sm:$0xff]  }
 0x48e   :  { %8501 = vmatprep.subr.bf16.mxu1 %v12190_v36  ;;  %v12241_v12 = vld [vmem:[#allocation8 + $0x12ac] ss:$28 sps:$4 sm:$0xff]   ;;  %v12244_v36 = vld [vmem:[#allocation11 + $0x154] ss:$8 sps:$4 sm:$0xff]  }
 0x490   :  { %7320 = vmatpush1.bf16.msra.mxu0 %v12185_v13  ;;  %v12239_v13 = vld [vmem:[#allocation8 + $0x12a8] ss:$28 sps:$4 sm:$0xff]  }
 0x491   :  { %8502 = vmatpush1.bf16.msra.mxu1 %v12188_v16  ;;  %7321 = vmatprep.subr.bf16.mxu0 %v12193_v15  ;;  %v12242_v16 = vld [vmem:[#allocation11 + $0x150] ss:$8 sps:$4 sm:$0xff]  }
 0x492   :  { %8503 = vmatprep.subr.bf16.mxu1 %v12196_v52  ;;  %v12247_v15 = vld [vmem:[#allocation8 + $0x12e4] ss:$28 sps:$4 sm:$0xff]   ;;  %v12250_v52 = vld [vmem:[#allocation11 + $0x164] ss:$8 sps:$4 sm:$0xff]  }
 0x493   :  { %v10740_v24 = vpop.f32.mrb[36].mxu1 }
 0x494   :  { %v10741_v27 = vpop.f32.mrb[37].mxu1  ;;  %7322 = vmatpush1.bf16.msra.mxu0 %v12191_v25 }
 0x495   :  { %v10742_v33 = vadd.f32 %v10741_v27, %v10740_v24  ;;  %v10743_v57 = vpop.f32.mrb[38].mxu1  ;;  %8504 = vmatpush1.bf16.msra.mxu1 %v12194_v1  ;;  %7323 = vmatprep.subr.bf16.mxu0 %v12199_v2  ;;  %v12245_v2 = vld [vmem:[#allocation8 + $0x12e0] ss:$28 sps:$4 sm:$0xff]   ;;  %v12248_v24 = vld [vmem:[#allocation11 + $0x160] ss:$8 sps:$4 sm:$0xff]  }
 0x496   :  { %v10744_v39 = vpop.f32.mrb[39].mxu1  ;;  %8505 = vmatprep.subr.bf16.mxu1 %v12202_v23  ;;  %v12251_v57 = vld [vmem:[#allocation8 + $0x1318] ss:$28 sps:$4 sm:$0xff]  }
 0x497   :  { %v13315_v42 = vadd.f32 %v10742_v33, %v13307_v56  ;;  %v12217_v56 = vld [vmem:[#allocation8 + $0x11cc] ss:$28 sps:$4 sm:$0xff]  }
 0x498   :  { %7324 = vmatpush1.bf16.msra.mxu0 %v12197_v32  ;;  %v12256_v32 = vld [vmem:[#allocation11 + $0x174] ss:$8 sps:$4 sm:$0xff]   ;;  %v12257_v39 = vld [vmem:[#allocation8 + $0x1350] ss:$28 sps:$4 sm:$0xff]  }
 0x499   :  { %8506 = vmatpush1.bf16.msra.mxu1 %v12200_v17  ;;  %7325 = vmatprep.subr.bf16.mxu0 %v12205_v28  ;;  %v12254_v17 = vld [vmem:[#allocation11 + $0x170] ss:$8 sps:$4 sm:$0xff]   ;;  %v12259_v28 = vld [vmem:[#allocation8 + $0x1354] ss:$28 sps:$4 sm:$0xff]  }
 0x49a   :  { %8507 = vmatprep.subr.bf16.mxu1 %v12208_v40  ;;  %v12260_v40 = vld [vmem:[#allocation11 + $0x180] ss:$8 sps:$4 sm:$0xff]  }
 0x49c   :  { %7326 = vmatpush1.bf16.msra.mxu0 %v12203_v49  ;;  %v12268_v49 = vld [vmem:[#allocation11 + $0x194] ss:$8 sps:$4 sm:$0xff]  }
 0x49d   :  { %8508 = vmatpush1.bf16.msra.mxu1 %v12206_v34  ;;  %7336 = vmatprep.subr.bf16.mxu0 %v12211_v63  ;;  %v12263_v34 = vld [vmem:[#allocation8 + $0x1388] ss:$28 sps:$4 sm:$0xff]  }
 0x49e   :  { %8518 = vmatprep.subr.bf16.mxu1 %v12214_v58  ;;  %v12271_v63 = vld [vmem:[#allocation8 + $0x13c4] ss:$28 sps:$4 sm:$0xff]  }
 0x49f   :  { %7328 = vmatmul.mubr.bf16.vlgmr.msra.gmra.mrb[12].mxu0 %v13214_v30  ;;  %v12229_v30 = vld [vmem:[#allocation8 + $0x123c] ss:$28 sps:$4 sm:$0xff]  }
 0x4a0   :  { %8510 = vmatmul.mubr.bf16.vlgmr.msra.gmra.mrb[60].mxu1 %v7786_v43  ;;  %7337 = vmatpush1.bf16.msra.mxu0 %v12209_v47  ;;  %v12269_v58 = vld [vmem:[#allocation8 + $0x13c0] ss:$28 sps:$4 sm:$0xff]   ;;  %v12275_v43 = vld [vmem:[#allocation8 + $0x13f8] ss:$28 sps:$4 sm:$0xff]  }
 0x4a1   :  { %7368 = vmatprep.mubr.bf16.mxu0 %v13216_v22  ;;  %8519 = vmatpush1.bf16.msra.mxu1 %v12212_v62  ;;  %v12230_v22 = vld [vmem:[#allocation11 + $0x130] ss:$8 sps:$4 sm:$0xff]   ;;  %v12280_v62 = vld [vmem:[#allocation11 + $0x1b4] ss:$8 sps:$4 sm:$0xff]  }
 0x4a2   :  { %8550 = vmatprep.mubr.bf16.mxu1 %v7789_v3  ;;  %7338 = vmatprep.subr.bf16.mxu0 %v12217_v56  ;;  %v12277_v47 = vld [vmem:[#allocation8 + $0x13fc] ss:$28 sps:$4 sm:$0xff]   ;;  %v12286_v3 = vld [vmem:[#allocation11 + $0x1c4] ss:$8 sps:$4 sm:$0xff]  }
 0x4a3   :  { %8520 = vmatprep.subr.bf16.mxu1 %v12220_v51  ;;  %v12278_v56 = vld [vmem:[#allocation11 + $0x1b0] ss:$8 sps:$4 sm:$0xff]   ;;  %v12283_v51 = vld [vmem:[#allocation8 + $0x1434] ss:$28 sps:$4 sm:$0xff]  }
 0x4a4   :  { %7339 = vmatpush1.bf16.msra.mxu0 %v12215_v4  ;;  %v12281_v4 = vld [vmem:[#allocation8 + $0x1430] ss:$28 sps:$4 sm:$0xff]  }
 0x4a5   :  { %8521 = vmatpush1.bf16.msra.mxu1 %v12218_v8  ;;  %7340 = vmatprep.subr.bf16.mxu0 %v12223_v14  ;;  %v12284_v8 = vld [vmem:[#allocation11 + $0x1c0] ss:$8 sps:$4 sm:$0xff]  }
 0x4a6   :  { %8522 = vmatprep.subr.bf16.mxu1 %v12226_v29  ;;  %v12289_v14 = vld [vmem:[#allocation8 + $0x146c] ss:$28 sps:$4 sm:$0xff]   ;;  %v12292_v29 = vld [vmem:[#allocation11 + $0x1d4] ss:$8 sps:$4 sm:$0xff]  }
 0x4a8   :  { %7341 = vmatpush1.bf16.msra.mxu0 %v12221_v10  ;;  %v12287_v10 = vld [vmem:[#allocation8 + $0x1468] ss:$28 sps:$4 sm:$0xff]  }
 0x4a9   :  { %8523 = vmatpush1.bf16.msra.mxu1 %v12224_v5  ;;  %7342 = vmatprep.subr.bf16.mxu0 %v12229_v30  ;;  %v12290_v5 = vld [vmem:[#allocation11 + $0x1d0] ss:$8 sps:$4 sm:$0xff]  }
 0x4aa   :  { %8524 = vmatprep.subr.bf16.mxu1 %v12232_v19  ;;  %v12295_v30 = vld [vmem:[#allocation8 + $0x14a4] ss:$28 sps:$4 sm:$0xff]   ;;  %v1843_v19 = vrot.slane %v13294_v54, %v13141_v38  ;;  %v12299_v54 = vld [vmem:[#allocation8 + $0x14d8] ss:$28 sps:$4 sm:$0xff]  }
 0x4ac   :  { %7343 = vmatpush1.bf16.msra.mxu0 %v12227_v50  ;;  %v12298_v50 = vld [vmem:[#allocation11 + $0x1e4] ss:$8 sps:$4 sm:$0xff]  }
 0x4ad   :  { %8525 = vmatpush1.bf16.msra.mxu1 %v12230_v22  ;;  %7344 = vmatprep.subr.bf16.mxu0 %v12235_v61 }
 0x4ae   :  { %8526 = vmatprep.subr.bf16.mxu1 %v12238_v31  ;;  %v12293_v31 = vld [vmem:[#allocation8 + $0x14a0] ss:$28 sps:$4 sm:$0xff]  }
 0x4b0   :  { %7345 = vmatpush1.bf16.msra.mxu0 %v12233_v6 }
 0x4b1   :  { %8527 = vmatpush1.bf16.msra.mxu1 %v12236_v26  ;;  %7346 = vmatprep.subr.bf16.mxu0 %v12241_v12  ;;  %v12296_v12 = vld [vmem:[#allocation11 + $0x1e0] ss:$8 sps:$4 sm:$0xff]  }
 0x4b2   :  { %8528 = vmatprep.subr.bf16.mxu1 %v12244_v36  ;;  %v12301_v36 = vld [vmem:[#allocation8 + $0x14dc] ss:$28 sps:$4 sm:$0xff]  }
 0x4b3   :  { %v10762_v25 = vpop.f32.mrb[40].mxu1 }
 0x4b4   :  { %v10763_v1 = vpop.f32.mrb[41].mxu1  ;;  %7347 = vmatpush1.bf16.msra.mxu0 %v12239_v13  ;;  %v10902_v13 = vadd.f32 %v13286_v46, %v1843_v19  ;;  %v12331_v19 = vld [vmem:[#allocation8 + $0x16d4] ss:$28 sps:$4 sm:$0xff]  }
 0x4b5   :  { %v10764_v45 = vadd.f32 %v10763_v1, %v10762_v25  ;;  %v10765_v23 = vpop.f32.mrb[42].mxu1  ;;  %8529 = vmatpush1.bf16.msra.mxu1 %v12242_v16  ;;  %7348 = vmatprep.subr.bf16.mxu0 %v12247_v15  ;;  %v12304_v15 = vld [vmem:[#allocation11 + $0x1f4] ss:$8 sps:$4 sm:$0xff]   ;;  %v12302_v25 = vld [vmem:[#allocation11 + $0x1f0] ss:$8 sps:$4 sm:$0xff]  }
 0x4b6   :  { %v10766_v27 = vpop.f32.mrb[43].mxu1  ;;  %8530 = vmatprep.subr.bf16.mxu1 %v12250_v52  ;;  %v12307_v1 = vld [vmem:[#allocation8 + $0x1514] ss:$28 sps:$4 sm:$0xff]   ;;  %v12310_v23 = vld [vmem:[#allocation8 + $0x154c] ss:$28 sps:$4 sm:$0xff]  }
 0x4b7   :  { %v13321_v33 = vadd.f32 %v10764_v45, %v13315_v42  ;;  %v12266_v42 = vld [vmem:[#allocation11 + $0x190] ss:$8 sps:$4 sm:$0xff]   ;;  %v12305_v45 = vld [vmem:[#allocation8 + $0x1510] ss:$28 sps:$4 sm:$0xff]   ;;  %v12308_v27 = vld [vmem:[#allocation8 + $0x1548] ss:$28 sps:$4 sm:$0xff]  }
 0x4b8   :  { %7349 = vmatpush1.bf16.msra.mxu0 %v12245_v2  ;;  %v7781_v2 = vmax.f32 %v10902_v13, 0.0  ;;  %v12428_v13 = vld [vmem:[#allocation11 + $0x290] ss:$8 sps:$4 sm:$0xff]  }
 0x4b9   :  { %8531 = vmatpush1.bf16.msra.mxu1 %v12248_v24  ;;  %7350 = vmatprep.subr.bf16.mxu0 %v12253_v53  ;;  %v12401_v24 = vld [vmem:[#allocation11 + $0x200] ss:$8 sps:$4 sm:$0xff]   ;;  %v12403_v53 = vld [vmem:[#allocation11 + $0x204] ss:$8 sps:$4 sm:$0xff]  }
 0x4ba   :  { %8532 = vmatprep.subr.bf16.mxu1 %v12256_v32  ;;  %v7788_v46 = vpack.c.bf16 %v7781_v2, %v7781_v2  ;;  %v12406_v32 = vld [vmem:[#allocation11 + $0x214] ss:$8 sps:$4 sm:$0xff]   ;;  %v12343_v2 = vld [vmem:[#allocation8 + $0x17b4] ss:$28 sps:$4 sm:$0xff]  }
 0x4bc   :  { %7351 = vmatpush1.bf16.msra.mxu0 %v12251_v57  ;;  %v12404_v57 = vld [vmem:[#allocation11 + $0x210] ss:$8 sps:$4 sm:$0xff]  }
 0x4bd   :  { %8533 = vmatpush1.bf16.msra.mxu1 %v12254_v17  ;;  %7352 = vmatprep.subr.bf16.mxu0 %v12259_v28  ;;  %v12311_v17 = vld [vmem:[#allocation8 + $0x1580] ss:$28 sps:$4 sm:$0xff]   ;;  %v12409_v28 = vld [vmem:[#allocation11 + $0x224] ss:$8 sps:$4 sm:$0xff]  }
 0x4be   :  { %8534 = vmatprep.subr.bf16.mxu1 %v12262_v35  ;;  %v12316_v35 = vld [vmem:[#allocation8 + $0x15bc] ss:$28 sps:$4 sm:$0xff]  }
 0x4c0   :  { %7353 = vmatpush1.bf16.msra.mxu0 %v12257_v39  ;;  %v12314_v39 = vld [vmem:[#allocation8 + $0x15b8] ss:$28 sps:$4 sm:$0xff]  }
 0x4c1   :  { %8535 = vmatpush1.bf16.msra.mxu1 %v12260_v40  ;;  %7354 = vmatprep.subr.bf16.mxu0 %v12265_v41  ;;  %v12412_v40 = vld [vmem:[#allocation11 + $0x234] ss:$8 sps:$4 sm:$0xff]   ;;  %v12319_v41 = vld [vmem:[#allocation8 + $0x15f4] ss:$28 sps:$4 sm:$0xff]  }
 0x4c2   :  { %8536 = vmatprep.subr.bf16.mxu1 %v12268_v49  ;;  %v12317_v49 = vld [vmem:[#allocation8 + $0x15f0] ss:$28 sps:$4 sm:$0xff]  }
 0x4c4   :  { %7355 = vmatpush1.bf16.msra.mxu0 %v12263_v34  ;;  %v12415_v34 = vld [vmem:[#allocation11 + $0x244] ss:$8 sps:$4 sm:$0xff]  }
 0x4c5   :  { %8537 = vmatpush1.bf16.msra.mxu1 %v12266_v42  ;;  %7356 = vmatprep.subr.bf16.mxu0 %v12271_v63  ;;  %v12322_v42 = vld [vmem:[#allocation8 + $0x162c] ss:$28 sps:$4 sm:$0xff]  }
 0x4c6   :  { %8538 = vmatprep.subr.bf16.mxu1 %v12274_v59  ;;  %v12413_v63 = vld [vmem:[#allocation11 + $0x240] ss:$8 sps:$4 sm:$0xff]  }
 0x4c7   :  { %v12320_v59 = vld [vmem:[#allocation8 + $0x1628] ss:$28 sps:$4 sm:$0xff]  }
 0x4c8   :  { %7357 = vmatpush1.bf16.msra.mxu0 %v12269_v58  ;;  %v12418_v58 = vld [vmem:[#allocation11 + $0x254] ss:$8 sps:$4 sm:$0xff]  }
 0x4c9   :  { %8539 = vmatpush1.bf16.msra.mxu1 %v12272_v60  ;;  %7358 = vmatprep.subr.bf16.mxu0 %v12277_v47  ;;  %v12325_v60 = vld [vmem:[#allocation8 + $0x1664] ss:$28 sps:$4 sm:$0xff]  }
 0x4ca   :  { %8540 = vmatprep.subr.bf16.mxu1 %v12280_v62  ;;  %v12416_v62 = vld [vmem:[#allocation11 + $0x250] ss:$8 sps:$4 sm:$0xff]  }
 0x4cc   :  { %7359 = vmatpush1.bf16.msra.mxu0 %v12275_v43 }
 0x4cd   :  { %8541 = vmatpush1.bf16.msra.mxu1 %v12278_v56  ;;  %7360 = vmatprep.subr.bf16.mxu0 %v12283_v51  ;;  %v12323_v56 = vld [vmem:[#allocation8 + $0x1660] ss:$28 sps:$4 sm:$0xff]   ;;  %v12421_v51 = vld [vmem:[#allocation11 + $0x264] ss:$8 sps:$4 sm:$0xff]  }
 0x4ce   :  { %8542 = vmatprep.subr.bf16.mxu1 %v12286_v3 }
 0x4d0   :  { %7361 = vmatpush1.bf16.msra.mxu0 %v12281_v4 }
 0x4d1   :  { %8543 = vmatpush1.bf16.msra.mxu1 %v12284_v8  ;;  %7362 = vmatprep.subr.bf16.mxu0 %v12289_v14  ;;  %v12328_v8 = vld [vmem:[#allocation8 + $0x169c] ss:$28 sps:$4 sm:$0xff]  }
 0x4d2   :  { %8544 = vmatprep.subr.bf16.mxu1 %v12292_v29 }
 0x4d3   :  { %v10784_v22 = vpop.f32.mrb[44].mxu1 }
 0x4d4   :  { %v10785_v61 = vpop.f32.mrb[45].mxu1  ;;  %7363 = vmatpush1.bf16.msra.mxu0 %v12287_v10  ;;  %v12419_v10 = vld [vmem:[#allocation11 + $0x260] ss:$8 sps:$4 sm:$0xff]  }
 0x4d5   :  { %v10786_v6 = vadd.f32 %v10785_v61, %v10784_v22  ;;  %v10787_v26 = vpop.f32.mrb[46].mxu1  ;;  %8545 = vmatpush1.bf16.msra.mxu1 %v12290_v5  ;;  %7364 = vmatprep.subr.bf16.mxu0 %v12295_v30  ;;  %v12326_v5 = vld [vmem:[#allocation8 + $0x1698] ss:$28 sps:$4 sm:$0xff]   ;;  %v12424_v30 = vld [vmem:[#allocation11 + $0x274] ss:$8 sps:$4 sm:$0xff]  }
 0x4d6   :  { %v10788_v16 = vpop.f32.mrb[47].mxu1  ;;  %8546 = vmatprep.subr.bf16.mxu1 %v12298_v50  ;;  %v12422_v50 = vld [vmem:[#allocation11 + $0x270] ss:$8 sps:$4 sm:$0xff]   ;;  %v12329_v22 = vld [vmem:[#allocation8 + $0x16d0] ss:$28 sps:$4 sm:$0xff]  }
 0x4d7   :  { %v13327_v52 = vadd.f32 %v10786_v6, %v13321_v33  ;;  %v12313_v33 = vld [vmem:[#allocation8 + $0x1584] ss:$28 sps:$4 sm:$0xff]   ;;  %v12427_v61 = vld [vmem:[#allocation11 + $0x284] ss:$8 sps:$4 sm:$0xff]   ;;  %v12425_v6 = vld [vmem:[#allocation11 + $0x280] ss:$8 sps:$4 sm:$0xff]  }
 0x4d8   :  { %7365 = vmatpush1.bf16.msra.mxu0 %v12293_v31  ;;  %v12334_v31 = vld [vmem:[#allocation8 + $0x170c] ss:$28 sps:$4 sm:$0xff]   ;;  %v12335_v16 = vld [vmem:[#allocation8 + $0x1740] ss:$28 sps:$4 sm:$0xff]  }
 0x4d9   :  { %8547 = vmatpush1.bf16.msra.mxu1 %v12296_v12  ;;  %7366 = vmatprep.subr.bf16.mxu0 %v12301_v36  ;;  %v12332_v26 = vld [vmem:[#allocation8 + $0x1708] ss:$28 sps:$4 sm:$0xff]  }
 0x4da   :  { %8548 = vmatprep.subr.bf16.mxu1 %v12304_v15  ;;  %v12430_v12 = vld [vmem:[#allocation11 + $0x294] ss:$8 sps:$4 sm:$0xff]   ;;  %v12433_v15 = vld [vmem:[#allocation11 + $0x2a4] ss:$8 sps:$4 sm:$0xff]  }
 0x4db   :  { %v12337_v36 = vld [vmem:[#allocation8 + $0x1744] ss:$28 sps:$4 sm:$0xff]  }
 0x4dc   :  { %7367 = vmatpush1.bf16.msra.mxu0 %v12299_v54  ;;  %v12431_v54 = vld [vmem:[#allocation11 + $0x2a0] ss:$8 sps:$4 sm:$0xff]  }
 0x4dd   :  { %8549 = vmatpush1.bf16.msra.mxu1 %v12302_v25  ;;  %7377 = vmatprep.subr.bf16.mxu0 %v12307_v1  ;;  %v12338_v25 = vld [vmem:[#allocation8 + $0x1778] ss:$28 sps:$4 sm:$0xff]   ;;  %v12436_v1 = vld [vmem:[#allocation11 + $0x2b4] ss:$8 sps:$4 sm:$0xff]  }
 0x4de   :  { %8559 = vmatprep.subr.bf16.mxu1 %v12403_v53  ;;  %v12437_v53 = vld [vmem:[#allocation11 + $0x2c0] ss:$8 sps:$4 sm:$0xff]  }
 0x4df   :  { %7369 = vmatmul.mubr.bf16.vlgmr.msra.gmra.mrb[12].mxu0 %v13234_v48  ;;  %v12407_v48 = vld [vmem:[#allocation11 + $0x220] ss:$8 sps:$4 sm:$0xff]  }
 0x4e0   :  { %8551 = vmatmul.mubr.bf16.vlgmr.msra.gmra.mrb[60].mxu1 %v7788_v46  ;;  %7378 = vmatpush1.bf16.msra.mxu0 %v12305_v45  ;;  %v12434_v45 = vld [vmem:[#allocation11 + $0x2b0] ss:$8 sps:$4 sm:$0xff]   ;;  %v12439_v46 = vld [vmem:[#allocation11 + $0x2c4] ss:$8 sps:$4 sm:$0xff]  }
 0x4e1   :  { %7409 = vmatprep.mubr.bf16.mxu0 %v13236_v21  ;;  %7379 = vmatprep.subr.bf16.mxu0 %v12310_v23  ;;  %v12410_v21 = vld [vmem:[#allocation11 + $0x230] ss:$8 sps:$4 sm:$0xff]   ;;  %v12341_v23 = vld [vmem:[#allocation8 + $0x17b0] ss:$28 sps:$4 sm:$0xff]  }
 0x4e2   :  { %8560 = vmatpush1.bf16.msra.mxu1 %v12401_v24  ;;  %v12346_v24 = vld [vmem:[#allocation8 + $0x17ec] ss:$28 sps:$4 sm:$0xff]  }
 0x4e3   :  { %8561 = vmatprep.subr.bf16.mxu1 %v12406_v32  ;;  %v12442_v32 = vld [vmem:[#allocation11 + $0x2d4] ss:$8 sps:$4 sm:$0xff]  }
 0x4e4   :  { %7380 = vmatpush1.bf16.msra.mxu0 %v12308_v27  ;;  %v12344_v27 = vld [vmem:[#allocation8 + $0x17e8] ss:$28 sps:$4 sm:$0xff]  }
 0x4e5   :  { %7381 = vmatprep.subr.bf16.mxu0 %v12313_v33  ;;  %v12349_v33 = vld [vmem:[#allocation8 + $0x1824] ss:$28 sps:$4 sm:$0xff]  }
 0x4e6   :  { %8562 = vmatpush1.bf16.msra.mxu1 %v12404_v57 }
 0x4e7   :  { %8563 = vmatprep.subr.bf16.mxu1 %v12409_v28 }
 0x4e8   :  { %7382 = vmatpush1.bf16.msra.mxu0 %v12311_v17  ;;  %v12440_v17 = vld [vmem:[#allocation11 + $0x2d0] ss:$8 sps:$4 sm:$0xff]  }
 0x4e9   :  { %7383 = vmatprep.subr.bf16.mxu0 %v12316_v35  ;;  %v12347_v35 = vld [vmem:[#allocation8 + $0x1820] ss:$28 sps:$4 sm:$0xff]  }
 0x4ea   :  { %8564 = vmatpush1.bf16.msra.mxu1 %v12407_v48 }
 0x4eb   :  { %8565 = vmatprep.subr.bf16.mxu1 %v12412_v40  ;;  %v12352_v40 = vld [vmem:[#allocation8 + $0x185c] ss:$28 sps:$4 sm:$0xff]  }
 0x4ec   :  { %7384 = vmatpush1.bf16.msra.mxu0 %v12314_v39 }
 0x4ed   :  { %7385 = vmatprep.subr.bf16.mxu0 %v12319_v41 }
 0x4ee   :  { %8566 = vmatpush1.bf16.msra.mxu1 %v12410_v21 }
 0x4ef   :  { %8567 = vmatprep.subr.bf16.mxu1 %v12415_v34  ;;  %v12355_v34 = vld [vmem:[#allocation8 + $0x1894] ss:$28 sps:$4 sm:$0xff]  }
 0x4f0   :  { %7386 = vmatpush1.bf16.msra.mxu0 %v12317_v49  ;;  %v12350_v49 = vld [vmem:[#allocation8 + $0x1858] ss:$28 sps:$4 sm:$0xff]  }
 0x4f1   :  { %7387 = vmatprep.subr.bf16.mxu0 %v12322_v42  ;;  %v12353_v42 = vld [vmem:[#allocation8 + $0x1890] ss:$28 sps:$4 sm:$0xff]  }
 0x4f2   :  { %8568 = vmatpush1.bf16.msra.mxu1 %v12413_v63  ;;  %v12358_v63 = vld [vmem:[#allocation8 + $0x18cc] ss:$28 sps:$4 sm:$0xff]  }
 0x4f3   :  { %v10806_v47 = vpop.f32.mrb[48].mxu1  ;;  %8569 = vmatprep.subr.bf16.mxu1 %v12418_v58  ;;  %v12361_v58 = vld [vmem:[#allocation8 + $0x1904] ss:$28 sps:$4 sm:$0xff]  }
 0x4f4   :  { %v10807_v43 = vpop.f32.mrb[49].mxu1  ;;  %7388 = vmatpush1.bf16.msra.mxu0 %v12320_v59  ;;  %v12356_v59 = vld [vmem:[#allocation8 + $0x18c8] ss:$28 sps:$4 sm:$0xff]  }
 0x4f5   :  { %v10808_v3 = vadd.f32 %v10807_v43, %v10806_v47  ;;  %v10809_v4 = vpop.f32.mrb[50].mxu1  ;;  %7389 = vmatprep.subr.bf16.mxu0 %v12325_v60  ;;  %v12359_v60 = vld [vmem:[#allocation8 + $0x1900] ss:$28 sps:$4 sm:$0xff]   ;;  %v12367_v43 = vld [vmem:[#allocation8 + $0x1974] ss:$28 sps:$4 sm:$0xff]  }
 0x4f6   :  { %v10810_v14 = vpop.f32.mrb[51].mxu1  ;;  %8570 = vmatpush1.bf16.msra.mxu1 %v12416_v62  ;;  %v12364_v47 = vld [vmem:[#allocation8 + $0x193c] ss:$28 sps:$4 sm:$0xff]  }
 0x4f7   :  { %v13332_v29 = vadd.f32 %v10808_v3, %v13327_v52  ;;  %8571 = vmatprep.subr.bf16.mxu1 %v12421_v51  ;;  %v12340_v52 = vld [vmem:[#allocation8 + $0x177c] ss:$28 sps:$4 sm:$0xff]   ;;  %v12370_v51 = vld [vmem:[#allocation8 + $0x19ac] ss:$28 sps:$4 sm:$0xff]   ;;  %v12373_v3 = vld [vmem:[#allocation8 + $0x19e4] ss:$28 sps:$4 sm:$0xff]  }
 0x4f8   :  { %7390 = vmatpush1.bf16.msra.mxu0 %v12323_v56  ;;  %v12362_v62 = vld [vmem:[#allocation8 + $0x1938] ss:$28 sps:$4 sm:$0xff]   ;;  %v12365_v56 = vld [vmem:[#allocation8 + $0x1970] ss:$28 sps:$4 sm:$0xff]  }
 0x4f9   :  { %7391 = vmatprep.subr.bf16.mxu0 %v12328_v8  ;;  %v12371_v8 = vld [vmem:[#allocation8 + $0x19e0] ss:$28 sps:$4 sm:$0xff]  }
 0x4fa   :  { %8572 = vmatpush1.bf16.msra.mxu1 %v12419_v10  ;;  %v12376_v10 = vld [vmem:[#allocation8 + $0x1a1c] ss:$28 sps:$4 sm:$0xff]  }
 0x4fb   :  { %8573 = vmatprep.subr.bf16.mxu1 %v12424_v30 }
 0x4fc   :  { %7392 = vmatpush1.bf16.msra.mxu0 %v12326_v5 }
 0x4fd   :  { %7393 = vmatprep.subr.bf16.mxu0 %v12331_v19  ;;  %v12374_v19 = vld [vmem:[#allocation8 + $0x1a18] ss:$28 sps:$4 sm:$0xff]  }
 0x4fe   :  { %8574 = vmatpush1.bf16.msra.mxu1 %v12422_v50  ;;  %v12379_v50 = vld [vmem:[#allocation8 + $0x1a54] ss:$28 sps:$4 sm:$0xff]  }
 0x4ff   :  { %8575 = vmatprep.subr.bf16.mxu1 %v12427_v61  ;;  %v12382_v61 = vld [vmem:[#allocation8 + $0x1a8c] ss:$28 sps:$4 sm:$0xff]  }
 0x500   :  { %7394 = vmatpush1.bf16.msra.mxu0 %v12329_v22  ;;  %v12377_v22 = vld [vmem:[#allocation8 + $0x1a50] ss:$28 sps:$4 sm:$0xff]  }
 0x501   :  { %7395 = vmatprep.subr.bf16.mxu0 %v12334_v31  ;;  %v12380_v31 = vld [vmem:[#allocation8 + $0x1a88] ss:$28 sps:$4 sm:$0xff]  }
 0x502   :  { %8576 = vmatpush1.bf16.msra.mxu1 %v12425_v6  ;;  %v12385_v6 = vld [vmem:[#allocation8 + $0x1ac4] ss:$28 sps:$4 sm:$0xff]  }
 0x503   :  { %8577 = vmatprep.subr.bf16.mxu1 %v12430_v12  ;;  %v12388_v12 = vld [vmem:[#allocation8 + $0x1afc] ss:$28 sps:$4 sm:$0xff]  }
 0x504   :  { %7396 = vmatpush1.bf16.msra.mxu0 %v12332_v26  ;;  %v12383_v26 = vld [vmem:[#allocation8 + $0x1ac0] ss:$28 sps:$4 sm:$0xff]  }
 0x505   :  { %7397 = vmatprep.subr.bf16.mxu0 %v12337_v36  ;;  %v12386_v36 = vld [vmem:[#allocation8 + $0x1af8] ss:$28 sps:$4 sm:$0xff]  }
 0x506   :  { %8578 = vmatpush1.bf16.msra.mxu1 %v12428_v13  ;;  %v12391_v13 = vld [vmem:[#allocation8 + $0x1b34] ss:$28 sps:$4 sm:$0xff]  }
 0x507   :  { %8579 = vmatprep.subr.bf16.mxu1 %v12433_v15  ;;  %v12394_v15 = vld [vmem:[#allocation8 + $0x1b6c] ss:$28 sps:$4 sm:$0xff]  }
 0x508   :  { %7398 = vmatpush1.bf16.msra.mxu0 %v12335_v16  ;;  %v12389_v16 = vld [vmem:[#allocation8 + $0x1b30] ss:$28 sps:$4 sm:$0xff]  }
 0x509   :  { %7399 = vmatprep.subr.bf16.mxu0 %v12340_v52  ;;  %v12392_v52 = vld [vmem:[#allocation8 + $0x1b68] ss:$28 sps:$4 sm:$0xff]  }
 0x50a   :  { %8580 = vmatpush1.bf16.msra.mxu1 %v12431_v54  ;;  %v12397_v54 = vld [vmem:[#allocation8 + $0x1ba4] ss:$28 sps:$4 sm:$0xff]  }
 0x50b   :  { %8581 = vmatprep.subr.bf16.mxu1 %v12436_v1  ;;  %v12400_v1 = vld [vmem:[#allocation8 + $0x1bdc] ss:$28 sps:$4 sm:$0xff]  }
 0x50c   :  { %7400 = vmatpush1.bf16.msra.mxu0 %v12338_v25  ;;  %v12395_v25 = vld [vmem:[#allocation8 + $0x1ba0] ss:$28 sps:$4 sm:$0xff]  }
 0x50d   :  { %7401 = vmatprep.subr.bf16.mxu0 %v12343_v2  ;;  %v12398_v2 = vld [vmem:[#allocation8 + $0x1bd8] ss:$28 sps:$4 sm:$0xff]  }
 0x50e   :  { %8582 = vmatpush1.bf16.msra.mxu1 %v12434_v45  ;;  %v12445_v45 = vld [vmem:[#allocation11 + $0x2e4] ss:$8 sps:$4 sm:$0xff]  }
 0x50f   :  { %8583 = vmatprep.subr.bf16.mxu1 %v12439_v46  ;;  %v12448_v46 = vld [vmem:[#allocation11 + $0x2f4] ss:$8 sps:$4 sm:$0xff]  }
 0x510   :  { %7402 = vmatpush1.bf16.msra.mxu0 %v12341_v23  ;;  %v12443_v23 = vld [vmem:[#allocation11 + $0x2e0] ss:$8 sps:$4 sm:$0xff]  }
 0x511   :  { %7403 = vmatprep.subr.bf16.mxu0 %v12346_v24  ;;  %v12446_v24 = vld [vmem:[#allocation11 + $0x2f0] ss:$8 sps:$4 sm:$0xff]  }
 0x512   :  { %8584 = vmatpush1.bf16.msra.mxu1 %v12437_v53  ;;  %v12451_v53 = vld [vmem:[#allocation11 + $0x304] ss:$8 sps:$4 sm:$0xff]  }
 0x513   :  { %v10828_v57 = vpop.f32.mrb[52].mxu1  ;;  %8585 = vmatprep.subr.bf16.mxu1 %v12442_v32  ;;  %v12478_v32 = vld [vmem:[#allocation14 + $0xc] ss:$16 sps:$4 sm:$0xff]  }
 0x514   :  { %v10829_v28 = vpop.f32.mrb[53].mxu1  ;;  %7404 = vmatpush1.bf16.msra.mxu0 %v12344_v27  ;;  %v12476_v27 = vld [vmem:[#allocation14 + $0x8] ss:$16 sps:$4 sm:$0xff]  }
 0x515   :  { %v10830_v48 = vadd.f32 %v10829_v28, %v10828_v57  ;;  %v10831_v39 = vpop.f32.mrb[54].mxu1  ;;  %7405 = vmatprep.subr.bf16.mxu0 %v12349_v33  ;;  %v12484_v33 = vld [vmem:[#allocation14 + $0x2c] ss:$16 sps:$4 sm:$0xff]   ;;  %v12482_v57 = vld [vmem:[#allocation14 + $0x28] ss:$16 sps:$4 sm:$0xff]  }
 0x516   :  { %v10832_v41 = vpop.f32.mrb[55].mxu1  ;;  %8586 = vmatpush1.bf16.msra.mxu1 %v12440_v17  ;;  %v12490_v17 = vld [vmem:[#allocation14 + $0x4c] ss:$16 sps:$4 sm:$0xff]   ;;  %v12500_v39 = vld [vmem:[#allocation14 + $0x88] ss:$16 sps:$4 sm:$0xff]  }
 0x517   :  { %v7734_v21 = vadd.f32 %v10830_v48, %v13332_v29  ;;  %8587 = vmatprep.subr.bf16.mxu1 %v12445_v45  ;;  %v12496_v28 = vld [vmem:[#allocation14 + $0x6c] ss:$16 sps:$4 sm:$0xff]   ;;  %v12506_v41 = vld [vmem:[#allocation14 + $0xa8] ss:$16 sps:$4 sm:$0xff]  }
 0x518   :  { %7406 = vmatpush1.bf16.msra.mxu0 %v12347_v35  ;;  %v12494_v35 = vld [vmem:[#allocation14 + $0x68] ss:$16 sps:$4 sm:$0xff]   ;;  %v12502_v48 = vld [vmem:[#allocation14 + $0x8c] ss:$16 sps:$4 sm:$0xff]  }
 0x519   :  { %7407 = vmatprep.subr.bf16.mxu0 %v12352_v40  ;;  %v12508_v40 = vld [vmem:[#allocation14 + $0xac] ss:$16 sps:$4 sm:$0xff]  }
 0x51a   :  { %8588 = vmatpush1.bf16.msra.mxu1 %v12443_v23  ;;  %v12472_v45 = vld [vmem:[#allocation11 + $0x374] ss:$8 sps:$4 sm:$0xff]   ;;  %v12470_v23 = vld [vmem:[#allocation11 + $0x370] ss:$8 sps:$4 sm:$0xff]  }
 0x51b   :  { %8589 = vmatprep.subr.bf16.mxu1 %v12448_v46 }
 0x51c   :  { %7408 = vmatpush1.bf16.msra.mxu0 %v12350_v49  ;;  %v12512_v49 = vld [vmem:[#allocation14 + $0xc8] ss:$16 sps:$4 sm:$0xff]  }
 0x51d   :  { %7418 = vmatprep.subr.bf16.mxu0 %v12355_v34  ;;  %v12520_v34 = vld [vmem:[#allocation14 + $0xec] ss:$16 sps:$4 sm:$0xff]  }
 0x51e   :  { %8590 = vmatpush1.bf16.msra.mxu1 %v12446_v24  ;;  %v12475_v24 = vld [vmem:[#allocation14 + $0x4] ss:$16 sps:$4 sm:$0xff]  }
 0x51f   :  { %7410 = vmatmul.mubr.bf16.vlgmr.msra.gmra.mrb[12].mxu0 %v13249_v7  ;;  %v12368_v7 = vld [vmem:[#allocation8 + $0x19a8] ss:$28 sps:$4 sm:$0xff]   ;;  %8600 = vmatprep.subr.bf16.mxu1 %v12451_v53 }
 0x520   :  { %7419 = vmatpush1.bf16.msra.mxu0 %v12353_v42  ;;  %7450 = vmatprep.mubr.bf16.mxu0 %v13251_v37  ;;  %v12518_v42 = vld [vmem:[#allocation14 + $0xe8] ss:$16 sps:$4 sm:$0xff]   ;;  %v12473_v53 = vld [vmem:[#allocation14] ss:$16 sps:$4 sm:$0xff]  }
 0x521   :  { %7420 = vmatprep.subr.bf16.mxu0 %v12358_v63  ;;  %v12526_v63 = vld [vmem:[#allocation14 + $0x10c] ss:$16 sps:$4 sm:$0xff]  }
 0x524   :  { %7421 = vmatpush1.bf16.msra.mxu0 %v12356_v59  ;;  %v12524_v59 = vld [vmem:[#allocation14 + $0x108] ss:$16 sps:$4 sm:$0xff]  }
 0x525   :  { %7422 = vmatprep.subr.bf16.mxu0 %v12361_v58  ;;  %v12532_v58 = vld [vmem:[#allocation14 + $0x12c] ss:$16 sps:$4 sm:$0xff]  }
 0x528   :  { %7423 = vmatpush1.bf16.msra.mxu0 %v12359_v60  ;;  %v12530_v60 = vld [vmem:[#allocation14 + $0x128] ss:$16 sps:$4 sm:$0xff]  }
 0x529   :  { %7424 = vmatprep.subr.bf16.mxu0 %v12364_v47  ;;  %v12538_v47 = vld [vmem:[#allocation14 + $0x14c] ss:$16 sps:$4 sm:$0xff]  }
 0x52c   :  { %7425 = vmatpush1.bf16.msra.mxu0 %v12362_v62  ;;  %v12536_v62 = vld [vmem:[#allocation14 + $0x148] ss:$16 sps:$4 sm:$0xff]  }
 0x52d   :  { %7426 = vmatprep.subr.bf16.mxu0 %v12367_v43  ;;  %v12544_v43 = vld [vmem:[#allocation14 + $0x16c] ss:$16 sps:$4 sm:$0xff]  }
 0x530   :  { %7427 = vmatpush1.bf16.msra.mxu0 %v12365_v56  ;;  %v12542_v56 = vld [vmem:[#allocation14 + $0x168] ss:$16 sps:$4 sm:$0xff]  }
 0x531   :  { %7428 = vmatprep.subr.bf16.mxu0 %v12370_v51  ;;  %v12550_v51 = vld [vmem:[#allocation14 + $0x18c] ss:$16 sps:$4 sm:$0xff]  }
 0x533   :  { %v10850_v37 = vpop.f32.mrb[56].mxu1 }
 0x534   :  { %v10851_v4 = vpop.f32.mrb[57].mxu1  ;;  %7429 = vmatpush1.bf16.msra.mxu0 %v12368_v7  ;;  %v12548_v7 = vld [vmem:[#allocation14 + $0x188] ss:$16 sps:$4 sm:$0xff]  }
 0x535   :  { %v10852_v14 = vadd.f32 %v10851_v4, %v10850_v37  ;;  %v10853_v29 = vpop.f32.mrb[58].mxu1  ;;  %7430 = vmatprep.subr.bf16.mxu0 %v12373_v3  ;;  %v12556_v3 = vld [vmem:[#allocation14 + $0x1ac] ss:$16 sps:$4 sm:$0xff]   ;;  %v12554_v37 = vld [vmem:[#allocation14 + $0x1a8] ss:$16 sps:$4 sm:$0xff]  }
 0x536   :  { %v10854_v5 = vpop.f32.mrb[59].mxu1  ;;  %v12611_v4 = vld [vmem:[#allocation10] sm:$0xff] }
 0x537   :  { %v13337_v30 = vadd.f32 %v10852_v14, %v7734_v21  ;;  %v12514_v21 = vld [vmem:[#allocation14 + $0xcc] ss:$16 sps:$4 sm:$0xff]   ;;  %v1855_v14 = vrot.slane %v12611_v4, %v13144_v44 }
 0x538   :  { %7431 = vmatpush1.bf16.msra.mxu0 %v12371_v8  ;;  %v1851_v8 = vrot.slane %v12611_v4, %v13165_v18  ;;  %v12457_v44 = vld [vmem:[#allocation11 + $0x324] ss:$8 sps:$4 sm:$0xff]   ;;  %v12455_v18 = vld [vmem:[#allocation11 + $0x320] ss:$8 sps:$4 sm:$0xff]  }
 0x539   :  { %7432 = vmatprep.subr.bf16.mxu0 %v12376_v10  ;;  %v7785_v46 = vmax.f32 %v13337_v30, 0.0  ;;  %v12499_v30 = vld [vmem:[#allocation14 + $0x84] ss:$16 sps:$4 sm:$0xff]   ;;  %v12557_v4 = vld [vmem:[#allocation14 + $0x1c0] ss:$16 sps:$4 sm:$0xff]  }
 0x53c   :  { %7433 = vmatpush1.bf16.msra.mxu0 %v12374_v19 }
 0x53d   :  { %7434 = vmatprep.subr.bf16.mxu0 %v12379_v50 }
 0x540   :  { %7435 = vmatpush1.bf16.msra.mxu0 %v12377_v22 }
 0x541   :  { %7436 = vmatprep.subr.bf16.mxu0 %v12382_v61 }
 0x544   :  { %7437 = vmatpush1.bf16.msra.mxu0 %v12380_v31 }
 0x545   :  { %7438 = vmatprep.subr.bf16.mxu0 %v12385_v6 }
 0x548   :  { %7439 = vmatpush1.bf16.msra.mxu0 %v12383_v26  ;;  %v12449_v26 = vld [vmem:[#allocation11 + $0x300] ss:$8 sps:$4 sm:$0xff]  }
 0x549   :  { %7440 = vmatprep.subr.bf16.mxu0 %v12388_v12 }
 0x54c   :  { %7441 = vmatpush1.bf16.msra.mxu0 %v12386_v36  ;;  %v12454_v36 = vld [vmem:[#allocation11 + $0x314] ss:$8 sps:$4 sm:$0xff]  }
 0x54d   :  { %7442 = vmatprep.subr.bf16.mxu0 %v12391_v13  ;;  %v12452_v13 = vld [vmem:[#allocation11 + $0x310] ss:$8 sps:$4 sm:$0xff]  }
 0x550   :  { %7443 = vmatpush1.bf16.msra.mxu0 %v12389_v16  ;;  %v12460_v16 = vld [vmem:[#allocation11 + $0x334] ss:$8 sps:$4 sm:$0xff]  }
 0x551   :  { %7444 = vmatprep.subr.bf16.mxu0 %v12394_v15  ;;  %v12458_v15 = vld [vmem:[#allocation11 + $0x330] ss:$8 sps:$4 sm:$0xff]  }
 0x554   :  { %7445 = vmatpush1.bf16.msra.mxu0 %v12392_v52  ;;  %v12463_v52 = vld [vmem:[#allocation11 + $0x344] ss:$8 sps:$4 sm:$0xff]  }
 0x555   :  { %7446 = vmatprep.subr.bf16.mxu0 %v12397_v54  ;;  %v12461_v54 = vld [vmem:[#allocation11 + $0x340] ss:$8 sps:$4 sm:$0xff]  }
 0x558   :  { %7447 = vmatpush1.bf16.msra.mxu0 %v12395_v25  ;;  %v12466_v25 = vld [vmem:[#allocation11 + $0x354] ss:$8 sps:$4 sm:$0xff]  }
 0x559   :  { %7448 = vmatprep.subr.bf16.mxu0 %v12400_v1  ;;  %v12464_v1 = vld [vmem:[#allocation11 + $0x350] ss:$8 sps:$4 sm:$0xff]  }
 0x55c   :  { %7449 = vmatpush1.bf16.msra.mxu0 %v12398_v2  ;;  %v12469_v2 = vld [vmem:[#allocation11 + $0x364] ss:$8 sps:$4 sm:$0xff]  }
 0x55d   :  { %9092 = vmatprep.subr.bf16.mxu0 %v12478_v32  ;;  %v12481_v32 = vld [vmem:[#allocation14 + $0x24] ss:$16 sps:$4 sm:$0xff]  }
 0x55f   :  { %7451 = vmatmul.mubr.bf16.vlgmr.msra.gmra.mrb[12].mxu0 %v13260_v55  ;;  %v12488_v55 = vld [vmem:[#allocation14 + $0x48] ss:$16 sps:$4 sm:$0xff]  }
 0x560   :  { %9093 = vmatpush1.bf16.msra.mxu0 %v12476_v27  ;;  %v7792_v27 = vpack.c.bf16 %v7785_v46, %v7785_v46  ;;  %v12578_v46 = vld [vmem:[%s13471_s9 + $0xd0] sm:$0xff]  }
 0x561   :  { %9094 = vmatprep.subr.bf16.mxu0 %v12484_v33  ;;  %v12479_v33 = vld [vmem:[#allocation14 + $0x20] ss:$16 sps:$4 sm:$0xff]  }
 0x564   :  { %9095 = vmatpush1.bf16.msra.mxu0 %v12482_v57  ;;  %v12487_v57 = vld [vmem:[#allocation14 + $0x44] ss:$16 sps:$4 sm:$0xff]  }
 0x565   :  { %9096 = vmatprep.subr.bf16.mxu0 %v12490_v17  ;;  %v12485_v17 = vld [vmem:[#allocation14 + $0x40] ss:$16 sps:$4 sm:$0xff]  }
 0x568   :  { %9097 = vmatpush1.bf16.msra.mxu0 %v12488_v55  ;;  %v12493_v55 = vld [vmem:[#allocation14 + $0x64] ss:$16 sps:$4 sm:$0xff]  }
 0x569   :  { %9098 = vmatprep.subr.bf16.mxu0 %v12496_v28  ;;  %v12491_v28 = vld [vmem:[#allocation14 + $0x60] ss:$16 sps:$4 sm:$0xff]  }
 0x56c   :  { %9099 = vmatpush1.bf16.msra.mxu0 %v12494_v35  ;;  %v12497_v35 = vld [vmem:[#allocation14 + $0x80] ss:$16 sps:$4 sm:$0xff]  }
 0x56d   :  { %9100 = vmatprep.subr.bf16.mxu0 %v12502_v48  ;;  %v12505_v48 = vld [vmem:[#allocation14 + $0xa4] ss:$16 sps:$4 sm:$0xff]  }
 0x570   :  { %9101 = vmatpush1.bf16.msra.mxu0 %v12500_v39  ;;  %v12503_v39 = vld [vmem:[#allocation14 + $0xa0] ss:$16 sps:$4 sm:$0xff]  }
 0x571   :  { %9102 = vmatprep.subr.bf16.mxu0 %v12508_v40  ;;  %v12511_v40 = vld [vmem:[#allocation14 + $0xc4] ss:$16 sps:$4 sm:$0xff]  }
 0x574   :  { %9103 = vmatpush1.bf16.msra.mxu0 %v12506_v41  ;;  %v12509_v41 = vld [vmem:[#allocation14 + $0xc0] ss:$16 sps:$4 sm:$0xff]  }
 0x575   :  { %9104 = vmatprep.subr.bf16.mxu0 %v12514_v21  ;;  %v12517_v21 = vld [vmem:[#allocation14 + $0xe4] ss:$16 sps:$4 sm:$0xff]  }
 0x578   :  { %9105 = vmatpush1.bf16.msra.mxu0 %v12512_v49  ;;  %v12515_v49 = vld [vmem:[#allocation14 + $0xe0] ss:$16 sps:$4 sm:$0xff]  }
 0x579   :  { %9106 = vmatprep.subr.bf16.mxu0 %v12520_v34  ;;  %v12523_v34 = vld [vmem:[#allocation14 + $0x104] ss:$16 sps:$4 sm:$0xff]  }
 0x57c   :  { %9107 = vmatpush1.bf16.msra.mxu0 %v12518_v42  ;;  %v12521_v42 = vld [vmem:[#allocation14 + $0x100] ss:$16 sps:$4 sm:$0xff]  }
 0x57d   :  { %9108 = vmatprep.subr.bf16.mxu0 %v12526_v63  ;;  %v12529_v63 = vld [vmem:[#allocation14 + $0x124] ss:$16 sps:$4 sm:$0xff]  }
 0x580   :  { %9109 = vmatpush1.bf16.msra.mxu0 %v12524_v59  ;;  %v12527_v59 = vld [vmem:[#allocation14 + $0x120] ss:$16 sps:$4 sm:$0xff]  }
 0x581   :  { %9110 = vmatprep.subr.bf16.mxu0 %v12532_v58  ;;  %v12535_v58 = vld [vmem:[#allocation14 + $0x144] ss:$16 sps:$4 sm:$0xff]  }
 0x584   :  { %9111 = vmatpush1.bf16.msra.mxu0 %v12530_v60  ;;  %v12533_v60 = vld [vmem:[#allocation14 + $0x140] ss:$16 sps:$4 sm:$0xff]  }
 0x585   :  { %9112 = vmatprep.subr.bf16.mxu0 %v12538_v47  ;;  %v12541_v47 = vld [vmem:[#allocation14 + $0x164] ss:$16 sps:$4 sm:$0xff]  }
 0x588   :  { %9113 = vmatpush1.bf16.msra.mxu0 %v12536_v62  ;;  %v12539_v62 = vld [vmem:[#allocation14 + $0x160] ss:$16 sps:$4 sm:$0xff]  }
 0x589   :  { %9114 = vmatprep.subr.bf16.mxu0 %v12544_v43  ;;  %v12547_v43 = vld [vmem:[#allocation14 + $0x184] ss:$16 sps:$4 sm:$0xff]  }
 0x58c   :  { %9115 = vmatpush1.bf16.msra.mxu0 %v12542_v56  ;;  %v12545_v56 = vld [vmem:[#allocation14 + $0x180] ss:$16 sps:$4 sm:$0xff]  }
 0x58d   :  { %9116 = vmatprep.subr.bf16.mxu0 %v12550_v51  ;;  %v12553_v51 = vld [vmem:[#allocation14 + $0x1a4] ss:$16 sps:$4 sm:$0xff]  }
 0x590   :  { %9117 = vmatpush1.bf16.msra.mxu0 %v12548_v7  ;;  %v12551_v7 = vld [vmem:[#allocation14 + $0x1a0] ss:$16 sps:$4 sm:$0xff]  }
 0x591   :  { %9118 = vmatprep.subr.bf16.mxu0 %v12556_v3  ;;  %v12559_v3 = vld [vmem:[#allocation14 + $0x1c4] ss:$16 sps:$4 sm:$0xff]  }
 0x594   :  { %9119 = vmatpush1.bf16.msra.mxu0 %v12554_v37  ;;  %v12562_v37 = vld [vmem:[#allocation14 + $0x1cc] ss:$16 sps:$4 sm:$0xff]  }
 0x595   :  { %9120 = vmatprep.subr.bf16.mxu0 %v12562_v37 }
 0x632   :  { %v7452_v29 = vpop.f32.mrb[12].mxu0 }
 0x633   :  { %v10904_v10 = vadd.f32 %v7452_v29, %v1851_v8  ;;  %v7454_v5 = vpop.f32.mrb[13].mxu0  ;;  %v12560_v8 = vld [vmem:[#allocation14 + $0x1c8] ss:$16 sps:$4 sm:$0xff]   ;;  %v12568_v29 = vld [vmem:[#allocation14 + $0x1ec] ss:$16 sps:$4 sm:$0xff]  }
 0x634   :  { %v10905_v19 = vadd.f32 %v7454_v5, %v1855_v14  ;;  %v7456_v50 = vpop.f32.mrb[14].mxu0  ;;  %9121 = vmatpush1.bf16.msra.mxu0 %v12560_v8  ;;  %v12565_v14 = vld [vmem:[#allocation14 + $0x1e4] ss:$16 sps:$4 sm:$0xff]   ;;  %v12566_v5 = vld [vmem:[#allocation14 + $0x1e8] ss:$16 sps:$4 sm:$0xff]  }
 0x635   :  { %v7783_v22 = vmax.f32 %v10904_v10, 0.0  ;;  %v7457_v61 = vpop.f32.mrb[15].mxu0  ;;  %v12563_v10 = vld [vmem:[#allocation14 + $0x1e0] ss:$16 sps:$4 sm:$0xff]   ;;  %9122 = vmatprep.subr.bf16.mxu0 %v12568_v29 }
 0x636   :  { %v7784_v31 = vmax.f32 %v10905_v19, 0.0  ;;  %v12569_v19 = vld [vmem:[%s13471_s9 + $0x40] sm:$0xff]  }
 0x637   :  { %v7790_v12 = vpack.c.bf16 %v7783_v22, %v7783_v22  ;;  %v12570_v50 = vld [vmem:[%s13471_s9 + $0xc0] sm:$0xff]  }
 0x638   :  { %v7791_v6 = vpack.c.bf16 %v7784_v31, %v7784_v31  ;;  %9123 = vmatpush1.bf16.msra.mxu0 %v12566_v5  ;;  %v7905_v22 = vld [vmem:[#allocation13] sm:$0x3] }
 0x639   :  { %10878 = vmatprep.subr.bf16.mxu0 %v12570_v50  ;;  %v7910_v61 = vrot.slane %v7905_v22, %v13098_v9  ;;  %v7914_v31 = vrot.slane %v7905_v22, %v13103_v11 }
 0x63a   :  { %8591 = vmatprep.mubr.bf16.mxu1 %v7791_v6 }
 0x63b   :  { %8592 = vmatmul.mubr.bf16.vlgmr.msra.gmra.mrb[60].mxu1 %v7790_v12 }
 0x63c   :  { %8601 = vmatpush1.bf16.msra.mxu1 %v12449_v26  ;;  %8632 = vmatprep.mubr.bf16.mxu1 %v12886_v0  ;;  %v12467_v0 = vld [vmem:[#allocation11 + $0x360] ss:$8 sps:$4 sm:$0xff]  }
 0x63d   :  { %8602 = vmatprep.subr.bf16.mxu1 %v12454_v36 }
 0x640   :  { %8603 = vmatpush1.bf16.msra.mxu1 %v12452_v13 }
 0x641   :  { %8604 = vmatprep.subr.bf16.mxu1 %v12457_v44 }
 0x644   :  { %8605 = vmatpush1.bf16.msra.mxu1 %v12455_v18 }
 0x645   :  { %8606 = vmatprep.subr.bf16.mxu1 %v12460_v16 }
 0x648   :  { %8607 = vmatpush1.bf16.msra.mxu1 %v12458_v15 }
 0x649   :  { %8608 = vmatprep.subr.bf16.mxu1 %v12463_v52  ;;  %v12571_v52 = vld [vmem:[%s13471_s9] sm:$0xff]  }
 0x64c   :  { %8609 = vmatpush1.bf16.msra.mxu1 %v12461_v54  ;;  %v12572_v54 = vld [vmem:[%s13471_s9 + $0x80] sm:$0xff]  }
 0x64d   :  { %8610 = vmatprep.subr.bf16.mxu1 %v12466_v25 }
 0x650   :  { %8611 = vmatpush1.bf16.msra.mxu1 %v12464_v1  ;;  %v12573_v1 = vld [vmem:[%s13471_s9 + $0x48] sm:$0xff]  }
 0x651   :  { %8612 = vmatprep.subr.bf16.mxu1 %v12469_v2  ;;  %v12574_v2 = vld [vmem:[%s13471_s9 + $0xc8] sm:$0xff]  }
 0x654   :  { %8613 = vmatpush1.bf16.msra.mxu1 %v12467_v0  ;;  %v12575_v0 = vld [vmem:[%s13471_s9 + $0x8] sm:$0xff]  }
 0x655   :  { %8614 = vmatprep.subr.bf16.mxu1 %v12472_v45  ;;  %v12576_v45 = vld [vmem:[%s13471_s9 + $0x88] sm:$0xff]  }
 0x658   :  { %8615 = vmatpush1.bf16.msra.mxu1 %v12470_v23  ;;  %v12577_v23 = vld [vmem:[%s13471_s9 + $0x50] sm:$0xff]  }
 0x659   :  { %9051 = vmatprep.subr.bf16.mxu1 %v12475_v24  ;;  %v12579_v24 = vld [vmem:[%s13471_s9 + $0x10] sm:$0xff]  }
 0x65b   :  { %8633 = vmatmul.mubr.bf16.vlgmr.msra.gmra.mrb[60].mxu1 %v7792_v27  ;;  %v12581_v27 = vld [vmem:[%s13471_s9 + $0x58] sm:$0xff]  }
 0x65c   :  { %9052 = vmatpush1.bf16.msra.mxu1 %v12473_v53  ;;  %v12580_v53 = vld [vmem:[%s13471_s9 + $0x90] sm:$0xff]  }
 0x65d   :  { %9053 = vmatprep.subr.bf16.mxu1 %v12481_v32  ;;  %v12582_v32 = vld [vmem:[%s13471_s9 + $0xd8] sm:$0xff]  }
 0x660   :  { %9054 = vmatpush1.bf16.msra.mxu1 %v12479_v33  ;;  %v12583_v33 = vld [vmem:[%s13471_s9 + $0x18] sm:$0xff]  }
 0x661   :  { %9055 = vmatprep.subr.bf16.mxu1 %v12487_v57  ;;  %v12584_v57 = vld [vmem:[%s13471_s9 + $0x98] sm:$0xff]  }
 0x664   :  { %9056 = vmatpush1.bf16.msra.mxu1 %v12485_v17  ;;  %v12585_v17 = vld [vmem:[%s13471_s9 + $0x60] sm:$0xff]  }
 0x665   :  { %9057 = vmatprep.subr.bf16.mxu1 %v12493_v55  ;;  %v12586_v55 = vld [vmem:[%s13471_s9 + $0xe0] sm:$0xff]  }
 0x668   :  { %9058 = vmatpush1.bf16.msra.mxu1 %v12491_v28  ;;  %v12587_v28 = vld [vmem:[%s13471_s9 + $0x20] sm:$0xff]  }
 0x669   :  { %9059 = vmatprep.subr.bf16.mxu1 %v12499_v30  ;;  %v12588_v30 = vld [vmem:[%s13471_s9 + $0xa0] sm:$0xff]  }
 0x66c   :  { %9060 = vmatpush1.bf16.msra.mxu1 %v12497_v35  ;;  %v12589_v35 = vld [vmem:[%s13471_s9 + $0x68] sm:$0xff]  }
 0x66d   :  { %9061 = vmatprep.subr.bf16.mxu1 %v12505_v48  ;;  %v12590_v48 = vld [vmem:[%s13471_s9 + $0xe8] sm:$0xff]  }
 0x670   :  { %9062 = vmatpush1.bf16.msra.mxu1 %v12503_v39  ;;  %v12591_v39 = vld [vmem:[%s13471_s9 + $0x28] sm:$0xff]  }
 0x671   :  { %9063 = vmatprep.subr.bf16.mxu1 %v12511_v40  ;;  %v12592_v40 = vld [vmem:[%s13471_s9 + $0xa8] sm:$0xff]  }
 0x674   :  { %9064 = vmatpush1.bf16.msra.mxu1 %v12509_v41  ;;  %v12593_v41 = vld [vmem:[%s13471_s9 + $0x70] sm:$0xff]  }
 0x675   :  { %9065 = vmatprep.subr.bf16.mxu1 %v12517_v21  ;;  %v12594_v21 = vld [vmem:[%s13471_s9 + $0xf0] sm:$0xff]  }
 0x678   :  { %9066 = vmatpush1.bf16.msra.mxu1 %v12515_v49  ;;  %v12595_v49 = vld [vmem:[%s13471_s9 + $0x30] sm:$0xff]  }
 0x679   :  { %9067 = vmatprep.subr.bf16.mxu1 %v12523_v34  ;;  %v12596_v34 = vld [vmem:[%s13471_s9 + $0xb0] sm:$0xff]  }
 0x67c   :  { %9068 = vmatpush1.bf16.msra.mxu1 %v12521_v42  ;;  %v12597_v42 = vld [vmem:[%s13471_s9 + $0x78] sm:$0xff]  }
 0x67d   :  { %9069 = vmatprep.subr.bf16.mxu1 %v12529_v63  ;;  %v12598_v63 = vld [vmem:[%s13471_s9 + $0xf8] sm:$0xff]  }
 0x680   :  { %9070 = vmatpush1.bf16.msra.mxu1 %v12527_v59  ;;  %v12599_v59 = vld [vmem:[%s13471_s9 + $0x38] sm:$0xff]  }
 0x681   :  { %9071 = vmatprep.subr.bf16.mxu1 %v12535_v58  ;;  %v12600_v58 = vld [vmem:[%s13471_s9 + $0xb8] sm:$0xff]   ;;  %s12887_s9 = smov 120  }
 0x684   :  { %9072 = vmatpush1.bf16.msra.mxu1 %v12533_v60  ;;  %v8709_v60 = vld [vmem:[#allocation16] sm:$0xf] }
 0x685   :  { %9073 = vmatprep.subr.bf16.mxu1 %v12541_v47  ;;  %v8714_v47 = vrot.slane %v8709_v60, %v13098_v9 }
 0x688   :  { %9074 = vmatpush1.bf16.msra.mxu1 %v12539_v62  ;;  %v8722_v62 = vrot.slane %v8709_v60, %v13141_v38 }
 0x689   :  { %9075 = vmatprep.subr.bf16.mxu1 %v12547_v43  ;;  %v8718_v43 = vrot.slane %v8709_v60, %v13103_v11 }
 0x68c   :  { %9076 = vmatpush1.bf16.msra.mxu1 %v12545_v56  ;;  %v8726_v56 = vrot.slane %v8709_v60, %v13110_v20 }
 0x68d   :  { %9077 = vmatprep.subr.bf16.mxu1 %v12553_v51 }
 0x690   :  { %9078 = vmatpush1.bf16.msra.mxu1 %v12551_v7 }
 0x691   :  { %9079 = vmatprep.subr.bf16.mxu1 %v12559_v3 }
 0x694   :  { %9080 = vmatpush1.bf16.msra.mxu1 %v12557_v4 }
 0x695   :  { %9081 = vmatprep.subr.bf16.mxu1 %v12565_v14 }
 0x698   :  { %9082 = vmatpush1.bf16.msra.mxu1 %v12563_v10 }
 0x699   :  { %10856 = vmatprep.subr.bf16.mxu1 %v12569_v19 }
 0x72e   :  { %v8634_v6 = vpop.f32.mrb[60].mxu1 }
 0x72f   :  { %v10906_v26 = vadd.f32 %v8634_v6, %v7910_v61  ;;  %v8636_v12 = vpop.f32.mrb[61].mxu1 }
 0x730   :  { %v10907_v36 = vadd.f32 %v8636_v12, %v7914_v31  ;;  %v8638_v13 = vpop.f32.mrb[62].mxu1 }
 0x731   :  { %v8641_v44 = vmax.f32 %v10906_v26, 0.0  ;;  %v8639_v18 = vpop.f32.mrb[63].mxu1 }
 0x732   :  { %v8642_v16 = vmax.f32 %v10907_v36, 0.0  ;;  %v10647_v36 = vld [vmem:[#allocation17] ss:$0 sm:$0xff] }
 0x733   :  { %v8643_v25 = vpack.c.bf16 %v8641_v44, %v8641_v44 }
 0x734   :  { %v8644_v15 = vpack.c.bf16 %v8642_v16, %v8642_v16 }
 0x736   :  { %9083 = vmatprep.mubr.bf16.mxu1 %v8644_v15  ;;  %9124 = vmatprep.mubr.bf16.mxu0 %v8644_v15 }
 0x737   :  { %9084 = vmatmul.mubr.bf16.vlgmr.msra.gmra.mrb[64].mxu1 %v8643_v25  ;;  %9125 = vmatmul.mubr.bf16.vlgmr.msra.gmra.mrb[16].mxu0 %v8643_v25 }
 0x738   :  { %10857 = vmatpush3.bf16.msra.mxu1 %v12571_v52  ;;  %10879 = vmatpush3.bf16.msra.mxu0 %v12572_v54 }
 0x739   :  { %10858 = vmatprep.subr.bf16.mxu1 %v12573_v1  ;;  %10880 = vmatprep.subr.bf16.mxu0 %v12574_v2 }
 0x73c   :  { %10859 = vmatpush3.bf16.msra.mxu1 %v12575_v0  ;;  %10881 = vmatpush3.bf16.msra.mxu0 %v12576_v45 }
 0x73d   :  { %10860 = vmatprep.subr.bf16.mxu1 %v12577_v23  ;;  %10882 = vmatprep.subr.bf16.mxu0 %v12578_v46 }
 0x740   :  { %10861 = vmatpush3.bf16.msra.mxu1 %v12579_v24  ;;  %10883 = vmatpush3.bf16.msra.mxu0 %v12580_v53 }
 0x741   :  { %10862 = vmatprep.subr.bf16.mxu1 %v12581_v27  ;;  %10884 = vmatprep.subr.bf16.mxu0 %v12582_v32 }
 0x744   :  { %10863 = vmatpush3.bf16.msra.mxu1 %v12583_v33  ;;  %10885 = vmatpush3.bf16.msra.mxu0 %v12584_v57 }
 0x745   :  { %10864 = vmatprep.subr.bf16.mxu1 %v12585_v17  ;;  %10886 = vmatprep.subr.bf16.mxu0 %v12586_v55 }
 0x748   :  { %10865 = vmatpush3.bf16.msra.mxu1 %v12587_v28  ;;  %10887 = vmatpush3.bf16.msra.mxu0 %v12588_v30 }
 0x749   :  { %10866 = vmatprep.subr.bf16.mxu1 %v12589_v35  ;;  %10888 = vmatprep.subr.bf16.mxu0 %v12590_v48 }
 0x74c   :  { %10867 = vmatpush3.bf16.msra.mxu1 %v12591_v39  ;;  %10889 = vmatpush3.bf16.msra.mxu0 %v12592_v40 }
 0x74d   :  { %10868 = vmatprep.subr.bf16.mxu1 %v12593_v41  ;;  %10890 = vmatprep.subr.bf16.mxu0 %v12594_v21 }
 0x750   :  { %10869 = vmatpush3.bf16.msra.mxu1 %v12595_v49  ;;  %10891 = vmatpush3.bf16.msra.mxu0 %v12596_v34 }
 0x751   :  { %10870 = vmatprep.subr.bf16.mxu1 %v12597_v42  ;;  %10892 = vmatprep.subr.bf16.mxu0 %v12598_v63 }
 0x754   :  { %10871 = vmatpush3.bf16.msra.mxu1 %v12599_v59  ;;  %10893 = vmatpush3.bf16.msra.mxu0 %v12600_v58 }
 0x80a   :  { %v9085_v51 = vpop.f32.mrb[64].mxu1  ;;  %v9126_v7 = vpop.f32.mrb[16].mxu0 }
 0x80b   :  { %v9086_v3 = vadd.f32 %v9085_v51, %v8714_v47  ;;  %v9127_v37 = vadd.f32 %v9126_v7, %v8722_v62  ;;  %v9087_v4 = vpop.f32.mrb[65].mxu1  ;;  %v9128_v8 = vpop.f32.mrb[17].mxu0 }
 0x80c   :  { %v9088_v14 = vadd.f32 %v9087_v4, %v8718_v43  ;;  %v9129_v29 = vadd.f32 %v9128_v8, %v8726_v56  ;;  %v9089_v10 = vpop.f32.mrb[66].mxu1  ;;  %v9130_v5 = vpop.f32.mrb[18].mxu0 }
 0x80d   :  { %v9133_v19 = vmax.f32 %v9086_v3, 0.0  ;;  %v9135_v50 = vmax.f32 %v9127_v37, 0.0  ;;  %v9090_v22 = vpop.f32.mrb[67].mxu1  ;;  %v9131_v9 = vpop.f32.mrb[19].mxu0 }
 0x80e   :  { %v9134_v61 = vmax.f32 %v9088_v14, 0.0  ;;  %v9136_v38 = vmax.f32 %v9129_v29, 0.0 }
 0x80f   :  { %v9137_v6 = vpack.c.bf16 %v9133_v19, %v9133_v19  ;;  %v9139_v20 = vpack.c.bf16 %v9135_v50, %v9135_v50 }
 0x810   :  { %v9138_v31 = vpack.c.bf16 %v9134_v61, %v9134_v61  ;;  %v9140_v11 = vpack.c.bf16 %v9136_v38, %v9136_v38 }
 0x812   :  { %9436 = vmatprep.mubr.bf16.mxu1 %v9138_v31  ;;  %9476 = vmatprep.mubr.bf16.mxu0 %v9140_v11 }
 0x813   :  { %9437 = vmatmul.mubr.bf16.vlgmr.msra.gmra.mrb[68].mxu1 %v9137_v6  ;;  %9477 = vmatmul.mubr.bf16.vlgmr.msra.gmra.mrb[20].mxu0 %v9139_v20 }
 0x8e6   :  { %v10872_v26 = vpop.f32.mrb[68].mxu1  ;;  %v10894_v12 = vpop.f32.mrb[20].mxu0 }
 0x8e7   :  { %v10873_v13 = vpop.f32.mrb[69].mxu1  ;;  %v10895_v44 = vpop.f32.mrb[21].mxu0 }
 0x8e8   :  { %v10874_v18 = vadd.f32 %v10873_v13, %v10872_v26  ;;  %v10896_v16 = vadd.f32 %v10895_v44, %v10894_v12  ;;  %v10875_v15 = vpop.f32.mrb[70].mxu1  ;;  %v10897_v52 = vpop.f32.mrb[22].mxu0 }
 0x8e9   :  { %v10876_v54 = vpop.f32.mrb[71].mxu1  ;;  %v10898_v25 = vpop.f32.mrb[23].mxu0 }
 0x8ea   :  { %v9439_v1 = vadd.f32 %v10874_v18, %v10647_v36 }
 0x8ec   :  { %v9479_v2 = vadd.f32 %v10896_v16, %v9439_v1 }
 0x8ee   :  { %v9497_v0 = vsel %vm9496_vm1, %v9479_v2, -inf  ;;  %v9485_v45 = vsel %vm9484_vm2, %v9479_v2, -inf }
 0x8ef   :  { %9498 = vmax.xlane.f32.xlu0 %v9497_v0 }
 0x8f3   :  { %9486 = vmax.xlane.f32.xlu0 %v9485_v45 }
 0x97c   :  { %v9499_v23 = vpop.xlane.xlu0 %9498 }
 0x97d   :  { %v9500_v46 = vsub.f32 %v9479_v2, %v9499_v23 }
 0x97f   :  { %v9501_v24 = vmul.f32 1.442695, %v9500_v46 }
 0x980   :  { %v9487_v27 = vpop.xlane.xlu0 %9486 }
 0x981   :  { %12601 = vpow2.f32 %v9501_v24  ;;  %v9488_v32 = vsub.f32 %v9479_v2, %v9487_v27 }
 0x983   :  { %v9489_v33 = vmul.f32 1.442695, %v9488_v32 }
 0x985   :  { %12603 = vpow2.f32 %v9489_v33 }
 0x98b   :  { %v12602_v53 = vpop.eup %12601 }
 0x98c   :  { %9504 = vrot.lane.b32.xlu1 %v12602_v53, %s12887_s9 }
 0x98f   :  { %v12604_v57 = vpop.eup %12603 }
 0x990   :  { %v9491_v17 = vsel %vm9484_vm2, %v12604_v57, 0.0 }
 0x9b0   :  { %9492 = vadd.xlane.f32.xlu1 %v9491_v17 }
 0x9fe   :  { %v9505_v55 = vpop.permute.xlu1 %9504 }
 0x9ff   :  { %v9507_v28 = vsel %vm9484_vm2, %v9505_v55, 0.0 }
 0xa00   :  { %9508 = vadd.xlane.f32.xlu0 %v9507_v28 }
 0xa3d   :  { %v9493_v30 = vpop.xlane.xlu1 %9492 }
 0xa3e   :  { %12605 = vrcp.f32 %v9493_v30 }
 0xa48   :  { %v12606_v48 = vpop.eup %12605 }
 0xa49   :  { %v9495_v40 = vmul.f32 %v12606_v48, %v12604_v57 }
 0xa8d   :  { %v9509_v35 = vpop.xlane.xlu0 %9508 }
 0xa8e   :  { %12607 = vrcp.f32 %v9509_v35 }
 0xa98   :  { %v12608_v39 = vpop.eup %12607 }
 0xa99   :  { %v9511_v41 = vmul.f32 %v12608_v39, %v12602_v53 }
 0xa9b   :  { %v9512_v21 = vsel %vm9484_vm2, %v9495_v40, %v9511_v41 }
 0xa9c   :  { %9514 = vst.msk [vmem:[#allocation19] sm:$0xff] %vm9513_vm3, %v9512_v21 }
 0xa9d   :  { %12843 = shalt.err (!%p12840_p0)
}
 0xa9e   :  { %s12844_s20 = scalar_lea.hbm %s13473_s11, 128 }
 0xa9f   :  { %p12845_p1 = scmp.ne.s32.totalorder %s13473_s11, %s12844_s20  ;;  %p12848_p2 = scmp.lt.u32.totalorder %s12844_s20, %s13473_s11 }
 0xaa1   :  { %p12850_p3 = pnand %p12848_p2, %p12845_p1 }
 0xaa3   :  { %12853 = shalt.err (!%p12850_p3)
}
 0xaa4   :  { %9524 = dma.vmem_to_hbm [thread:$0]  %s9522_s15, 128, %s13473_s11, [#allocation4]  }
 0xaa5   :  { %12866 = dma.done.wait [#allocation4], 128  }
 0xaa6   :  { %12867 = vsyncadd [#allocation4], 4294967168 }
 0xaa7   :  { %9528 = vsyncpa [#allocation3], 1 }
 0xaa8   :  { %9529 = vsyncpa [#allocation6], 1 }
 0xaa9   :  { %9530 = vsyncpa [#allocation9], 1 }
 0xaaa   :  { %9531 = vsyncpa [#allocation12], 1 }
 0xaab   :  { %9532 = vsyncpa [#allocation15], 1 }
 0xaac   :  { %9533 = vsyncpa [#allocation18], 1 }
 0xaad   :  { %9534 = vsyncpa [#allocation4], 1 }

</bundles_post_ra>
